<compile_context>
chip_gen: v7x
topology: tpu7x:2x2x1
jax: 0.10.0
libtpu: 0.0.40
codegen_flags: <defaults>
</compile_context>

<pallas_src>
import jax
import jax.numpy as jnp
from jax import lax
from jax.experimental import pallas as pl
from jax.experimental.pallas import tpu as pltpu


_SQRT_2_OVER_PI = 0.7978845608028654
_ROW_GRAN = 256          # MXU result-row granularity (v6e/v7x); multiple of 128 (v5e)
_HIDDEN = (512, 256, 256, 128, 128)


def _gelu2(x):
    # 2 * gelu(x) with the tanh approximation; the 0.5 factor is folded into
    # the NEXT layer's weights in prepare_params().
    # TODO(synk): PyTorch's default F.gelu is erf-exact; erf is not reliably
    # lowerable inside Mosaic, so the tanh approximation (max abs deviation
    # ~1e-3) is used instead.
    return x + x * jnp.tanh(_SQRT_2_OVER_PI * (x + 0.044715 * x * x * x))


def _fused_mlp_kernel(xc_ref,
                      w1_ref, b1_ref, w2_ref, b2_ref, w3_ref, b3_ref,
                      w4_ref, b4_ref, w5_ref, b5_ref, w6t_ref, b6t_ref,
                      o_ref):
    f32 = jnp.float32
    bf16 = jnp.bfloat16

    def layer(h_bf16, w_ref, b_ref):
        # bf16 MXU inputs, f32 accumulation, f32 GELU, bf16 for the next dot.
        z = jnp.dot(h_bf16, w_ref[...], preferred_element_type=f32) + b_ref[...]
        return _gelu2(z).astype(bf16)

    # TODO(synk): dropout layers are inference-mode identity here; training-mode
    # dropout (PRNG masking via pltpu.prng_*) is not implemented.
    h = layer(xc_ref[...], w1_ref, b1_ref)     # single K=3D dot (concat fused in wrapper)
    h = layer(h, w2_ref, b2_ref)
    h = layer(h, w3_ref, b3_ref)
    h = layer(h, w4_ref, b4_ref)
    h = layer(h, w5_ref, b5_ref)               # (tm, 128) bf16, == 2*gelu(z5)

    # Final 128 -> 1 layer, computed transposed so the tm per-row scalars land
    # on lanes:  yT[o, r] = sum_k w6t[o, k] * h[r, k]   (rows 1..7 of w6t are 0).
    yT = lax.dot_general(w6t_ref[...], h, (((1,), (1,)), ((), ())),
                         preferred_element_type=f32) + b6t_ref[...]
    o_ref[...] = yT.astype(o_ref.dtype)        # lane-dense (8, tm) store


def prepare_params(params):
    """One-time conversion of PyTorch-layout params (W: (out, in), b: (out,)):
       - transpose every weight to (in, out) and cast to bf16,
       - fold the preceding GELU's 0.5 factor into W2..W6,
       - re-layout the final (1, 128) weight / (1,) bias as zero-padded
         (8, 128)/(8, 1) transposed slabs (lane-dense packed output),
       - keep biases in f32, shape (1, out).
    Returns a flat tuple in kernel argument order."""
    f32, bf16 = jnp.float32, jnp.bfloat16

    def w_t(name, scale=1.0):
        return (scale * params[name].astype(f32)).T.astype(bf16)

    def b_row(name):
        return params[name].astype(f32).reshape(1, -1)

    w1, b1 = w_t("w1"), b_row("b1")
    w2, b2 = w_t("w2", 0.5), b_row("b2")
    w3, b3 = w_t("w3", 0.5), b_row("b3")
    w4, b4 = w_t("w4", 0.5), b_row("b4")
    w5, b5 = w_t("w5", 0.5), b_row("b5")
    w6_row = (0.5 * params["w6"].astype(f32))[0]                       # (128,)
    w6t = jnp.zeros((8, 128), bf16).at[0, :].set(w6_row.astype(bf16))  # (8, 128)
    b6t = jnp.zeros((8, 1), f32).at[0, 0].set(params["b6"].astype(f32)[0])
    return (w1, b1, w2, b2, w3, b3, w4, b4, w5, b5, w6t, b6t)


def _choose_tm(m_aligned, tm_max):
    if m_aligned <= _ROW_GRAN:
        return m_aligned                       # tiny batch: one small tile (grid = 1)
    # Large batch: tiles are multiples of the MXU row granularity and the grid
    # gets >= 2 steps so v7x's two TensorCores both receive rows.
    half = pl.cdiv(m_aligned, 2)
    tm = pl.cdiv(half, _ROW_GRAN) * _ROW_GRAN
    return min(tm, tm_max)


def _vmem_limit_bytes(tm, d3, prepped):
    # Derived from the actual tile footprint (weights assumed double-buffered
    # as the worst case) with generous margin, clamped to stay well inside
    # v7x's 64 MiB physical VMEM.
    weight_bytes = sum(int(p.size) * p.dtype.itemsize for p in prepped)
    act_in = 2 * tm * d3 * 2                   # bf16 input block x 2 buffers
    act_out = 2 * 8 * tm * 4                   # f32 output block x 2 buffers
    inter = tm * sum(_HIDDEN) * 6              # f32 + bf16 live layer intermediates
    est = 2 * weight_bytes + act_in + act_out + inter
    return int(min(48 * 1024 * 1024, max(24 * 1024 * 1024, 2 * est)))


def fantasy_score_prediction(x, player_emb, match_emb, prepped, *, tm_max=1024):
    """x/player_emb/match_emb: (..., D).  prepped: output of prepare_params().
    Returns (..., 1) float32."""
    D = x.shape[-1]
    lead = x.shape[:-1]
    d3 = 3 * D

    # Fuse the concat and the bf16 cast of the MXU operand on the way in: layer 1
    # then runs as a single K=3D dot, and the kernel's input DMA bytes are halved.
    xc = jnp.concatenate(
        [x.reshape(-1, D), player_emb.reshape(-1, D), match_emb.reshape(-1, D)],
        axis=-1).astype(jnp.bfloat16)
    M = xc.shape[0]

    m_aligned = ((M + 15) // 16) * 16          # bf16 packs 16 rows per vreg
    tm = _choose_tm(m_aligned, tm_max)
    m_pad = pl.cdiv(m_aligned, tm) * tm
    if m_pad != M:
        xc = jnp.pad(xc, ((0, m_pad - M), (0, 0)))

    act_spec = pl.BlockSpec((tm, d3), lambda i: (i, 0))
    out_spec = pl.BlockSpec((8, tm), lambda i: (0, i))   # rows packed onto lanes

    def const_spec(shape, pipeline_mode):
        if pipeline_mode is None:
            return pl.BlockSpec(shape, lambda i: (0, 0))
        return pl.BlockSpec(shape, lambda i: (0, 0), pipeline_mode=pipeline_mode)

    def run(pipeline_mode):
        param_specs = [const_spec(p.shape, pipeline_mode) for p in prepped]
        return pl.pallas_call(
            _fused_mlp_kernel,
            out_shape=jax.ShapeDtypeStruct((8, m_pad), jnp.float32),
            grid_spec=pltpu.PrefetchScalarGridSpec(
                num_scalar_prefetch=0,
                grid=(m_pad // tm,),
                in_specs=[act_spec] + param_specs,
                out_specs=out_spec,
            ),
            compiler_params=pltpu.CompilerParams(
                dimension_semantics=("parallel",),
                vmem_limit_bytes=_vmem_limit_bytes(tm, d3, prepped),
            ),
        )(xc, *prepped)

    try:
        # Constant-index weights never change between grid steps: single-buffer
        # them (VMEM headroom, notably on v7x's 64 MiB).
        out = run(pl.Buffered(1))
    except Exception:
        # Fallback to default buffering if this jax build rejects pipeline_mode.
        out = run(None)

    y = out[0, :M].astype(jnp.float32)
    return y.reshape(*lead, 1)


if __name__ == "__main__":
    B, S, D = 2, 8, 64
    key = jax.random.PRNGKey(0)
    keys = jax.random.split(key, 20)

    x = jax.random.normal(keys[0], (B, S, D), dtype=jnp.float32)
    pe = jax.random.normal(keys[1], (B, S, D), dtype=jnp.float32)
    me = jax.random.normal(keys[2], (B, S, D), dtype=jnp.float32)

    # PyTorch-style init: U(-1/sqrt(fan_in), 1/sqrt(fan_in)), weights (out, in).
    layer_dims = [(3 * D, 512), (512, 256), (256, 256), (256, 128), (128, 128), (128, 1)]
    params = {}
    k = 3
    for idx, (fin, fout) in enumerate(layer_dims, start=1):
        bound = 1.0 / (fin ** 0.5)
        params[f"w{idx}"] = jax.random.uniform(keys[k], (fout, fin), jnp.float32, -bound, bound)
        params[f"b{idx}"] = jax.random.uniform(keys[k + 1], (fout,), jnp.float32, -bound, bound)
        k += 2

    prepped = prepare_params(params)

    def ref_forward(x_, pe_, me_, bf16_dots):
        """Plain-JAX reference. bf16_dots=True replicates the kernel's bf16-at-MXU
        semantics (f32 accumulation); False is the full-f32 PyTorch-equivalent math."""
        dt = jnp.bfloat16 if bf16_dots else jnp.float32
        h = jnp.concatenate([x_, pe_, me_], axis=-1).astype(dt)
        for i in range(1, 6):
            z = jnp.dot(h, params[f"w{i}"].T.astype(dt),
                        preferred_element_type=jnp.float32) + params[f"b{i}"]
            h = (0.5 * _gelu2(z)).astype(dt)
        return jnp.dot(h, params["w6"].T.astype(dt),
                       preferred_element_type=jnp.float32) + params["b6"]

    # --- Small-batch path: M = 16, single tile, grid = 1 ---
    y = jax.block_until_ready(fantasy_score_prediction(x, pe, me, prepped))
    assert y.shape == (B, S, 1), y.shape
    y_bf = ref_forward(x, pe, me, True)
    y_f32 = ref_forward(x, pe, me, False)
    assert jnp.allclose(y, y_bf, atol=1e-3, rtol=1e-3), float(jnp.max(jnp.abs(y - y_bf)))
    assert jnp.allclose(y, y_f32, atol=5e-2, rtol=5e-2), float(jnp.max(jnp.abs(y - y_f32)))

    # --- Larger-batch path: row padding, tm = 256, grid = 2, packed output ---
    B2, S2 = 3, 100
    x2 = jax.random.normal(keys[15], (B2, S2, D), dtype=jnp.float32)
    pe2 = jax.random.normal(keys[16], (B2, S2, D), dtype=jnp.float32)
    me2 = jax.random.normal(keys[17], (B2, S2, D), dtype=jnp.float32)
    y2 = jax.block_until_ready(fantasy_score_prediction(x2, pe2, me2, prepped))
    assert y2.shape == (B2, S2, 1), y2.shape
    y2_bf = ref_forward(x2, pe2, me2, True)
    assert jnp.allclose(y2, y2_bf, atol=1e-3, rtol=1e-3), float(jnp.max(jnp.abs(y2 - y2_bf)))

    print("KERNEL_OK")
</pallas_src>

<mosaic_0001>
module attributes {stable_mosaic.version = 11 : i64} {
  func.func @_fused_mlp_kernel(%arg0: i32, %arg1: memref<16x192xbf16, #tpu.memory_space<vmem>>, %arg2: memref<192x512xbf16, #tpu.memory_space<vmem>>, %arg3: memref<1x512xf32, #tpu.memory_space<vmem>>, %arg4: memref<512x256xbf16, #tpu.memory_space<vmem>>, %arg5: memref<1x256xf32, #tpu.memory_space<vmem>>, %arg6: memref<256x256xbf16, #tpu.memory_space<vmem>>, %arg7: memref<1x256xf32, #tpu.memory_space<vmem>>, %arg8: memref<256x128xbf16, #tpu.memory_space<vmem>>, %arg9: memref<1x128xf32, #tpu.memory_space<vmem>>, %arg10: memref<128x128xbf16, #tpu.memory_space<vmem>>, %arg11: memref<1x128xf32, #tpu.memory_space<vmem>>, %arg12: memref<8x128xbf16, #tpu.memory_space<vmem>>, %arg13: memref<8x1xf32, #tpu.memory_space<vmem>>, %arg14: memref<8x16xf32, #tpu.memory_space<vmem>>) attributes {dimension_semantics = [#tpu.dimension_semantics<parallel>], iteration_bounds = array<i64: 1>, scalar_prefetch = 0 : i64, scratch_operands = 0 : i64, tpu.core_type = #tpu.core_type<tc>, window_params = [{transform_indices = @transform_0, window_bounds = array<i64: 16, 192>}, {pipeline_mode = #tpu.pipeline_mode<synchronous>, transform_indices = @transform_1, window_bounds = array<i64: 192, 512>}, {pipeline_mode = #tpu.pipeline_mode<synchronous>, transform_indices = @transform_2, window_bounds = array<i64: 1, 512>}, {pipeline_mode = #tpu.pipeline_mode<synchronous>, transform_indices = @transform_3, window_bounds = array<i64: 512, 256>}, {pipeline_mode = #tpu.pipeline_mode<synchronous>, transform_indices = @transform_4, window_bounds = array<i64: 1, 256>}, {pipeline_mode = #tpu.pipeline_mode<synchronous>, transform_indices = @transform_5, window_bounds = array<i64: 256, 256>}, {pipeline_mode = #tpu.pipeline_mode<synchronous>, transform_indices = @transform_6, window_bounds = array<i64: 1, 256>}, {pipeline_mode = #tpu.pipeline_mode<synchronous>, transform_indices = @transform_7, window_bounds = array<i64: 256, 128>}, {pipeline_mode = #tpu.pipeline_mode<synchronous>, transform_indices = @transform_8, window_bounds = array<i64: 1, 128>}, {pipeline_mode = #tpu.pipeline_mode<synchronous>, transform_indices = @transform_9, window_bounds = array<i64: 128, 128>}, {pipeline_mode = #tpu.pipeline_mode<synchronous>, transform_indices = @transform_10, window_bounds = array<i64: 1, 128>}, {pipeline_mode = #tpu.pipeline_mode<synchronous>, transform_indices = @transform_11, window_bounds = array<i64: 8, 128>}, {pipeline_mode = #tpu.pipeline_mode<synchronous>, transform_indices = @transform_12, window_bounds = array<i64: 8, 1>}, {transform_indices = @transform_13, window_bounds = array<i64: 8, 16>}]} {
    %c0 = arith.constant 0 : index
    %c0_0 = arith.constant 0 : index
    %0 = vector.load %arg1[%c0, %c0_0] : memref<16x192xbf16, #tpu.memory_space<vmem>>, vector<16x192xbf16>
    %c0_1 = arith.constant 0 : index
    %c0_2 = arith.constant 0 : index
    %1 = vector.load %arg2[%c0_1, %c0_2] : memref<192x512xbf16, #tpu.memory_space<vmem>>, vector<192x512xbf16>
    %cst = arith.constant dense<0.000000e+00> : vector<16x512xf32>
    %2 = tpu.matmul %0, %1, %cst {dimension_numbers = #tpu.dot_dimension_numbers<[1], [0], [0], [1], [0, 0, 1, 1], [], []>} : vector<16x192xbf16>, vector<192x512xbf16>, vector<16x512xf32> -> vector<16x512xf32>
    %c0_3 = arith.constant 0 : index
    %c0_4 = arith.constant 0 : index
    %3 = vector.load %arg3[%c0_3, %c0_4] : memref<1x512xf32, #tpu.memory_space<vmem>>, vector<1x512xf32>
    %4 = vector.broadcast %3 : vector<1x512xf32> to vector<16x512xf32>
    %5 = arith.addf %2, %4 : vector<16x512xf32>
    %cst_5 = arith.constant 4.471500e-02 : f32
    %6 = vector.broadcast %cst_5 : f32 to vector<16x512xf32>
    %7 = arith.mulf %6, %5 : vector<16x512xf32>
    %8 = arith.mulf %7, %5 : vector<16x512xf32>
    %9 = arith.mulf %8, %5 : vector<16x512xf32>
    %10 = arith.addf %5, %9 : vector<16x512xf32>
    %cst_6 = arith.constant 0.797884583 : f32
    %11 = vector.broadcast %cst_6 : f32 to vector<16x512xf32>
    %12 = arith.mulf %11, %10 : vector<16x512xf32>
    %13 = math.tanh %12 : vector<16x512xf32>
    %14 = arith.mulf %5, %13 : vector<16x512xf32>
    %15 = arith.addf %5, %14 : vector<16x512xf32>
    %16 = arith.truncf %15 : vector<16x512xf32> to vector<16x512xbf16>
    %c0_7 = arith.constant 0 : index
    %c0_8 = arith.constant 0 : index
    %17 = vector.load %arg4[%c0_7, %c0_8] : memref<512x256xbf16, #tpu.memory_space<vmem>>, vector<512x256xbf16>
    %cst_9 = arith.constant dense<0.000000e+00> : vector<16x256xf32>
    %18 = tpu.matmul %16, %17, %cst_9 {dimension_numbers = #tpu.dot_dimension_numbers<[1], [0], [0], [1], [0, 0, 1, 1], [], []>} : vector<16x512xbf16>, vector<512x256xbf16>, vector<16x256xf32> -> vector<16x256xf32>
    %c0_10 = arith.constant 0 : index
    %c0_11 = arith.constant 0 : index
    %19 = vector.load %arg5[%c0_10, %c0_11] : memref<1x256xf32, #tpu.memory_space<vmem>>, vector<1x256xf32>
    %20 = vector.broadcast %19 : vector<1x256xf32> to vector<16x256xf32>
    %21 = arith.addf %18, %20 : vector<16x256xf32>
    %cst_12 = arith.constant 4.471500e-02 : f32
    %22 = vector.broadcast %cst_12 : f32 to vector<16x256xf32>
    %23 = arith.mulf %22, %21 : vector<16x256xf32>
    %24 = arith.mulf %23, %21 : vector<16x256xf32>
    %25 = arith.mulf %24, %21 : vector<16x256xf32>
    %26 = arith.addf %21, %25 : vector<16x256xf32>
    %cst_13 = arith.constant 0.797884583 : f32
    %27 = vector.broadcast %cst_13 : f32 to vector<16x256xf32>
    %28 = arith.mulf %27, %26 : vector<16x256xf32>
    %29 = math.tanh %28 : vector<16x256xf32>
    %30 = arith.mulf %21, %29 : vector<16x256xf32>
    %31 = arith.addf %21, %30 : vector<16x256xf32>
    %32 = arith.truncf %31 : vector<16x256xf32> to vector<16x256xbf16>
    %c0_14 = arith.constant 0 : index
    %c0_15 = arith.constant 0 : index
    %33 = vector.load %arg6[%c0_14, %c0_15] : memref<256x256xbf16, #tpu.memory_space<vmem>>, vector<256x256xbf16>
    %cst_16 = arith.constant dense<0.000000e+00> : vector<16x256xf32>
    %34 = tpu.matmul %32, %33, %cst_16 {dimension_numbers = #tpu.dot_dimension_numbers<[1], [0], [0], [1], [0, 0, 1, 1], [], []>} : vector<16x256xbf16>, vector<256x256xbf16>, vector<16x256xf32> -> vector<16x256xf32>
    %c0_17 = arith.constant 0 : index
    %c0_18 = arith.constant 0 : index
    %35 = vector.load %arg7[%c0_17, %c0_18] : memref<1x256xf32, #tpu.memory_space<vmem>>, vector<1x256xf32>
    %36 = vector.broadcast %35 : vector<1x256xf32> to vector<16x256xf32>
    %37 = arith.addf %34, %36 : vector<16x256xf32>
    %cst_19 = arith.constant 4.471500e-02 : f32
    %38 = vector.broadcast %cst_19 : f32 to vector<16x256xf32>
    %39 = arith.mulf %38, %37 : vector<16x256xf32>
    %40 = arith.mulf %39, %37 : vector<16x256xf32>
    %41 = arith.mulf %40, %37 : vector<16x256xf32>
    %42 = arith.addf %37, %41 : vector<16x256xf32>
    %cst_20 = arith.constant 0.797884583 : f32
    %43 = vector.broadcast %cst_20 : f32 to vector<16x256xf32>
    %44 = arith.mulf %43, %42 : vector<16x256xf32>
    %45 = math.tanh %44 : vector<16x256xf32>
    %46 = arith.mulf %37, %45 : vector<16x256xf32>
    %47 = arith.addf %37, %46 : vector<16x256xf32>
    %48 = arith.truncf %47 : vector<16x256xf32> to vector<16x256xbf16>
    %c0_21 = arith.constant 0 : index
    %c0_22 = arith.constant 0 : index
    %49 = vector.load %arg8[%c0_21, %c0_22] : memref<256x128xbf16, #tpu.memory_space<vmem>>, vector<256x128xbf16>
    %cst_23 = arith.constant dense<0.000000e+00> : vector<16x128xf32>
    %50 = tpu.matmul %48, %49, %cst_23 {dimension_numbers = #tpu.dot_dimension_numbers<[1], [0], [0], [1], [0, 0, 1, 1], [], []>} : vector<16x256xbf16>, vector<256x128xbf16>, vector<16x128xf32> -> vector<16x128xf32>
    %c0_24 = arith.constant 0 : index
    %c0_25 = arith.constant 0 : index
    %51 = vector.load %arg9[%c0_24, %c0_25] : memref<1x128xf32, #tpu.memory_space<vmem>>, vector<1x128xf32>
    %52 = vector.broadcast %51 : vector<1x128xf32> to vector<16x128xf32>
    %53 = arith.addf %50, %52 : vector<16x128xf32>
    %cst_26 = arith.constant 4.471500e-02 : f32
    %54 = vector.broadcast %cst_26 : f32 to vector<16x128xf32>
    %55 = arith.mulf %54, %53 : vector<16x128xf32>
    %56 = arith.mulf %55, %53 : vector<16x128xf32>
    %57 = arith.mulf %56, %53 : vector<16x128xf32>
    %58 = arith.addf %53, %57 : vector<16x128xf32>
    %cst_27 = arith.constant 0.797884583 : f32
    %59 = vector.broadcast %cst_27 : f32 to vector<16x128xf32>
    %60 = arith.mulf %59, %58 : vector<16x128xf32>
    %61 = math.tanh %60 : vector<16x128xf32>
    %62 = arith.mulf %53, %61 : vector<16x128xf32>
    %63 = arith.addf %53, %62 : vector<16x128xf32>
    %64 = arith.truncf %63 : vector<16x128xf32> to vector<16x128xbf16>
    %c0_28 = arith.constant 0 : index
    %c0_29 = arith.constant 0 : index
    %65 = vector.load %arg10[%c0_28, %c0_29] : memref<128x128xbf16, #tpu.memory_space<vmem>>, vector<128x128xbf16>
    %cst_30 = arith.constant dense<0.000000e+00> : vector<16x128xf32>
    %66 = tpu.matmul %64, %65, %cst_30 {dimension_numbers = #tpu.dot_dimension_numbers<[1], [0], [0], [1], [0, 0, 1, 1], [], []>} : vector<16x128xbf16>, vector<128x128xbf16>, vector<16x128xf32> -> vector<16x128xf32>
    %c0_31 = arith.constant 0 : index
    %c0_32 = arith.constant 0 : index
    %67 = vector.load %arg11[%c0_31, %c0_32] : memref<1x128xf32, #tpu.memory_space<vmem>>, vector<1x128xf32>
    %68 = vector.broadcast %67 : vector<1x128xf32> to vector<16x128xf32>
    %69 = arith.addf %66, %68 : vector<16x128xf32>
    %cst_33 = arith.constant 4.471500e-02 : f32
    %70 = vector.broadcast %cst_33 : f32 to vector<16x128xf32>
    %71 = arith.mulf %70, %69 : vector<16x128xf32>
    %72 = arith.mulf %71, %69 : vector<16x128xf32>
    %73 = arith.mulf %72, %69 : vector<16x128xf32>
    %74 = arith.addf %69, %73 : vector<16x128xf32>
    %cst_34 = arith.constant 0.797884583 : f32
    %75 = vector.broadcast %cst_34 : f32 to vector<16x128xf32>
    %76 = arith.mulf %75, %74 : vector<16x128xf32>
    %77 = math.tanh %76 : vector<16x128xf32>
    %78 = arith.mulf %69, %77 : vector<16x128xf32>
    %79 = arith.addf %69, %78 : vector<16x128xf32>
    %80 = arith.truncf %79 : vector<16x128xf32> to vector<16x128xbf16>
    %c0_35 = arith.constant 0 : index
    %c0_36 = arith.constant 0 : index
    %81 = vector.load %arg12[%c0_35, %c0_36] : memref<8x128xbf16, #tpu.memory_space<vmem>>, vector<8x128xbf16>
    %cst_37 = arith.constant dense<0.000000e+00> : vector<8x16xf32>
    %82 = tpu.matmul %81, %80, %cst_37 {dimension_numbers = #tpu.dot_dimension_numbers<[1], [1], [0], [0], [0, 0, 1, 0], [], []>} : vector<8x128xbf16>, vector<16x128xbf16>, vector<8x16xf32> -> vector<8x16xf32>
    %c0_38 = arith.constant 0 : index
    %c0_39 = arith.constant 0 : index
    %83 = vector.load %arg13[%c0_38, %c0_39] : memref<8x1xf32, #tpu.memory_space<vmem>>, vector<8x1xf32>
    %84 = vector.broadcast %83 : vector<8x1xf32> to vector<8x16xf32>
    %85 = arith.addf %82, %84 : vector<8x16xf32>
    %c0_40 = arith.constant 0 : index
    %c0_41 = arith.constant 0 : index
    %86 = vector.load %arg14[%c0_40, %c0_41] : memref<8x16xf32, #tpu.memory_space<vmem>>, vector<8x16xf32>
    tpu.vector_store %arg14[%c0_40, %c0_41], %85 {strides = array<i32>} : memref<8x16xf32, #tpu.memory_space<vmem>>, vector<8x16xf32>,
    return
  }
  func.func @transform_0(%arg0: i32) -> (i32, i32) {
    %c0_i32 = arith.constant 0 : i32
    %c0_i32_0 = arith.constant 0 : i32
    return %arg0, %c0_i32 : i32, i32
  }
  func.func @transform_1(%arg0: i32) -> (i32, i32) {
    %c0_i32 = arith.constant 0 : i32
    %c0_i32_0 = arith.constant 0 : i32
    %c0_i32_1 = arith.constant 0 : i32
    return %c0_i32, %c0_i32_0 : i32, i32
  }
  func.func @transform_2(%arg0: i32) -> (i32, i32) {
    %c0_i32 = arith.constant 0 : i32
    %c0_i32_0 = arith.constant 0 : i32
    %c0_i32_1 = arith.constant 0 : i32
    return %c0_i32, %c0_i32_0 : i32, i32
  }
  func.func @transform_3(%arg0: i32) -> (i32, i32) {
    %c0_i32 = arith.constant 0 : i32
    %c0_i32_0 = arith.constant 0 : i32
    %c0_i32_1 = arith.constant 0 : i32
    return %c0_i32, %c0_i32_0 : i32, i32
  }
  func.func @transform_4(%arg0: i32) -> (i32, i32) {
    %c0_i32 = arith.constant 0 : i32
    %c0_i32_0 = arith.constant 0 : i32
    %c0_i32_1 = arith.constant 0 : i32
    return %c0_i32, %c0_i32_0 : i32, i32
  }
  func.func @transform_5(%arg0: i32) -> (i32, i32) {
    %c0_i32 = arith.constant 0 : i32
    %c0_i32_0 = arith.constant 0 : i32
    %c0_i32_1 = arith.constant 0 : i32
    return %c0_i32, %c0_i32_0 : i32, i32
  }
  func.func @transform_6(%arg0: i32) -> (i32, i32) {
    %c0_i32 = arith.constant 0 : i32
    %c0_i32_0 = arith.constant 0 : i32
    %c0_i32_1 = arith.constant 0 : i32
    return %c0_i32, %c0_i32_0 : i32, i32
  }
  func.func @transform_7(%arg0: i32) -> (i32, i32) {
    %c0_i32 = arith.constant 0 : i32
    %c0_i32_0 = arith.constant 0 : i32
    %c0_i32_1 = arith.constant 0 : i32
    return %c0_i32, %c0_i32_0 : i32, i32
  }
  func.func @transform_8(%arg0: i32) -> (i32, i32) {
    %c0_i32 = arith.constant 0 : i32
    %c0_i32_0 = arith.constant 0 : i32
    %c0_i32_1 = arith.constant 0 : i32
    return %c0_i32, %c0_i32_0 : i32, i32
  }
  func.func @transform_9(%arg0: i32) -> (i32, i32) {
    %c0_i32 = arith.constant 0 : i32
    %c0_i32_0 = arith.constant 0 : i32
    %c0_i32_1 = arith.constant 0 : i32
    return %c0_i32, %c0_i32_0 : i32, i32
  }
  func.func @transform_10(%arg0: i32) -> (i32, i32) {
    %c0_i32 = arith.constant 0 : i32
    %c0_i32_0 = arith.constant 0 : i32
    %c0_i32_1 = arith.constant 0 : i32
    return %c0_i32, %c0_i32_0 : i32, i32
  }
  func.func @transform_11(%arg0: i32) -> (i32, i32) {
    %c0_i32 = arith.constant 0 : i32
    %c0_i32_0 = arith.constant 0 : i32
    %c0_i32_1 = arith.constant 0 : i32
    return %c0_i32, %c0_i32_0 : i32, i32
  }
  func.func @transform_12(%arg0: i32) -> (i32, i32) {
    %c0_i32 = arith.constant 0 : i32
    %c0_i32_0 = arith.constant 0 : i32
    %c0_i32_1 = arith.constant 0 : i32
    return %c0_i32, %c0_i32_0 : i32, i32
  }
  func.func @transform_13(%arg0: i32) -> (i32, i32) {
    %c0_i32 = arith.constant 0 : i32
    %c0_i32_0 = arith.constant 0 : i32
    return %c0_i32, %arg0 : i32, i32
  }
}

module attributes {stable_mosaic.version = 11 : i64} {
  func.func @_fused_mlp_kernel(%arg0: i32, %arg1: memref<16x192xbf16, #tpu.memory_space<vmem>>, %arg2: memref<192x512xbf16, #tpu.memory_space<vmem>>, %arg3: memref<1x512xf32, #tpu.memory_space<vmem>>, %arg4: memref<512x256xbf16, #tpu.memory_space<vmem>>, %arg5: memref<1x256xf32, #tpu.memory_space<vmem>>, %arg6: memref<256x256xbf16, #tpu.memory_space<vmem>>, %arg7: memref<1x256xf32, #tpu.memory_space<vmem>>, %arg8: memref<256x128xbf16, #tpu.memory_space<vmem>>, %arg9: memref<1x128xf32, #tpu.memory_space<vmem>>, %arg10: memref<128x128xbf16, #tpu.memory_space<vmem>>, %arg11: memref<1x128xf32, #tpu.memory_space<vmem>>, %arg12: memref<8x128xbf16, #tpu.memory_space<vmem>>, %arg13: memref<8x1xf32, #tpu.memory_space<vmem>>, %arg14: memref<8x16xf32, #tpu.memory_space<vmem>>) attributes {dimension_semantics = [#tpu.dimension_semantics<parallel>], iteration_bounds = array<i64: 1>, scalar_prefetch = 0 : i64, scratch_operands = 0 : i64, tpu.core_type = #tpu.core_type<tc>, window_params = [{transform_indices = @transform_0, window_bounds = array<i64: 16, 192>}, {pipeline_mode = #tpu.pipeline_mode<synchronous>, transform_indices = @transform_1, window_bounds = array<i64: 192, 512>}, {pipeline_mode = #tpu.pipeline_mode<synchronous>, transform_indices = @transform_2, window_bounds = array<i64: 1, 512>}, {pipeline_mode = #tpu.pipeline_mode<synchronous>, transform_indices = @transform_3, window_bounds = array<i64: 512, 256>}, {pipeline_mode = #tpu.pipeline_mode<synchronous>, transform_indices = @transform_4, window_bounds = array<i64: 1, 256>}, {pipeline_mode = #tpu.pipeline_mode<synchronous>, transform_indices = @transform_5, window_bounds = array<i64: 256, 256>}, {pipeline_mode = #tpu.pipeline_mode<synchronous>, transform_indices = @transform_6, window_bounds = array<i64: 1, 256>}, {pipeline_mode = #tpu.pipeline_mode<synchronous>, transform_indices = @transform_7, window_bounds = array<i64: 256, 128>}, {pipeline_mode = #tpu.pipeline_mode<synchronous>, transform_indices = @transform_8, window_bounds = array<i64: 1, 128>}, {pipeline_mode = #tpu.pipeline_mode<synchronous>, transform_indices = @transform_9, window_bounds = array<i64: 128, 128>}, {pipeline_mode = #tpu.pipeline_mode<synchronous>, transform_indices = @transform_10, window_bounds = array<i64: 1, 128>}, {pipeline_mode = #tpu.pipeline_mode<synchronous>, transform_indices = @transform_11, window_bounds = array<i64: 8, 128>}, {pipeline_mode = #tpu.pipeline_mode<synchronous>, transform_indices = @transform_12, window_bounds = array<i64: 8, 1>}, {transform_indices = @transform_13, window_bounds = array<i64: 8, 16>}]} {
    %c0 = arith.constant 0 : index
    %c0_0 = arith.constant 0 : index
    %0 = vector.load %arg1[%c0, %c0_0] : memref<16x192xbf16, #tpu.memory_space<vmem>>, vector<16x192xbf16>
    %c0_1 = arith.constant 0 : index
    %c0_2 = arith.constant 0 : index
    %1 = vector.load %arg2[%c0_1, %c0_2] : memref<192x512xbf16, #tpu.memory_space<vmem>>, vector<192x512xbf16>
    %cst = arith.constant dense<0.000000e+00> : vector<16x512xf32>
    %2 = tpu.matmul %0, %1, %cst {dimension_numbers = #tpu.dot_dimension_numbers<[1], [0], [0], [1], [0, 0, 1, 1], [], []>} : vector<16x192xbf16>, vector<192x512xbf16>, vector<16x512xf32> -> vector<16x512xf32>
    %c0_3 = arith.constant 0 : index
    %c0_4 = arith.constant 0 : index
    %3 = vector.load %arg3[%c0_3, %c0_4] : memref<1x512xf32, #tpu.memory_space<vmem>>, vector<1x512xf32>
    %4 = vector.broadcast %3 : vector<1x512xf32> to vector<16x512xf32>
    %5 = arith.addf %2, %4 : vector<16x512xf32>
    %cst_5 = arith.constant 4.471500e-02 : f32
    %6 = vector.broadcast %cst_5 : f32 to vector<16x512xf32>
    %7 = arith.mulf %6, %5 : vector<16x512xf32>
    %8 = arith.mulf %7, %5 : vector<16x512xf32>
    %9 = arith.mulf %8, %5 : vector<16x512xf32>
    %10 = arith.addf %5, %9 : vector<16x512xf32>
    %cst_6 = arith.constant 0.797884583 : f32
    %11 = vector.broadcast %cst_6 : f32 to vector<16x512xf32>
    %12 = arith.mulf %11, %10 : vector<16x512xf32>
    %13 = math.tanh %12 : vector<16x512xf32>
    %14 = arith.mulf %5, %13 : vector<16x512xf32>
    %15 = arith.addf %5, %14 : vector<16x512xf32>
    %16 = arith.truncf %15 : vector<16x512xf32> to vector<16x512xbf16>
    %c0_7 = arith.constant 0 : index
    %c0_8 = arith.constant 0 : index
    %17 = vector.load %arg4[%c0_7, %c0_8] : memref<512x256xbf16, #tpu.memory_space<vmem>>, vector<512x256xbf16>
    %cst_9 = arith.constant dense<0.000000e+00> : vector<16x256xf32>
    %18 = tpu.matmul %16, %17, %cst_9 {dimension_numbers = #tpu.dot_dimension_numbers<[1], [0], [0], [1], [0, 0, 1, 1], [], []>} : vector<16x512xbf16>, vector<512x256xbf16>, vector<16x256xf32> -> vector<16x256xf32>
    %c0_10 = arith.constant 0 : index
    %c0_11 = arith.constant 0 : index
    %19 = vector.load %arg5[%c0_10, %c0_11] : memref<1x256xf32, #tpu.memory_space<vmem>>, vector<1x256xf32>
    %20 = vector.broadcast %19 : vector<1x256xf32> to vector<16x256xf32>
    %21 = arith.addf %18, %20 : vector<16x256xf32>
    %cst_12 = arith.constant 4.471500e-02 : f32
    %22 = vector.broadcast %cst_12 : f32 to vector<16x256xf32>
    %23 = arith.mulf %22, %21 : vector<16x256xf32>
    %24 = arith.mulf %23, %21 : vector<16x256xf32>
    %25 = arith.mulf %24, %21 : vector<16x256xf32>
    %26 = arith.addf %21, %25 : vector<16x256xf32>
    %cst_13 = arith.constant 0.797884583 : f32
    %27 = vector.broadcast %cst_13 : f32 to vector<16x256xf32>
    %28 = arith.mulf %27, %26 : vector<16x256xf32>
    %29 = math.tanh %28 : vector<16x256xf32>
    %30 = arith.mulf %21, %29 : vector<16x256xf32>
    %31 = arith.addf %21, %30 : vector<16x256xf32>
    %32 = arith.truncf %31 : vector<16x256xf32> to vector<16x256xbf16>
    %c0_14 = arith.constant 0 : index
    %c0_15 = arith.constant 0 : index
    %33 = vector.load %arg6[%c0_14, %c0_15] : memref<256x256xbf16, #tpu.memory_space<vmem>>, vector<256x256xbf16>
    %cst_16 = arith.constant dense<0.000000e+00> : vector<16x256xf32>
    %34 = tpu.matmul %32, %33, %cst_16 {dimension_numbers = #tpu.dot_dimension_numbers<[1], [0], [0], [1], [0, 0, 1, 1], [], []>} : vector<16x256xbf16>, vector<256x256xbf16>, vector<16x256xf32> -> vector<16x256xf32>
    %c0_17 = arith.constant 0 : index
    %c0_18 = arith.constant 0 : index
    %35 = vector.load %arg7[%c0_17, %c0_18] : memref<1x256xf32, #tpu.memory_space<vmem>>, vector<1x256xf32>
    %36 = vector.broadcast %35 : vector<1x256xf32> to vector<16x256xf32>
    %37 = arith.addf %34, %36 : vector<16x256xf32>
    %cst_19 = arith.constant 4.471500e-02 : f32
    %38 = vector.broadcast %cst_19 : f32 to vector<16x256xf32>
    %39 = arith.mulf %38, %37 : vector<16x256xf32>
    %40 = arith.mulf %39, %37 : vector<16x256xf32>
    %41 = arith.mulf %40, %37 : vector<16x256xf32>
    %42 = arith.addf %37, %41 : vector<16x256xf32>
    %cst_20 = arith.constant 0.797884583 : f32
    %43 = vector.broadcast %cst_20 : f32 to vector<16x256xf32>
    %44 = arith.mulf %43, %42 : vector<16x256xf32>
    %45 = math.tanh %44 : vector<16x256xf32>
    %46 = arith.mulf %37, %45 : vector<16x256xf32>
    %47 = arith.addf %37, %46 : vector<16x256xf32>
    %48 = arith.truncf %47 : vector<16x256xf32> to vector<16x256xbf16>
    %c0_21 = arith.constant 0 : index
    %c0_22 = arith.constant 0 : index
    %49 = vector.load %arg8[%c0_21, %c0_22] : memref<256x128xbf16, #tpu.memory_space<vmem>>, vector<256x128xbf16>
    %cst_23 = arith.constant dense<0.000000e+00> : vector<16x128xf32>
    %50 = tpu.matmul %48, %49, %cst_23 {dimension_numbers = #tpu.dot_dimension_numbers<[1], [0], [0], [1], [0, 0, 1, 1], [], []>} : vector<16x256xbf16>, vector<256x128xbf16>, vector<16x128xf32> -> vector<16x128xf32>
    %c0_24 = arith.constant 0 : index
    %c0_25 = arith.constant 0 : index
    %51 = vector.load %arg9[%c0_24, %c0_25] : memref<1x128xf32, #tpu.memory_space<vmem>>, vector<1x128xf32>
    %52 = vector.broadcast %51 : vector<1x128xf32> to vector<16x128xf32>
    %53 = arith.addf %50, %52 : vector<16x128xf32>
    %cst_26 = arith.constant 4.471500e-02 : f32
    %54 = vector.broadcast %cst_26 : f32 to vector<16x128xf32>
    %55 = arith.mulf %54, %53 : vector<16x128xf32>
    %56 = arith.mulf %55, %53 : vector<16x128xf32>
    %57 = arith.mulf %56, %53 : vector<16x128xf32>
    %58 = arith.addf %53, %57 : vector<16x128xf32>
    %cst_27 = arith.constant 0.797884583 : f32
    %59 = vector.broadcast %cst_27 : f32 to vector<16x128xf32>
    %60 = arith.mulf %59, %58 : vector<16x128xf32>
    %61 = math.tanh %60 : vector<16x128xf32>
    %62 = arith.mulf %53, %61 : vector<16x128xf32>
    %63 = arith.addf %53, %62 : vector<16x128xf32>
    %64 = arith.truncf %63 : vector<16x128xf32> to vector<16x128xbf16>
    %c0_28 = arith.constant 0 : index
    %c0_29 = arith.constant 0 : index
    %65 = vector.load %arg10[%c0_28, %c0_29] : memref<128x128xbf16, #tpu.memory_space<vmem>>, vector<128x128xbf16>
    %cst_30 = arith.constant dense<0.000000e+00> : vector<16x128xf32>
    %66 = tpu.matmul %64, %65, %cst_30 {dimension_numbers = #tpu.dot_dimension_numbers<[1], [0], [0], [1], [0, 0, 1, 1], [], []>} : vector<16x128xbf16>, vector<128x128xbf16>, vector<16x128xf32> -> vector<16x128xf32>
    %c0_31 = arith.constant 0 : index
    %c0_32 = arith.constant 0 : index
    %67 = vector.load %arg11[%c0_31, %c0_32] : memref<1x128xf32, #tpu.memory_space<vmem>>, vector<1x128xf32>
    %68 = vector.broadcast %67 : vector<1x128xf32> to vector<16x128xf32>
    %69 = arith.addf %66, %68 : vector<16x128xf32>
    %cst_33 = arith.constant 4.471500e-02 : f32
    %70 = vector.broadcast %cst_33 : f32 to vector<16x128xf32>
    %71 = arith.mulf %70, %69 : vector<16x128xf32>
    %72 = arith.mulf %71, %69 : vector<16x128xf32>
    %73 = arith.mulf %72, %69 : vector<16x128xf32>
    %74 = arith.addf %69, %73 : vector<16x128xf32>
    %cst_34 = arith.constant 0.797884583 : f32
    %75 = vector.broadcast %cst_34 : f32 to vector<16x128xf32>
    %76 = arith.mulf %75, %74 : vector<16x128xf32>
    %77 = math.tanh %76 : vector<16x128xf32>
    %78 = arith.mulf %69, %77 : vector<16x128xf32>
    %79 = arith.addf %69, %78 : vector<16x128xf32>
    %80 = arith.truncf %79 : vector<16x128xf32> to vector<16x128xbf16>
    %c0_35 = arith.constant 0 : index
    %c0_36 = arith.constant 0 : index
    %81 = vector.load %arg12[%c0_35, %c0_36] : memref<8x128xbf16, #tpu.memory_space<vmem>>, vector<8x128xbf16>
    %cst_37 = arith.constant dense<0.000000e+00> : vector<8x16xf32>
    %82 = tpu.matmul %81, %80, %cst_37 {dimension_numbers = #tpu.dot_dimension_numbers<[1], [1], [0], [0], [0, 0, 1, 0], [], []>} : vector<8x128xbf16>, vector<16x128xbf16>, vector<8x16xf32> -> vector<8x16xf32>
    %c0_38 = arith.constant 0 : index
    %c0_39 = arith.constant 0 : index
    %83 = vector.load %arg13[%c0_38, %c0_39] : memref<8x1xf32, #tpu.memory_space<vmem>>, vector<8x1xf32>
    %84 = vector.broadcast %83 : vector<8x1xf32> to vector<8x16xf32>
    %85 = arith.addf %82, %84 : vector<8x16xf32>
    %c0_40 = arith.constant 0 : index
    %c0_41 = arith.constant 0 : index
    %86 = vector.load %arg14[%c0_40, %c0_41] : memref<8x16xf32, #tpu.memory_space<vmem>>, vector<8x16xf32>
    tpu.vector_store %arg14[%c0_40, %c0_41], %85 {strides = array<i32>} : memref<8x16xf32, #tpu.memory_space<vmem>>, vector<8x16xf32>,
    return
  }
  func.func @transform_0(%arg0: i32) -> (i32, i32) {
    %c0_i32 = arith.constant 0 : i32
    %c0_i32_0 = arith.constant 0 : i32
    return %arg0, %c0_i32 : i32, i32
  }
  func.func @transform_1(%arg0: i32) -> (i32, i32) {
    %c0_i32 = arith.constant 0 : i32
    %c0_i32_0 = arith.constant 0 : i32
    %c0_i32_1 = arith.constant 0 : i32
    return %c0_i32, %c0_i32_0 : i32, i32
  }
  func.func @transform_2(%arg0: i32) -> (i32, i32) {
    %c0_i32 = arith.constant 0 : i32
    %c0_i32_0 = arith.constant 0 : i32
    %c0_i32_1 = arith.constant 0 : i32
    return %c0_i32, %c0_i32_0 : i32, i32
  }
  func.func @transform_3(%arg0: i32) -> (i32, i32) {
    %c0_i32 = arith.constant 0 : i32
    %c0_i32_0 = arith.constant 0 : i32
    %c0_i32_1 = arith.constant 0 : i32
    return %c0_i32, %c0_i32_0 : i32, i32
  }
  func.func @transform_4(%arg0: i32) -> (i32, i32) {
    %c0_i32 = arith.constant 0 : i32
    %c0_i32_0 = arith.constant 0 : i32
    %c0_i32_1 = arith.constant 0 : i32
    return %c0_i32, %c0_i32_0 : i32, i32
  }
  func.func @transform_5(%arg0: i32) -> (i32, i32) {
    %c0_i32 = arith.constant 0 : i32
    %c0_i32_0 = arith.constant 0 : i32
    %c0_i32_1 = arith.constant 0 : i32
    return %c0_i32, %c0_i32_0 : i32, i32
  }
  func.func @transform_6(%arg0: i32) -> (i32, i32) {
    %c0_i32 = arith.constant 0 : i32
    %c0_i32_0 = arith.constant 0 : i32
    %c0_i32_1 = arith.constant 0 : i32
    return %c0_i32, %c0_i32_0 : i32, i32
  }
  func.func @transform_7(%arg0: i32) -> (i32, i32) {
    %c0_i32 = arith.constant 0 : i32
    %c0_i32_0 = arith.constant 0 : i32
    %c0_i32_1 = arith.constant 0 : i32
    return %c0_i32, %c0_i32_0 : i32, i32
  }
  func.func @transform_8(%arg0: i32) -> (i32, i32) {
    %c0_i32 = arith.constant 0 : i32
    %c0_i32_0 = arith.constant 0 : i32
    %c0_i32_1 = arith.constant 0 : i32
    return %c0_i32, %c0_i32_0 : i32, i32
  }
  func.func @transform_9(%arg0: i32) -> (i32, i32) {
    %c0_i32 = arith.constant 0 : i32
    %c0_i32_0 = arith.constant 0 : i32
    %c0_i32_1 = arith.constant 0 : i32
    return %c0_i32, %c0_i32_0 : i32, i32
  }
  func.func @transform_10(%arg0: i32) -> (i32, i32) {
    %c0_i32 = arith.constant 0 : i32
    %c0_i32_0 = arith.constant 0 : i32
    %c0_i32_1 = arith.constant 0 : i32
    return %c0_i32, %c0_i32_0 : i32, i32
  }
  func.func @transform_11(%arg0: i32) -> (i32, i32) {
    %c0_i32 = arith.constant 0 : i32
    %c0_i32_0 = arith.constant 0 : i32
    %c0_i32_1 = arith.constant 0 : i32
    return %c0_i32, %c0_i32_0 : i32, i32
  }
  func.func @transform_12(%arg0: i32) -> (i32, i32) {
    %c0_i32 = arith.constant 0 : i32
    %c0_i32_0 = arith.constant 0 : i32
    %c0_i32_1 = arith.constant 0 : i32
    return %c0_i32, %c0_i32_0 : i32, i32
  }
  func.func @transform_13(%arg0: i32) -> (i32, i32) {
    %c0_i32 = arith.constant 0 : i32
    %c0_i32_0 = arith.constant 0 : i32
    return %c0_i32, %arg0 : i32, i32
  }
}

</mosaic_0001>

<bundles_post_ra>
// kernel: tpu_custom_call.1
= control target key start
LH: loop header
LB: loop body
LE: loop exit
PB: predicated region body
PF: predicated region fallthrough
CT: control target
= control target key end

     0   :  { %18 = vsyncpa [#allocation3], 0  ;;  %s2756_s0 = inlined_call_operand.hbm [shape: bf16[16,192], index: 0, kind: input, shape index: {}]   ;;  %s2757_s1 = inlined_call_operand.hbm [shape: bf16[192,512], index: 1, kind: input, shape index: {}]   ;;  %s2758_s2 = inlined_call_operand.vmem [shape: f32[1,512], index: 2, kind: input, shape index: {}]   ;;  %s2759_s3 = inlined_call_operand.hbm [shape: bf16[512,256], index: 3, kind: input, shape index: {}]   ;;  %s2760_s4 = inlined_call_operand.vmem [shape: f32[1,256], index: 4, kind: input, shape index: {}]   ;;  %s2761_s5 = inlined_call_operand.hbm [shape: bf16[256,256], index: 5, kind: input, shape index: {}]   ;;  %s2762_s6 = inlined_call_operand.vmem [shape: f32[1,256], index: 6, kind: input, shape index: {}]   ;;  %s2763_s7 = inlined_call_operand.hbm [shape: bf16[256,128], index: 7, kind: input, shape index: {}]   ;;  %s2764_s8 = inlined_call_operand.vmem [shape: f32[1,128], index: 8, kind: input, shape index: {}]   ;;  %s2765_s9 = inlined_call_operand.hbm [shape: bf16[128,128], index: 9, kind: input, shape index: {}]   ;;  %s2766_s10 = inlined_call_operand.vmem [shape: f32[1,128], index: 10, kind: input, shape index: {}]   ;;  %s2767_s11 = inlined_call_operand.vmem [shape: bf16[8,128], index: 11, kind: input, shape index: {}]   ;;  %s2768_s12 = inlined_call_operand.vmem [shape: f32[8,1], index: 12, kind: input, shape index: {}]   ;;  %s2769_s13 = inlined_call_operand.hbm [shape: f32[8,16], index: 13, kind: output, shape index: {}]  }
   0x1   :  { %19 = vsyncpa [#allocation6], 0 }
   0x2   :  { %20 = vsyncpa [#allocation9], 0 }
   0x3   :  { %21 = vsyncpa [#allocation12], 0 }
   0x4   :  { %22 = vsyncpa [#allocation4], 0  ;;  %s2498_s25 = smov [#allocation5]   ;;  %s2334_s29 = scalar_lea.hbm %s2757_s1, 6144 }
   0x5   :  { %s40_s26 = sshll.u32 %s2498_s25, 4  ;;  %p2335_p0 = scmp.ne.s32.totalorder %s2757_s1, %s2334_s29  ;;  %s41_s26 = int_to_ptr.vmem [resolvable:$true] %s40_s26 }
   0x6   :  { %p2338_p1 = scmp.lt.u32.totalorder %s2334_s29, %s2757_s1 }
   0x8   :  { %p2340_p2 = pnand %p2338_p1, %p2335_p0 }
   0xa   :  { %2343 = shalt.err (!%p2340_p2)
}
   0xb   :  { %s2344_s17 = scalar_lea.vmem %s41_s26, 6144  ;;  %p2349_p4 = scmp.lt.s32.totalorder %s41_s26, %s41_s26 }
   0xc   :  { %p2345_p3 = scmp.ne.s32.totalorder %s41_s26, %s2344_s17  ;;  %p2350_p5 = scmp.lt.s32.totalorder %s2344_s17, %s2344_s17 }
   0xe   :  { %p2351_p6 = por %p2350_p5, %p2349_p4 }
  0x10   :  { %p2352_p7 = pnand %p2351_p6, %p2345_p3 }
  0x12   :  { %2355 = shalt.err (!%p2352_p7)
}
  0x13   :  { %s2499_s18 = smov 256   ;;  %s2500_s19 = smov 16  }
  0x14   :  { %46 = dma.hbm_to_vmem [thread:$0]  %s2757_s1, 6144, %s41_s26, [#allocation6], %s2499_s18, %s2499_s18, %s2500_s19  }
  0x15   :  { %s2501_s22 = smov [#allocation8]   ;;  %s2502_s24 = smov [#allocation2]  }
  0x16   :  { %s68_s23 = sshll.u32 %s2501_s22, 4  ;;  %s28_s25 = sshll.u32 %s2502_s24, 4  ;;  %s69_s23 = int_to_ptr.vmem [resolvable:$true] %s68_s23  ;;  %s29_s25 = int_to_ptr.vmem [resolvable:$true] %s28_s25 }
  0x17   :  { %s2356_s29 = scalar_lea.hbm %s2761_s5, 4096 }
  0x18   :  { %p2357_p8 = scmp.ne.s32.totalorder %s2761_s5, %s2356_s29  ;;  %p2360_p9 = scmp.lt.u32.totalorder %s2356_s29, %s2761_s5 }
  0x1a   :  { %p2362_p10 = pnand %p2360_p9, %p2357_p8 }
  0x1c   :  { %2365 = shalt.err (!%p2362_p10)
}
  0x1d   :  { %s2366_s1 = scalar_lea.vmem %s69_s23, 4096  ;;  %p2371_p12 = scmp.lt.s32.totalorder %s69_s23, %s69_s23 }
  0x1e   :  { %p2367_p11 = scmp.ne.s32.totalorder %s69_s23, %s2366_s1  ;;  %p2372_p13 = scmp.lt.s32.totalorder %s2366_s1, %s2366_s1 }
  0x20   :  { %p2373_p0 = por %p2372_p13, %p2371_p12 }
  0x22   :  { %p2374_p1 = pnand %p2373_p0, %p2367_p11 }
  0x24   :  { %2377 = shalt.err (!%p2374_p1)
}
  0x25   :  { %s2503_s26 = smov 128   ;;  %s2504_s17 = smov 8  }
  0x26   :  { %74 = dma.hbm_to_vmem [thread:$0]  %s2761_s5, 4096, %s69_s23, [#allocation9], %s2503_s26, %s2503_s26, %s2504_s17  }
  0x27   :  { %s2378_s22 = scalar_lea.hbm %s2756_s0, 256 }
  0x28   :  { %p2379_p2 = scmp.ne.s32.totalorder %s2756_s0, %s2378_s22  ;;  %p2382_p3 = scmp.lt.u32.totalorder %s2378_s22, %s2756_s0 }
  0x2a   :  { %p2384_p4 = pnand %p2382_p3, %p2379_p2 }
  0x2c   :  { %2387 = shalt.err (!%p2384_p4)
}
  0x2d   :  { %s2388_s30 = scalar_lea.vmem %s29_s25, 256  ;;  %p2393_p6 = scmp.lt.s32.totalorder %s29_s25, %s29_s25 }
  0x2e   :  { %p2389_p5 = scmp.ne.s32.totalorder %s29_s25, %s2388_s30  ;;  %p2394_p7 = scmp.lt.s32.totalorder %s2388_s30, %s2388_s30 }
  0x30   :  { %p2395_p8 = por %p2394_p7, %p2393_p6 }
  0x32   :  { %p2396_p9 = pnand %p2395_p8, %p2389_p5 }
  0x34   :  { %2399 = shalt.err (!%p2396_p9)
}
  0x35   :  { %34 = dma.hbm_to_vmem [thread:$0]  %s2756_s0, 256, %s29_s25, [#allocation3], %s2503_s26, %s2503_s26, %s2504_s17  }
  0x36   :  { %s2505_s14 = smov [#allocation7]   ;;  %s2506_s16 = smov [#allocation10]  }
  0x37   :  { %s54_s15 = sshll.u32 %s2505_s14, 4  ;;  %s82_s1 = sshll.u32 %s2506_s16, 4  ;;  %s55_s15 = int_to_ptr.vmem [resolvable:$true] %s54_s15  ;;  %s83_s1 = int_to_ptr.vmem [resolvable:$true] %s82_s1 }
  0x38   :  { %s2400_s20 = scalar_lea.hbm %s2759_s3, 8192 }
  0x39   :  { %p2401_p10 = scmp.ne.s32.totalorder %s2759_s3, %s2400_s20  ;;  %p2404_p11 = scmp.lt.u32.totalorder %s2400_s20, %s2759_s3 }
  0x3b   :  { %p2406_p12 = pnand %p2404_p11, %p2401_p10 }
  0x3d   :  { %2409 = shalt.err (!%p2406_p12)
}
  0x3e   :  { %s2410_s0 = scalar_lea.vmem %s55_s15, 8192  ;;  %p2415_p0 = scmp.lt.s32.totalorder %s55_s15, %s55_s15 }
  0x3f   :  { %p2411_p13 = scmp.ne.s32.totalorder %s55_s15, %s2410_s0  ;;  %p2416_p1 = scmp.lt.s32.totalorder %s2410_s0, %s2410_s0 }
  0x41   :  { %p2417_p2 = por %p2416_p1, %p2415_p0 }
  0x43   :  { %p2418_p3 = pnand %p2417_p2, %p2411_p13 }
  0x45   :  { %2421 = shalt.err (!%p2418_p3)
}
  0x46   :  { %60 = dma.hbm_to_vmem [thread:$0]  %s2759_s3, 8192, %s55_s15, [#allocation6], %s2503_s26, %s2503_s26, %s2504_s17  }
  0x47   :  { %s2422_s5 = scalar_lea.hbm %s2763_s7, 2048 }
  0x48   :  { %p2423_p4 = scmp.ne.s32.totalorder %s2763_s7, %s2422_s5  ;;  %p2426_p5 = scmp.lt.u32.totalorder %s2422_s5, %s2763_s7 }
  0x4a   :  { %p2428_p6 = pnand %p2426_p5, %p2423_p4 }
  0x4c   :  { %2431 = shalt.err (!%p2428_p6)
}
  0x4d   :  { %s2432_s19 = scalar_lea.vmem %s83_s1, 2048  ;;  %p2437_p8 = scmp.lt.s32.totalorder %s83_s1, %s83_s1 }
  0x4e   :  { %p2433_p7 = scmp.ne.s32.totalorder %s83_s1, %s2432_s19  ;;  %p2438_p9 = scmp.lt.s32.totalorder %s2432_s19, %s2432_s19 }
  0x50   :  { %p2439_p10 = por %p2438_p9, %p2437_p8 }
  0x52   :  { %p2440_p11 = pnand %p2439_p10, %p2433_p7 }
  0x54   :  { %2443 = shalt.err (!%p2440_p11)
}
  0x55   :  { %s2507_s3 = smov 64   ;;  %s2508_s26 = smov 4  }
  0x56   :  { %88 = dma.hbm_to_vmem [thread:$0]  %s2763_s7, 2048, %s83_s1, [#allocation9], %s2507_s3, %s2507_s3, %s2508_s26  }
  0x57   :  { %s2509_s20 = smov [#allocation11]   ;;  %s2444_s27 = scalar_lea.hbm %s2765_s9, 1024 }
  0x58   :  { %s96_s21 = sshll.u32 %s2509_s20, 4  ;;  %p2445_p12 = scmp.ne.s32.totalorder %s2765_s9, %s2444_s27  ;;  %s97_s21 = int_to_ptr.vmem [resolvable:$true] %s96_s21 }
  0x59   :  { %p2448_p13 = scmp.lt.u32.totalorder %s2444_s27, %s2765_s9 }
  0x5b   :  { %p2450_p0 = pnand %p2448_p13, %p2445_p12 }
  0x5d   :  { %2453 = shalt.err (!%p2450_p0)
}
  0x5e   :  { %s2454_s30 = scalar_lea.vmem %s97_s21, 1024  ;;  %p2459_p2 = scmp.lt.s32.totalorder %s97_s21, %s97_s21 }
  0x5f   :  { %p2455_p1 = scmp.ne.s32.totalorder %s97_s21, %s2454_s30  ;;  %p2460_p3 = scmp.lt.s32.totalorder %s2454_s30, %s2454_s30 }
  0x61   :  { %p2461_p4 = por %p2460_p3, %p2459_p2 }
  0x63   :  { %p2462_p5 = pnand %p2461_p4, %p2455_p1 }
  0x65   :  { %2465 = shalt.err (!%p2462_p5)
}
  0x66   :  { %102 = dma.hbm_to_vmem [thread:$0]  %s2765_s9, 1024, %s97_s21, [#allocation12], %s2507_s3, %s2507_s3, %s2508_s26  }
  0x67   :  { %2488 = dma.done.wait [#allocation3], 256  }
  0x68   :  { %2489 = vsyncadd [#allocation3], 4294967040 }
  0x69   :  { %2490 = dma.done.wait [#allocation6], 14336  }
  0x6a   :  { %2491 = vsyncadd [#allocation6], 4294952960 }
  0x6b   :  { %2492 = dma.done.wait [#allocation9], 6144  }
  0x6c   :  { %2493 = vsyncadd [#allocation9], 4294961152 }
  0x6d   :  { %2494 = dma.done.wait [#allocation12], 1024  }
  0x6e   :  { %2495 = vsyncadd [#allocation12], 4294966272  ;;  %v2051_v0 = vld [vmem:[#allocation5 + $0x4] ss:$16 sps:$4 sm:$0xff]   ;;  %v2053_v1 = vld [vmem:[#allocation5] ss:$16 sps:$4 sm:$0xff]  }
  0x6f   :  { %453 = vmatprep.subr.bf16.mxu0 %v2051_v0  ;;  %v2054_v2 = vld [vmem:[#allocation5 + $0x24] ss:$16 sps:$4 sm:$0xff]   ;;  %v2056_v3 = vld [vmem:[#allocation5 + $0x20] ss:$16 sps:$4 sm:$0xff]   ;;  %v2081_v9 = vld [vmem:[#allocation5 + $0xc] ss:$16 sps:$4 sm:$0xff]  }
  0x70   :  { %454 = vmatpush1.bf16.msra.mxu0 %v2053_v1  ;;  %v2057_v4 = vld [vmem:[#allocation5 + $0x44] ss:$16 sps:$4 sm:$0xff]   ;;  %v2059_v5 = vld [vmem:[#allocation5 + $0x40] ss:$16 sps:$4 sm:$0xff]   ;;  %v2083_v10 = vld [vmem:[#allocation5 + $0x8] ss:$16 sps:$4 sm:$0xff]   ;;  %496 = vmatprep.subr.bf16.mxu1 %v2081_v9 }
  0x71   :  { %455 = vmatprep.subr.bf16.mxu0 %v2054_v2  ;;  %v2060_v6 = vld [vmem:[#allocation5 + $0x64] ss:$16 sps:$4 sm:$0xff]   ;;  %v2062_v7 = vld [vmem:[#allocation5 + $0x60] ss:$16 sps:$4 sm:$0xff]   ;;  %v2087_v13 = vld [vmem:[#allocation5 + $0x2c] ss:$16 sps:$4 sm:$0xff]   ;;  %497 = vmatpush1.bf16.msra.mxu1 %v2083_v10 }
  0x72   :  { %v2063_v8 = vld [vmem:[#allocation5 + $0x84] ss:$16 sps:$4 sm:$0xff]   ;;  %v2065_v11 = vld [vmem:[#allocation5 + $0x80] ss:$16 sps:$4 sm:$0xff]   ;;  %v2089_v14 = vld [vmem:[#allocation5 + $0x28] ss:$16 sps:$4 sm:$0xff]   ;;  %498 = vmatprep.subr.bf16.mxu1 %v2087_v13 }
  0x73   :  { %v2066_v12 = vld [vmem:[#allocation5 + $0xa4] ss:$16 sps:$4 sm:$0xff]   ;;  %v2068_v15 = vld [vmem:[#allocation5 + $0xa0] ss:$16 sps:$4 sm:$0xff]   ;;  %v2093_v17 = vld [vmem:[#allocation5 + $0x4c] ss:$16 sps:$4 sm:$0xff]  }
  0x74   :  { %456 = vmatpush1.bf16.msra.mxu0 %v2056_v3  ;;  %v2069_v16 = vld [vmem:[#allocation5 + $0xc4] ss:$16 sps:$4 sm:$0xff]   ;;  %v2095_v18 = vld [vmem:[#allocation5 + $0x48] ss:$16 sps:$4 sm:$0xff]   ;;  %vm449_vm0 = vcmask 523264   ;;  %vm2511_vm1 = vmmov 0  }
  0x75   :  { %457 = vmatprep.subr.bf16.mxu0 %v2057_v4  ;;  %499 = vmatpush1.bf16.msra.mxu1 %v2089_v14  ;;  %v2098_v19 = vld [vmem:[#allocation2 + $0x4] ss:$8 sps:$4 sm:$0xff]   ;;  %v2071_v21 = vld [vmem:[#allocation5 + $0xc0] ss:$16 sps:$4 sm:$0xff]   ;;  %v2101_v23 = vld [vmem:[#allocation5 + $0x68] ss:$16 sps:$4 sm:$0xff]  }
  0x76   :  { %500 = vmatprep.subr.bf16.mxu1 %v2093_v17  ;;  %v2099_v20 = vld [vmem:[#allocation5 + $0x6c] ss:$16 sps:$4 sm:$0xff]   ;;  %1843 = vmatprep.mubr.msk.bf16.mxu0 %vm449_vm0, %v2098_v19  ;;  %v2072_v22 = vld [vmem:[#allocation5 + $0xe4] ss:$16 sps:$4 sm:$0xff]   ;;  %v2074_v25 = vld [vmem:[#allocation5 + $0xe0] ss:$16 sps:$4 sm:$0xff]  }
  0x77   :  { %1844 = vmatprep.mubr.msk.bf16.mxu1 %vm449_vm0, %v2098_v19  ;;  %v2102_v24 = vld [vmem:[#allocation5 + $0x8c] ss:$16 sps:$4 sm:$0xff]   ;;  %v2075_v26 = vld [vmem:[#allocation5 + $0x104] ss:$16 sps:$4 sm:$0xff]   ;;  %v2104_v27 = vld [vmem:[#allocation5 + $0x88] ss:$16 sps:$4 sm:$0xff]  }
  0x78   :  { %458 = vmatpush1.bf16.msra.mxu0 %v2059_v5  ;;  %v2105_v28 = vld [vmem:[#allocation5 + $0xac] ss:$16 sps:$4 sm:$0xff]   ;;  %v2077_v29 = vld [vmem:[#allocation5 + $0x100] ss:$16 sps:$4 sm:$0xff]   ;;  %v2078_v30 = vld [vmem:[#allocation5 + $0x124] ss:$16 sps:$4 sm:$0xff]  }
  0x79   :  { %459 = vmatprep.subr.bf16.mxu0 %v2060_v6  ;;  %501 = vmatpush1.bf16.msra.mxu1 %v2095_v18  ;;  %v2107_v31 = vld [vmem:[#allocation5 + $0xa8] ss:$16 sps:$4 sm:$0xff]   ;;  %v2108_v32 = vld [vmem:[#allocation5 + $0xcc] ss:$16 sps:$4 sm:$0xff]   ;;  %v2080_v33 = vld [vmem:[#allocation5 + $0x120] ss:$16 sps:$4 sm:$0xff]  }
  0x7a   :  { %502 = vmatprep.subr.bf16.mxu1 %v2099_v20  ;;  %v2084_v34 = vld [vmem:[#allocation5 + $0x144] ss:$16 sps:$4 sm:$0xff]   ;;  %v2110_v35 = vld [vmem:[#allocation5 + $0xc8] ss:$16 sps:$4 sm:$0xff]   ;;  %v2111_v36 = vld [vmem:[#allocation5 + $0xec] ss:$16 sps:$4 sm:$0xff]  }
  0x7b   :  { %v2086_v37 = vld [vmem:[#allocation5 + $0x140] ss:$16 sps:$4 sm:$0xff]   ;;  %v2090_v38 = vld [vmem:[#allocation5 + $0x164] ss:$16 sps:$4 sm:$0xff]   ;;  %v2113_v39 = vld [vmem:[#allocation5 + $0xe8] ss:$16 sps:$4 sm:$0xff]  }
  0x7c   :  { %460 = vmatpush1.bf16.msra.mxu0 %v2062_v7  ;;  %v2114_v40 = vld [vmem:[#allocation5 + $0x10c] ss:$16 sps:$4 sm:$0xff]   ;;  %v2092_v41 = vld [vmem:[#allocation5 + $0x160] ss:$16 sps:$4 sm:$0xff]   ;;  %v2116_v42 = vld [vmem:[#allocation5 + $0x108] ss:$16 sps:$4 sm:$0xff]  }
  0x7d   :  { %461 = vmatprep.subr.bf16.mxu0 %v2063_v8  ;;  %503 = vmatpush1.bf16.msra.mxu1 %v2101_v23  ;;  %v2096_v43 = vld [vmem:[#allocation2] ss:$8 sps:$4 sm:$0xff]   ;;  %v2117_v44 = vld [vmem:[#allocation5 + $0x12c] ss:$16 sps:$4 sm:$0xff]   ;;  %v2126_v46 = vld [vmem:[#allocation7] ss:$8 sps:$4 sm:$0xff]  }
  0x7e   :  { %504 = vmatprep.subr.bf16.mxu1 %v2102_v24  ;;  %v2128_v45 = vld [vmem:[#allocation7 + $0x4] ss:$8 sps:$4 sm:$0xff]   ;;  %v2131_v47 = vld [vmem:[#allocation7 + $0x14] ss:$8 sps:$4 sm:$0xff]   ;;  %v2119_v48 = vld [vmem:[#allocation5 + $0x128] ss:$16 sps:$4 sm:$0xff]  }
  0x7f   :  { %v2120_v49 = vld [vmem:[#allocation5 + $0x14c] ss:$16 sps:$4 sm:$0xff]   ;;  %v2129_v50 = vld [vmem:[#allocation7 + $0x10] ss:$8 sps:$4 sm:$0xff]   ;;  %v2132_v54 = vld [vmem:[#allocation7 + $0x20] ss:$8 sps:$4 sm:$0xff]  }
  0x80   :  { %462 = vmatpush1.bf16.msra.mxu0 %v2065_v11  ;;  %v2134_v51 = vld [vmem:[#allocation7 + $0x24] ss:$8 sps:$4 sm:$0xff]   ;;  %v2122_v52 = vld [vmem:[#allocation5 + $0x148] ss:$16 sps:$4 sm:$0xff]   ;;  %v2137_v55 = vld [vmem:[#allocation7 + $0x34] ss:$8 sps:$4 sm:$0xff]  }
  0x81   :  { %463 = vmatprep.subr.bf16.mxu0 %v2066_v12  ;;  %505 = vmatpush1.bf16.msra.mxu1 %v2104_v27  ;;  %v2123_v53 = vld [vmem:[#allocation5 + $0x16c] ss:$16 sps:$4 sm:$0xff]   ;;  %v2125_v56 = vld [vmem:[#allocation5 + $0x168] ss:$16 sps:$4 sm:$0xff]   ;;  %s2513_s26 = smov [#allocation13]   ;;  %vm1773_vm2 = vcmask 130048  }
  0x82   :  { %506 = vmatprep.subr.bf16.mxu1 %v2105_v28  ;;  %v2135_v57 = vld [vmem:[#allocation7 + $0x30] ss:$8 sps:$4 sm:$0xff]   ;;  %v2140_v58 = vld [vmem:[#allocation7 + $0x44] ss:$8 sps:$4 sm:$0xff]   ;;  %v2138_v59 = vld [vmem:[#allocation7 + $0x40] ss:$8 sps:$4 sm:$0xff]   ;;  %v180_v28 = vlaneseq }
  0x83   :  { %v2143_v60 = vld [vmem:[#allocation7 + $0x54] ss:$8 sps:$4 sm:$0xff]   ;;  %v2141_v61 = vld [vmem:[#allocation7 + $0x50] ss:$8 sps:$4 sm:$0xff]   ;;  %v2146_v62 = vld [vmem:[#allocation7 + $0x64] ss:$8 sps:$4 sm:$0xff]  }
  0x84   :  { %464 = vmatpush1.bf16.msra.mxu0 %v2068_v15  ;;  %v2144_v63 = vld [vmem:[#allocation7 + $0x60] ss:$8 sps:$4 sm:$0xff]   ;;  %v2149_v0 = vld [vmem:[#allocation7 + $0x74] ss:$8 sps:$4 sm:$0xff]   ;;  %v2147_v1 = vld [vmem:[#allocation7 + $0x70] ss:$8 sps:$4 sm:$0xff]  }
  0x85   :  { %465 = vmatprep.subr.bf16.mxu0 %v2069_v16  ;;  %507 = vmatpush1.bf16.msra.mxu1 %v2107_v31  ;;  %v2152_v2 = vld [vmem:[#allocation7 + $0x84] ss:$8 sps:$4 sm:$0xff]   ;;  %v2150_v3 = vld [vmem:[#allocation7 + $0x80] ss:$8 sps:$4 sm:$0xff]   ;;  %v2155_v4 = vld [vmem:[#allocation7 + $0x94] ss:$8 sps:$4 sm:$0xff]  }
  0x86   :  { %508 = vmatprep.subr.bf16.mxu1 %v2108_v32  ;;  %v2153_v5 = vld [vmem:[#allocation7 + $0x90] ss:$8 sps:$4 sm:$0xff]   ;;  %v2158_v6 = vld [vmem:[#allocation7 + $0xa4] ss:$8 sps:$4 sm:$0xff]   ;;  %v2156_v7 = vld [vmem:[#allocation7 + $0xa0] ss:$8 sps:$4 sm:$0xff]  }
  0x87   :  { %v2161_v8 = vld [vmem:[#allocation7 + $0xb4] ss:$8 sps:$4 sm:$0xff]   ;;  %v2159_v9 = vld [vmem:[#allocation7 + $0xb0] ss:$8 sps:$4 sm:$0xff]   ;;  %v2162_v10 = vld [vmem:[#allocation7 + $0xc0] ss:$8 sps:$4 sm:$0xff]  }
  0x88   :  { %466 = vmatpush1.bf16.msra.mxu0 %v2071_v21  ;;  %v2164_v11 = vld [vmem:[#allocation7 + $0xc4] ss:$8 sps:$4 sm:$0xff]   ;;  %v2167_v12 = vld [vmem:[#allocation7 + $0xd4] ss:$8 sps:$4 sm:$0xff]   ;;  %v2165_v13 = vld [vmem:[#allocation7 + $0xd0] ss:$8 sps:$4 sm:$0xff]  }
  0x89   :  { %467 = vmatprep.subr.bf16.mxu0 %v2072_v22  ;;  %509 = vmatpush1.bf16.msra.mxu1 %v2110_v35  ;;  %v2170_v14 = vld [vmem:[#allocation7 + $0xe4] ss:$8 sps:$4 sm:$0xff]   ;;  %v2168_v15 = vld [vmem:[#allocation7 + $0xe0] ss:$8 sps:$4 sm:$0xff]   ;;  %v2173_v16 = vld [vmem:[#allocation7 + $0xf4] ss:$8 sps:$4 sm:$0xff]  }
  0x8a   :  { %510 = vmatprep.subr.bf16.mxu1 %v2111_v36  ;;  %v2171_v17 = vld [vmem:[#allocation7 + $0xf0] ss:$8 sps:$4 sm:$0xff]   ;;  %v2176_v18 = vld [vmem:[#allocation7 + $0x104] ss:$8 sps:$4 sm:$0xff]   ;;  %v2222_v19 = vld [vmem:[#allocation8] ss:$8 sps:$4 sm:$0xff]  }
  0x8b   :  { %v2224_v20 = vld [vmem:[#allocation8 + $0x4] ss:$8 sps:$4 sm:$0xff]   ;;  %v2227_v21 = vld [vmem:[#allocation8 + $0x14] ss:$8 sps:$4 sm:$0xff]   ;;  %v2225_v22 = vld [vmem:[#allocation8 + $0x10] ss:$8 sps:$4 sm:$0xff]  }
  0x8c   :  { %468 = vmatpush1.bf16.msra.mxu0 %v2074_v25  ;;  %v2230_v23 = vld [vmem:[#allocation8 + $0x24] ss:$8 sps:$4 sm:$0xff]   ;;  %v2228_v24 = vld [vmem:[#allocation8 + $0x20] ss:$8 sps:$4 sm:$0xff]   ;;  %v2233_v25 = vld [vmem:[#allocation8 + $0x34] ss:$8 sps:$4 sm:$0xff]  }
  0x8d   :  { %469 = vmatprep.subr.bf16.mxu0 %v2075_v26  ;;  %511 = vmatpush1.bf16.msra.mxu1 %v2113_v39  ;;  %v2231_v26 = vld [vmem:[#allocation8 + $0x30] ss:$8 sps:$4 sm:$0xff]   ;;  %v2236_v27 = vld [vmem:[#allocation8 + $0x44] ss:$8 sps:$4 sm:$0xff]   ;;  %v181_v31 = vshrl.u32 %v180_v28, 7  ;;  %s1781_s17 = sshll.u32 %s2513_s26, 4  ;;  %s1782_s17 = int_to_ptr.vmem [resolvable:$true] %s1781_s17 }
  0x8e   :  { %512 = vmatprep.subr.bf16.mxu1 %v2114_v40  ;;  %v2237_v32 = vld [vmem:[#allocation8 + $0x50] ss:$8 sps:$4 sm:$0xff]   ;;  %v2240_v35 = vld [vmem:[#allocation8 + $0x60] ss:$8 sps:$4 sm:$0xff]   ;;  %s2466_s15 = scalar_lea.vmem %s1782_s17, 128  ;;  %p2471_p7 = scmp.lt.s32.totalorder %s1782_s17, %s1782_s17 }
  0x8f   :  { %v178_v36 = vld [vmem:[%s2758_s2] sm:$0xf]  ;;  %p2467_p6 = scmp.ne.s32.totalorder %s1782_s17, %s2466_s15  ;;  %p2472_p8 = scmp.lt.s32.totalorder %s2466_s15, %s2466_s15 }
  0x90   :  { %470 = vmatpush1.bf16.msra.mxu0 %v2077_v29  ;;  %v2234_v29 = vld [vmem:[#allocation8 + $0x40] ss:$8 sps:$4 sm:$0xff]   ;;  %v2243_v40 = vld [vmem:[#allocation8 + $0x70] ss:$8 sps:$4 sm:$0xff]  }
  0x91   :  { %471 = vmatprep.subr.bf16.mxu0 %v2078_v30  ;;  %513 = vmatpush1.bf16.msra.mxu1 %v2116_v42  ;;  %v2239_v30 = vld [vmem:[#allocation8 + $0x54] ss:$8 sps:$4 sm:$0xff]   ;;  %p2473_p9 = por %p2472_p8, %p2471_p7 }
  0x92   :  { %514 = vmatprep.subr.bf16.mxu1 %v2117_v44 }
  0x93   :  { %p2474_p10 = pnand %p2473_p9, %p2467_p6 }
  0x94   :  { %472 = vmatpush1.bf16.msra.mxu0 %v2080_v33  ;;  %v2242_v33 = vld [vmem:[#allocation8 + $0x64] ss:$8 sps:$4 sm:$0xff]  }
  0x95   :  { %473 = vmatprep.subr.bf16.mxu0 %v2084_v34  ;;  %515 = vmatpush1.bf16.msra.mxu1 %v2119_v48  ;;  %v2665_v34 = vsub.s32 0, %v181_v31 }
  0x96   :  { %516 = vmatprep.subr.bf16.mxu1 %v2120_v49 }
  0x97   :  { %v183_v39 = vrot.slane %v178_v36, %v2665_v34 }
  0x98   :  { %474 = vmatpush1.bf16.msra.mxu0 %v2086_v37  ;;  %v2670_v37 = vsub.s32 1, %v181_v31 }
  0x99   :  { %475 = vmatprep.subr.bf16.mxu0 %v2090_v38  ;;  %517 = vmatpush1.bf16.msra.mxu1 %v2122_v52  ;;  %v2245_v38 = vld [vmem:[#allocation8 + $0x74] ss:$8 sps:$4 sm:$0xff]  }
  0x9a   :  { %518 = vmatprep.subr.bf16.mxu1 %v2123_v53 }
  0x9c   :  { %476 = vmatpush1.bf16.msra.mxu0 %v2092_v41  ;;  %v187_v41 = vrot.slane %v178_v36, %v2670_v37 }
  0x9d   :  { %1003 = vmatprep.subr.bf16.mxu0 %v2128_v45  ;;  %519 = vmatpush1.bf16.msra.mxu1 %v2125_v56 }
  0x9e   :  { %1327 = vmatprep.subr.bf16.mxu1 %v2224_v20 }
  0x9f   :  { %486 = vmatmul.mubr.bf16.vlgmr.msra.gmra.mrb[0].mxu0 %v2096_v43 }
  0xa0   :  { %1004 = vmatpush1.bf16.msra.mxu0 %v2126_v46  ;;  %529 = vmatmul.mubr.bf16.vlgmr.msra.gmra.mrb[0].mxu1 %v2096_v43 }
  0xa1   :  { %1005 = vmatprep.subr.bf16.mxu0 %v2131_v47  ;;  %1328 = vmatpush1.bf16.msra.mxu1 %v2222_v19 }
  0xa2   :  { %1329 = vmatprep.subr.bf16.mxu1 %v2227_v21 }
  0xa4   :  { %1006 = vmatpush1.bf16.msra.mxu0 %v2129_v50 }
  0xa5   :  { %1007 = vmatprep.subr.bf16.mxu0 %v2134_v51  ;;  %1330 = vmatpush1.bf16.msra.mxu1 %v2225_v22 }
  0xa6   :  { %1331 = vmatprep.subr.bf16.mxu1 %v2230_v23 }
  0xa8   :  { %1008 = vmatpush1.bf16.msra.mxu0 %v2132_v54 }
  0xa9   :  { %1009 = vmatprep.subr.bf16.mxu0 %v2137_v55  ;;  %1332 = vmatpush1.bf16.msra.mxu1 %v2228_v24 }
  0xaa   :  { %1333 = vmatprep.subr.bf16.mxu1 %v2233_v25 }
  0xac   :  { %1010 = vmatpush1.bf16.msra.mxu0 %v2135_v57 }
  0xad   :  { %1011 = vmatprep.subr.bf16.mxu0 %v2140_v58  ;;  %1334 = vmatpush1.bf16.msra.mxu1 %v2231_v26  ;;  %v190_v58 = vsub.s32 2, %v181_v31 }
  0xae   :  { %1335 = vmatprep.subr.bf16.mxu1 %v2236_v27 }
  0xb0   :  { %1012 = vmatpush1.bf16.msra.mxu0 %v2138_v59 }
  0xb1   :  { %1013 = vmatprep.subr.bf16.mxu0 %v2143_v60  ;;  %1336 = vmatpush1.bf16.msra.mxu1 %v2234_v29 }
  0xb2   :  { %1337 = vmatprep.subr.bf16.mxu1 %v2239_v30 }
  0xb4   :  { %1014 = vmatpush1.bf16.msra.mxu0 %v2141_v61  ;;  %v194_v61 = vsub.s32 3, %v181_v31 }
  0xb5   :  { %1015 = vmatprep.subr.bf16.mxu0 %v2146_v62  ;;  %1338 = vmatpush1.bf16.msra.mxu1 %v2237_v32 }
  0xb6   :  { %1339 = vmatprep.subr.bf16.mxu1 %v2242_v33 }
  0xb8   :  { %1016 = vmatpush1.bf16.msra.mxu0 %v2144_v63 }
  0xb9   :  { %1017 = vmatprep.subr.bf16.mxu0 %v2149_v0  ;;  %1340 = vmatpush1.bf16.msra.mxu1 %v2240_v35 }
  0xba   :  { %1341 = vmatprep.subr.bf16.mxu1 %v2245_v38 }
  0xbc   :  { %1018 = vmatpush1.bf16.msra.mxu0 %v2147_v1 }
  0xbd   :  { %1019 = vmatprep.subr.bf16.mxu0 %v2152_v2  ;;  %1342 = vmatpush1.bf16.msra.mxu1 %v2243_v40 }
  0xc0   :  { %1020 = vmatpush1.bf16.msra.mxu0 %v2150_v3 }
  0xc1   :  { %1021 = vmatprep.subr.bf16.mxu0 %v2155_v4  ;;  %v191_v4 = vrot.slane %v178_v36, %v190_v58  ;;  %v2174_v58 = vld [vmem:[#allocation7 + $0x100] ss:$8 sps:$4 sm:$0xff]  }
  0xc4   :  { %1022 = vmatpush1.bf16.msra.mxu0 %v2153_v5 }
  0xc5   :  { %1023 = vmatprep.subr.bf16.mxu0 %v2158_v6 }
  0xc8   :  { %1024 = vmatpush1.bf16.msra.mxu0 %v2156_v7  ;;  %v195_v7 = vrot.slane %v178_v36, %v194_v61 }
  0xc9   :  { %1025 = vmatprep.subr.bf16.mxu0 %v2161_v8 }
  0xcc   :  { %1026 = vmatpush1.bf16.msra.mxu0 %v2159_v9 }
  0xcd   :  { %1027 = vmatprep.subr.bf16.mxu0 %v2164_v11 }
  0xd0   :  { %1028 = vmatpush1.bf16.msra.mxu0 %v2162_v10 }
  0xd1   :  { %1029 = vmatprep.subr.bf16.mxu0 %v2167_v12 }
  0xd4   :  { %1030 = vmatpush1.bf16.msra.mxu0 %v2165_v13 }
  0xd5   :  { %1031 = vmatprep.subr.bf16.mxu0 %v2170_v14 }
  0xd8   :  { %1032 = vmatpush1.bf16.msra.mxu0 %v2168_v15 }
  0xd9   :  { %1033 = vmatprep.subr.bf16.mxu0 %v2173_v16 }
  0xdc   :  { %1034 = vmatpush1.bf16.msra.mxu0 %v2171_v17 }
  0xdd   :  { %1046 = vmatprep.subr.bf16.mxu0 %v2176_v18 }
 0x172   :  { %v487_v42 = vpop.f32.mrb[0].mxu0 }
 0x173   :  { %v2674_v43 = vadd.f32 %v487_v42, %v183_v39  ;;  %v489_v44 = vpop.f32.mrb[1].mxu0  ;;  %v530_v10 = vpop.f32.mrb[0].mxu1 }
 0x174   :  { %v2676_v45 = vadd.f32 %v489_v44, %v187_v41  ;;  %v491_v46 = vpop.f32.mrb[2].mxu0  ;;  %v2698_v11 = vadd.f32 %v530_v10, %v191_v4  ;;  %v532_v12 = vpop.f32.mrb[1].mxu1 }
 0x175   :  { %v539_v47 = vmul.f32 0.044715, %v2674_v43  ;;  %v2679_v48 = vadd.f32 %v491_v46, %v183_v39  ;;  %v493_v49 = vpop.f32.mrb[3].mxu0  ;;  %v2700_v13 = vadd.f32 %v532_v12, %v195_v7  ;;  %v534_v14 = vpop.f32.mrb[2].mxu1 }
 0x176   :  { %v540_v50 = vmul.f32 0.044715, %v2676_v45  ;;  %v2682_v51 = vadd.f32 %v493_v49, %v187_v41  ;;  %v541_v15 = vmul.f32 0.044715, %v2698_v11  ;;  %v535_v16 = vadd.f32 %v534_v14, %v191_v4  ;;  %v536_v17 = vpop.f32.mrb[3].mxu1 }
 0x177   :  { %v547_v52 = vmul.f32 %v539_v47, %v2674_v43  ;;  %v543_v53 = vmul.f32 0.044715, %v2679_v48  ;;  %v542_v18 = vmul.f32 0.044715, %v2700_v13  ;;  %v537_v19 = vadd.f32 %v536_v17, %v195_v7  ;;  %v2183_v7 = vld [vmem:[#allocation7 + $0x130] ss:$8 sps:$4 sm:$0xff]  }
 0x178   :  { %v548_v54 = vmul.f32 %v540_v50, %v2676_v45  ;;  %v544_v55 = vmul.f32 0.044715, %v2682_v51  ;;  %v549_v20 = vmul.f32 %v541_v15, %v2698_v11  ;;  %v545_v21 = vmul.f32 0.044715, %v535_v16  ;;  %v2186_v14 = vld [vmem:[#allocation7 + $0x140] ss:$8 sps:$4 sm:$0xff]  }
 0x179   :  { %v555_v56 = vmul.f32 %v547_v52, %v2674_v43  ;;  %v551_v57 = vmul.f32 %v543_v53, %v2679_v48  ;;  %v550_v22 = vmul.f32 %v542_v18, %v2700_v13  ;;  %v546_v23 = vmul.f32 0.044715, %v537_v19  ;;  %v2191_v15 = vld [vmem:[#allocation7 + $0x154] ss:$8 sps:$4 sm:$0xff]   ;;  %v2189_v17 = vld [vmem:[#allocation7 + $0x150] ss:$8 sps:$4 sm:$0xff]  }
 0x17a   :  { %v556_v59 = vmul.f32 %v548_v54, %v2676_v45  ;;  %v552_v60 = vmul.f32 %v544_v55, %v2682_v51  ;;  %v557_v24 = vmul.f32 %v549_v20, %v2698_v11  ;;  %v553_v25 = vmul.f32 %v545_v21, %v535_v16  ;;  %v2192_v18 = vld [vmem:[#allocation7 + $0x160] ss:$8 sps:$4 sm:$0xff]   ;;  %v2203_v21 = vld [vmem:[#allocation7 + $0x194] ss:$8 sps:$4 sm:$0xff]  }
 0x17b   :  { %v563_v62 = vadd.f32 %v555_v56, %v2674_v43  ;;  %v559_v63 = vmul.f32 %v551_v57, %v2679_v48  ;;  %v558_v26 = vmul.f32 %v550_v22, %v2700_v13  ;;  %v554_v27 = vmul.f32 %v546_v23, %v537_v19  ;;  %v2198_v20 = vld [vmem:[#allocation7 + $0x180] ss:$8 sps:$4 sm:$0xff]   ;;  %v2201_v22 = vld [vmem:[#allocation7 + $0x190] ss:$8 sps:$4 sm:$0xff]   ;;  %v2206_v23 = vld [vmem:[#allocation7 + $0x1a4] ss:$8 sps:$4 sm:$0xff]  }
 0x17c   :  { %v564_v0 = vadd.f32 %v556_v59, %v2676_v45  ;;  %v560_v1 = vmul.f32 %v552_v60, %v2682_v51  ;;  %v565_v29 = vadd.f32 %v557_v24, %v2698_v11  ;;  %v561_v30 = vmul.f32 %v553_v25, %v535_v16  ;;  %v2179_v59 = vld [vmem:[#allocation7 + $0x114] ss:$8 sps:$4 sm:$0xff]   ;;  %v2177_v60 = vld [vmem:[#allocation7 + $0x110] ss:$8 sps:$4 sm:$0xff]   ;;  %v2204_v24 = vld [vmem:[#allocation7 + $0x1a0] ss:$8 sps:$4 sm:$0xff]  }
 0x17d   :  { %v571_v2 = vmul.f32 0.7978846, %v563_v62  ;;  %v567_v3 = vadd.f32 %v559_v63, %v2679_v48  ;;  %v566_v33 = vadd.f32 %v558_v26, %v2700_v13  ;;  %v562_v35 = vmul.f32 %v554_v27, %v537_v19  ;;  %v2209_v25 = vld [vmem:[#allocation7 + $0x1b4] ss:$8 sps:$4 sm:$0xff]   ;;  %v2207_v26 = vld [vmem:[#allocation7 + $0x1b0] ss:$8 sps:$4 sm:$0xff]  }
 0x17e   :  { %v572_v5 = vmul.f32 0.7978846, %v564_v0  ;;  %v568_v6 = vadd.f32 %v560_v1, %v2682_v51  ;;  %v573_v39 = vmul.f32 0.7978846, %v565_v29  ;;  %v569_v40 = vadd.f32 %v561_v30, %v535_v16  ;;  %v2185_v1 = vld [vmem:[#allocation7 + $0x134] ss:$8 sps:$4 sm:$0xff]  }
 0x17f   :  { %2294 = vtanh.f32 %v571_v2  ;;  %v575_v8 = vmul.f32 0.7978846, %v567_v3  ;;  %v574_v44 = vmul.f32 0.7978846, %v566_v33  ;;  %v570_v46 = vadd.f32 %v562_v35, %v537_v19  ;;  %v2212_v27 = vld [vmem:[#allocation7 + $0x1c4] ss:$8 sps:$4 sm:$0xff]  }
 0x180   :  { %v576_v9 = vmul.f32 0.7978846, %v568_v6  ;;  %2296 = vtanh.f32 %v572_v5  ;;  %v577_v49 = vmul.f32 0.7978846, %v569_v40  ;;  %v2215_v29 = vld [vmem:[#allocation7 + $0x1d4] ss:$8 sps:$4 sm:$0xff]  }
 0x181   :  { %2298 = vtanh.f32 %v575_v8  ;;  %v578_v53 = vmul.f32 0.7978846, %v570_v46  ;;  %v2213_v30 = vld [vmem:[#allocation7 + $0x1d0] ss:$8 sps:$4 sm:$0xff]   ;;  %v2221_v33 = vld [vmem:[#allocation7 + $0x1f4] ss:$8 sps:$4 sm:$0xff]  }
 0x182   :  { %2300 = vtanh.f32 %v576_v9  ;;  %v2188_v9 = vld [vmem:[#allocation7 + $0x144] ss:$8 sps:$4 sm:$0xff]   ;;  %v2219_v35 = vld [vmem:[#allocation7 + $0x1f0] ss:$8 sps:$4 sm:$0xff]  }
 0x183   :  { %2302 = vtanh.f32 %v573_v39  ;;  %v2251_v39 = vld [vmem:[#allocation8 + $0x94] ss:$8 sps:$4 sm:$0xff]   ;;  %v2249_v40 = vld [vmem:[#allocation8 + $0x90] ss:$8 sps:$4 sm:$0xff]  }
 0x184   :  { %2304 = vtanh.f32 %v574_v44  ;;  %v2257_v44 = vld [vmem:[#allocation8 + $0xb4] ss:$8 sps:$4 sm:$0xff]   ;;  %v2255_v46 = vld [vmem:[#allocation8 + $0xb0] ss:$8 sps:$4 sm:$0xff]  }
 0x185   :  { %2306 = vtanh.f32 %v577_v49  ;;  %v2260_v49 = vld [vmem:[#allocation8 + $0xc4] ss:$8 sps:$4 sm:$0xff]  }
 0x186   :  { %2308 = vtanh.f32 %v578_v53  ;;  %v2266_v53 = vld [vmem:[#allocation8 + $0xe4] ss:$8 sps:$4 sm:$0xff]  }
 0x189   :  { %v2295_v28 = vpop.eup %2294 }
 0x18a   :  { %v2297_v31 = vpop.eup %2296  ;;  %v587_v32 = vmul.f32 %v2295_v28, %v2674_v43  ;;  %v2210_v28 = vld [vmem:[#allocation7 + $0x1c0] ss:$8 sps:$4 sm:$0xff]  }
 0x18b   :  { %v2299_v36 = vpop.eup %2298  ;;  %v588_v38 = vmul.f32 %v2297_v31, %v2676_v45  ;;  %v2218_v31 = vld [vmem:[#allocation7 + $0x1e4] ss:$8 sps:$4 sm:$0xff]  }
 0x18c   :  { %v2301_v41 = vpop.eup %2300  ;;  %v591_v42 = vmul.f32 %v2299_v36, %v2679_v48  ;;  %v595_v50 = vadd.f32 %v587_v32, %v2674_v43  ;;  %v2182_v43 = vld [vmem:[#allocation7 + $0x124] ss:$8 sps:$4 sm:$0xff]   ;;  %v2216_v32 = vld [vmem:[#allocation7 + $0x1e0] ss:$8 sps:$4 sm:$0xff]  }
 0x18d   :  { %v592_v47 = vmul.f32 %v2301_v41, %v2682_v51  ;;  %v596_v54 = vadd.f32 %v588_v38, %v2676_v45  ;;  %v2303_v61 = vpop.eup %2302  ;;  %v2180_v45 = vld [vmem:[#allocation7 + $0x120] ss:$8 sps:$4 sm:$0xff]   ;;  %v2248_v36 = vld [vmem:[#allocation8 + $0x84] ss:$8 sps:$4 sm:$0xff]  }
 0x18e   :  { %v599_v52 = vadd.f32 %v591_v42, %v2679_v48  ;;  %v2305_v48 = vpop.eup %2304  ;;  %v589_v62 = vmul.f32 %v2303_v61, %v2698_v11  ;;  %v2246_v38 = vld [vmem:[#allocation8 + $0x80] ss:$8 sps:$4 sm:$0xff]   ;;  %1343 = vmatprep.subr.bf16.mxu1 %v2248_v36  ;;  %v2254_v41 = vld [vmem:[#allocation8 + $0xa4] ss:$8 sps:$4 sm:$0xff]  }
 0x18f   :  { %v600_v55 = vadd.f32 %v592_v47, %v2682_v51  ;;  %v2307_v63 = vpop.eup %2306  ;;  %v590_v51 = vmul.f32 %v2305_v48, %v2700_v13  ;;  %1344 = vmatpush1.bf16.msra.mxu1 %v2246_v38  ;;  %v2252_v42 = vld [vmem:[#allocation8 + $0xa0] ss:$8 sps:$4 sm:$0xff]  }
 0x190   :  { %v603_v56 = vpack.c.bf16 %v599_v52, %v595_v50  ;;  %v2309_v0 = vpop.eup %2308  ;;  %v593_v2 = vmul.f32 %v2307_v63, %v535_v16  ;;  %v597_v3 = vadd.f32 %v589_v62, %v2698_v11  ;;  %v2194_v11 = vld [vmem:[#allocation7 + $0x164] ss:$8 sps:$4 sm:$0xff]   ;;  %1345 = vmatprep.subr.bf16.mxu1 %v2251_v39  ;;  %v2258_v47 = vld [vmem:[#allocation8 + $0xc0] ss:$8 sps:$4 sm:$0xff]   ;;  %v2263_v50 = vld [vmem:[#allocation8 + $0xd4] ss:$8 sps:$4 sm:$0xff]  }
 0x191   :  { %v604_v57 = vpack.c.bf16 %v600_v55, %v596_v54  ;;  %v594_v4 = vmul.f32 %v2309_v0, %v537_v19  ;;  %v598_v5 = vadd.f32 %v590_v51, %v2700_v13  ;;  %v2197_v13 = vld [vmem:[#allocation7 + $0x174] ss:$8 sps:$4 sm:$0xff]   ;;  %v2261_v52 = vld [vmem:[#allocation8 + $0xd0] ss:$8 sps:$4 sm:$0xff]   ;;  %v2264_v54 = vld [vmem:[#allocation8 + $0xe0] ss:$8 sps:$4 sm:$0xff]  }
 0x192   :  { %v601_v6 = vadd.f32 %v593_v2, %v535_v16  ;;  %v2195_v16 = vld [vmem:[#allocation7 + $0x170] ss:$8 sps:$4 sm:$0xff]   ;;  %v2269_v55 = vld [vmem:[#allocation8 + $0xf4] ss:$8 sps:$4 sm:$0xff]   ;;  %v2271_v36 = vld [vmem:[#allocation10] sm:$0xff]  }
 0x193   :  { %1035 = vmatprep.mubr.bf16.mxu0 %v604_v57  ;;  %v602_v8 = vadd.f32 %v594_v4, %v537_v19  ;;  %v2200_v19 = vld [vmem:[#allocation7 + $0x184] ss:$8 sps:$4 sm:$0xff]   ;;  %1346 = vmatpush1.bf16.msra.mxu1 %v2249_v40  ;;  %v671_v57 = vld [vmem:[%s2760_s4] sm:$0x3] }
 0x194   :  { %1036 = vmatmul.mubr.bf16.vlgmr.msra.gmra.mrb[4].mxu0 %v603_v56  ;;  %v605_v10 = vpack.c.bf16 %v601_v6, %v597_v3  ;;  %1347 = vmatprep.subr.bf16.mxu1 %v2254_v41  ;;  %v2267_v56 = vld [vmem:[#allocation8 + $0xf0] ss:$8 sps:$4 sm:$0xff]   ;;  %v2272_v38 = vld [vmem:[#allocation10 + $0x48] sm:$0xff]  }
 0x195   :  { %1047 = vmatpush1.bf16.msra.mxu0 %v2174_v58  ;;  %v606_v12 = vpack.c.bf16 %v602_v8, %v598_v5  ;;  %v676_v58 = vrot.slane %v671_v57, %v2665_v34  ;;  %v2273_v39 = vld [vmem:[#allocation10 + $0x8] sm:$0xff]   ;;  %v2274_v40 = vld [vmem:[#allocation10 + $0x50] sm:$0xff]  }
 0x196   :  { %1048 = vmatprep.subr.bf16.mxu0 %v2179_v59  ;;  %v680_v59 = vrot.slane %v671_v57, %v2670_v37  ;;  %v2275_v41 = vld [vmem:[#allocation10 + $0x10] sm:$0xff]  }
 0x197   :  { %1078 = vmatprep.mubr.bf16.mxu0 %v606_v12  ;;  %1348 = vmatpush1.bf16.msra.mxu1 %v2252_v42  ;;  %v2276_v42 = vld [vmem:[#allocation10 + $0x58] sm:$0xff]  }
 0x198   :  { %1349 = vmatprep.subr.bf16.mxu1 %v2257_v44  ;;  %v2277_v44 = vld [vmem:[#allocation10 + $0x18] sm:$0xff]  }
 0x199   :  { %1049 = vmatpush1.bf16.msra.mxu0 %v2177_v60 }
 0x19a   :  { %1050 = vmatprep.subr.bf16.mxu0 %v2182_v43 }
 0x19b   :  { %1350 = vmatpush1.bf16.msra.mxu1 %v2255_v46  ;;  %v2278_v46 = vld [vmem:[#allocation10 + $0x60] sm:$0xff]  }
 0x19c   :  { %1351 = vmatprep.subr.bf16.mxu1 %v2260_v49  ;;  %v2280_v49 = vld [vmem:[#allocation10 + $0x68] sm:$0xff]  }
 0x19d   :  { %1051 = vmatpush1.bf16.msra.mxu0 %v2180_v45 }
 0x19e   :  { %1052 = vmatprep.subr.bf16.mxu0 %v2185_v1 }
 0x19f   :  { %1352 = vmatpush1.bf16.msra.mxu1 %v2258_v47  ;;  %v2279_v47 = vld [vmem:[#allocation10 + $0x20] sm:$0xff]  }
 0x1a0   :  { %1353 = vmatprep.subr.bf16.mxu1 %v2263_v50  ;;  %v2281_v50 = vld [vmem:[#allocation10 + $0x28] sm:$0xff]  }
 0x1a1   :  { %1053 = vmatpush1.bf16.msra.mxu0 %v2183_v7 }
 0x1a2   :  { %1054 = vmatprep.subr.bf16.mxu0 %v2188_v9 }
 0x1a3   :  { %1354 = vmatpush1.bf16.msra.mxu1 %v2261_v52  ;;  %v2282_v52 = vld [vmem:[#allocation10 + $0x70] sm:$0xff]  }
 0x1a4   :  { %1355 = vmatprep.subr.bf16.mxu1 %v2266_v53  ;;  %v2283_v53 = vld [vmem:[#allocation10 + $0x30] sm:$0xff]  }
 0x1a5   :  { %1055 = vmatpush1.bf16.msra.mxu0 %v2186_v14 }
 0x1a6   :  { %1056 = vmatprep.subr.bf16.mxu0 %v2191_v15 }
 0x1a7   :  { %1356 = vmatpush1.bf16.msra.mxu1 %v2264_v54  ;;  %v2284_v54 = vld [vmem:[#allocation10 + $0x78] sm:$0xff]  }
 0x1a8   :  { %1357 = vmatprep.subr.bf16.mxu1 %v2269_v55  ;;  %v2285_v55 = vld [vmem:[#allocation10 + $0x38] sm:$0xff]  }
 0x1a9   :  { %1057 = vmatpush1.bf16.msra.mxu0 %v2189_v17 }
 0x1aa   :  { %1058 = vmatprep.subr.bf16.mxu0 %v2194_v11 }
 0x1ab   :  { %1358 = vmatpush1.bf16.msra.mxu1 %v2267_v56  ;;  %v1155_v56 = vld [vmem:[%s2762_s6] sm:$0x3] }
 0x1ac   :  { %v1160_v57 = vrot.slane %v1155_v56, %v2665_v34 }
 0x1ad   :  { %1059 = vmatpush1.bf16.msra.mxu0 %v2192_v18 }
 0x1ae   :  { %1060 = vmatprep.subr.bf16.mxu0 %v2197_v13 }
 0x1b1   :  { %1061 = vmatpush1.bf16.msra.mxu0 %v2195_v16 }
 0x1b2   :  { %1062 = vmatprep.subr.bf16.mxu0 %v2200_v19 }
 0x1b5   :  { %1063 = vmatpush1.bf16.msra.mxu0 %v2198_v20 }
 0x1b6   :  { %1064 = vmatprep.subr.bf16.mxu0 %v2203_v21 }
 0x1b9   :  { %1065 = vmatpush1.bf16.msra.mxu0 %v2201_v22 }
 0x1ba   :  { %1066 = vmatprep.subr.bf16.mxu0 %v2206_v23 }
 0x1bd   :  { %1067 = vmatpush1.bf16.msra.mxu0 %v2204_v24 }
 0x1be   :  { %1068 = vmatprep.subr.bf16.mxu0 %v2209_v25 }
 0x1c1   :  { %1069 = vmatpush1.bf16.msra.mxu0 %v2207_v26 }
 0x1c2   :  { %1070 = vmatprep.subr.bf16.mxu0 %v2212_v27 }
 0x1c5   :  { %1071 = vmatpush1.bf16.msra.mxu0 %v2210_v28 }
 0x1c6   :  { %1072 = vmatprep.subr.bf16.mxu0 %v2215_v29 }
 0x1c9   :  { %1073 = vmatpush1.bf16.msra.mxu0 %v2213_v30 }
 0x1ca   :  { %1074 = vmatprep.subr.bf16.mxu0 %v2218_v31 }
 0x1cd   :  { %1075 = vmatpush1.bf16.msra.mxu0 %v2216_v32 }
 0x1ce   :  { %1076 = vmatprep.subr.bf16.mxu0 %v2221_v33 }
 0x1d1   :  { %1077 = vmatpush1.bf16.msra.mxu0 %v2219_v35  ;;  %v2270_v35 = vld [vmem:[#allocation10 + $0x40] sm:$0xff]  }
 0x1d2   :  { %1967 = vmatprep.subr.bf16.mxu1 %v2270_v35  ;;  %v2288_v35 = vld [vmem:[#allocation11 + $0x10] sm:$0xff]  }
 0x1d4   :  { %1079 = vmatmul.mubr.bf16.vlgmr.msra.gmra.mrb[4].mxu0 %v605_v10 }
 0x2a7   :  { %v1080_v60 = vpop.f32.mrb[4].mxu0 }
 0x2a8   :  { %v2026_v43 = vadd.f32 %v1080_v60, %v676_v58  ;;  %v1082_v61 = vpop.f32.mrb[5].mxu0 }
 0x2a9   :  { %v2027_v48 = vadd.f32 %v1082_v61, %v680_v59  ;;  %v1084_v62 = vpop.f32.mrb[6].mxu0 }
 0x2aa   :  { %v1089_v63 = vmul.f32 0.044715, %v2026_v43  ;;  %v2028_v45 = vadd.f32 %v1084_v62, %v676_v58  ;;  %v1086_v51 = vpop.f32.mrb[7].mxu0  ;;  %v1164_v58 = vrot.slane %v1155_v56, %v2670_v37 }
 0x2ab   :  { %v1090_v0 = vmul.f32 0.044715, %v2027_v48  ;;  %v2029_v1 = vadd.f32 %v1086_v51, %v680_v59 }
 0x2ac   :  { %v1093_v2 = vmul.f32 %v2026_v43, %v1089_v63  ;;  %v1091_v3 = vmul.f32 0.044715, %v2028_v45 }
 0x2ad   :  { %v1094_v4 = vmul.f32 %v2027_v48, %v1090_v0  ;;  %v1092_v5 = vmul.f32 0.044715, %v2029_v1 }
 0x2ae   :  { %v1097_v6 = vmul.f32 %v2026_v43, %v1093_v2  ;;  %v1095_v7 = vmul.f32 %v2028_v45, %v1091_v3 }
 0x2af   :  { %v1098_v8 = vmul.f32 %v2027_v48, %v1094_v4  ;;  %v1096_v9 = vmul.f32 %v2029_v1, %v1092_v5 }
 0x2b0   :  { %v1101_v10 = vadd.f32 %v2026_v43, %v1097_v6  ;;  %v1099_v12 = vmul.f32 %v2028_v45, %v1095_v7 }
 0x2b1   :  { %v1102_v14 = vadd.f32 %v2027_v48, %v1098_v8  ;;  %v1100_v15 = vmul.f32 %v2029_v1, %v1096_v9 }
 0x2b2   :  { %v1105_v17 = vmul.f32 0.7978846, %v1101_v10  ;;  %v1103_v11 = vadd.f32 %v2028_v45, %v1099_v12 }
 0x2b3   :  { %v1106_v18 = vmul.f32 0.7978846, %v1102_v14  ;;  %v1104_v13 = vadd.f32 %v2029_v1, %v1100_v15 }
 0x2b4   :  { %2310 = vtanh.f32 %v1105_v17  ;;  %v1107_v16 = vmul.f32 0.7978846, %v1103_v11 }
 0x2b5   :  { %v1108_v19 = vmul.f32 0.7978846, %v1104_v13  ;;  %2312 = vtanh.f32 %v1106_v18 }
 0x2b6   :  { %2314 = vtanh.f32 %v1107_v16 }
 0x2b7   :  { %2316 = vtanh.f32 %v1108_v19 }
 0x2be   :  { %v2311_v20 = vpop.eup %2310 }
 0x2bf   :  { %v2313_v21 = vpop.eup %2312  ;;  %v1113_v22 = vmul.f32 %v2311_v20, %v2026_v43 }
 0x2c0   :  { %v2315_v23 = vpop.eup %2314  ;;  %v1114_v24 = vmul.f32 %v2313_v21, %v2027_v48 }
 0x2c1   :  { %v2317_v25 = vpop.eup %2316  ;;  %v1115_v26 = vmul.f32 %v2315_v23, %v2028_v45  ;;  %v1117_v28 = vadd.f32 %v2026_v43, %v1113_v22 }
 0x2c2   :  { %v1116_v27 = vmul.f32 %v2317_v25, %v2029_v1  ;;  %v1118_v30 = vadd.f32 %v2027_v48, %v1114_v24 }
 0x2c3   :  { %v1119_v29 = vadd.f32 %v2028_v45, %v1115_v26 }
 0x2c4   :  { %v1120_v31 = vadd.f32 %v2029_v1, %v1116_v27 }
 0x2c5   :  { %v1121_v32 = vpack.c.bf16 %v1119_v29, %v1117_v28 }
 0x2c6   :  { %v1122_v33 = vpack.c.bf16 %v1120_v31, %v1118_v30  ;;  %v2286_v31 = vld [vmem:[#allocation11] sm:$0xff]  }
 0x2c8   :  { %1359 = vmatprep.mubr.bf16.mxu1 %v1122_v33  ;;  %v2287_v33 = vld [vmem:[#allocation11 + $0x8] sm:$0xff]  }
 0x2c9   :  { %1360 = vmatmul.mubr.bf16.vlgmr.msra.gmra.mrb[4].mxu1 %v1121_v32  ;;  %v2510_v32 = vmov 0.0  }
 0x2ca   :  { %1968 = vmatpush3.bf16.msra.mxu1 %v2271_v36  ;;  %2020 = vmatprep.subr.bf16.mxu0 %v2510_v32  ;;  %v2289_v36 = vld [vmem:[#allocation11 + $0x18] sm:$0xff]  }
 0x2cb   :  { %1969 = vmatprep.subr.bf16.mxu1 %v2272_v38  ;;  %v2290_v38 = vld [vmem:[#allocation11 + $0x20] sm:$0xff]   ;;  %2022 = vmatprep.mubr.msk.bf16.mxu0 %vm2511_vm1, %v2510_v32 }
 0x2ce   :  { %1970 = vmatpush3.bf16.msra.mxu1 %v2273_v39  ;;  %v2291_v39 = vld [vmem:[#allocation11 + $0x28] sm:$0xff]  }
 0x2cf   :  { %1971 = vmatprep.subr.bf16.mxu1 %v2274_v40  ;;  %v2292_v40 = vld [vmem:[#allocation11 + $0x30] sm:$0xff]  }
 0x2d2   :  { %1972 = vmatpush3.bf16.msra.mxu1 %v2275_v41  ;;  %v2293_v41 = vld [vmem:[#allocation11 + $0x38] sm:$0xff]  }
 0x2d3   :  { %1973 = vmatprep.subr.bf16.mxu1 %v2276_v42 }
 0x2d6   :  { %1974 = vmatpush3.bf16.msra.mxu1 %v2277_v44  ;;  %v1941_v44 = vld [vmem:[%s2764_s8] ss:$0 sm:$0xff] }
 0x2d7   :  { %1975 = vmatprep.subr.bf16.mxu1 %v2278_v46 }
 0x2da   :  { %1976 = vmatpush3.bf16.msra.mxu1 %v2279_v47 }
 0x2db   :  { %1977 = vmatprep.subr.bf16.mxu1 %v2280_v49 }
 0x2de   :  { %1978 = vmatpush3.bf16.msra.mxu1 %v2281_v50 }
 0x2df   :  { %1979 = vmatprep.subr.bf16.mxu1 %v2282_v52 }
 0x2e2   :  { %1980 = vmatpush3.bf16.msra.mxu1 %v2283_v53 }
 0x2e3   :  { %1981 = vmatprep.subr.bf16.mxu1 %v2284_v54 }
 0x2e6   :  { %1982 = vmatpush3.bf16.msra.mxu1 %v2285_v55 }
 0x2e7   :  { %2000 = vmatprep.subr.bf16.mxu1 %v2510_v32 }
 0x39c   :  { %v1361_v59 = vpop.f32.mrb[4].mxu1 }
 0x39d   :  { %v1362_v60 = vadd.f32 %v1361_v59, %v1160_v57  ;;  %v1363_v43 = vpop.f32.mrb[5].mxu1 }
 0x39e   :  { %v1364_v61 = vadd.f32 %v1363_v43, %v1164_v58  ;;  %v1365_v48 = vpop.f32.mrb[6].mxu1 }
 0x39f   :  { %v1370_v62 = vmul.f32 0.044715, %v1362_v60  ;;  %v1366_v63 = vadd.f32 %v1365_v48, %v1160_v57  ;;  %v1367_v45 = vpop.f32.mrb[7].mxu1 }
 0x3a0   :  { %v1371_v51 = vmul.f32 0.044715, %v1364_v61  ;;  %v1368_v0 = vadd.f32 %v1367_v45, %v1164_v58 }
 0x3a1   :  { %v1374_v1 = vmul.f32 %v1370_v62, %v1362_v60  ;;  %v1372_v2 = vmul.f32 0.044715, %v1366_v63 }
 0x3a2   :  { %v1375_v3 = vmul.f32 %v1371_v51, %v1364_v61  ;;  %v1373_v4 = vmul.f32 0.044715, %v1368_v0 }
 0x3a3   :  { %v1378_v5 = vmul.f32 %v1374_v1, %v1362_v60  ;;  %v1376_v6 = vmul.f32 %v1372_v2, %v1366_v63 }
 0x3a4   :  { %v1379_v7 = vmul.f32 %v1375_v3, %v1364_v61  ;;  %v1377_v34 = vmul.f32 %v1373_v4, %v1368_v0  ;;  %v1727_v4 = vld [vmem:[%s2768_s12] sm:$0xff] }
 0x3a5   :  { %v1382_v8 = vadd.f32 %v1378_v5, %v1362_v60  ;;  %v1380_v37 = vmul.f32 %v1376_v6, %v1366_v63  ;;  %v2512_v5 = vmov 0   ;;  %v1958_v6 = vld [vmem:[%s2766_s10] ss:$0 sm:$0xff] }
 0x3a6   :  { %v1383_v9 = vadd.f32 %v1379_v7, %v1364_v61  ;;  %v1381_v10 = vmul.f32 %v1377_v34, %v1368_v0  ;;  %2050 = vset.pattern.permute.xlu0 %v2512_v5 }
 0x3a7   :  { %v1386_v12 = vmul.f32 0.7978846, %v1382_v8  ;;  %v1384_v14 = vadd.f32 %v1380_v37, %v1366_v63  ;;  %1730 = vperm.xlu0 %2050, %v1727_v4  }
 0x3a8   :  { %v1387_v15 = vmul.f32 0.7978846, %v1383_v9  ;;  %v1385_v17 = vadd.f32 %v1381_v10, %v1368_v0 }
 0x3a9   :  { %2318 = vtanh.f32 %v1386_v12  ;;  %v1388_v11 = vmul.f32 0.7978846, %v1384_v14 }
 0x3aa   :  { %v1389_v18 = vmul.f32 0.7978846, %v1385_v17  ;;  %2320 = vtanh.f32 %v1387_v15 }
 0x3ab   :  { %2322 = vtanh.f32 %v1388_v11 }
 0x3ac   :  { %2324 = vtanh.f32 %v1389_v18 }
 0x3b3   :  { %v2319_v13 = vpop.eup %2318 }
 0x3b4   :  { %v2321_v16 = vpop.eup %2320  ;;  %v1394_v19 = vmul.f32 %v2319_v13, %v1362_v60 }
 0x3b5   :  { %v2323_v20 = vpop.eup %2322  ;;  %v1395_v21 = vmul.f32 %v2321_v16, %v1364_v61 }
 0x3b6   :  { %v2325_v22 = vpop.eup %2324  ;;  %v1396_v23 = vmul.f32 %v2323_v20, %v1366_v63  ;;  %v1398_v25 = vadd.f32 %v1394_v19, %v1362_v60 }
 0x3b7   :  { %v1397_v24 = vmul.f32 %v2325_v22, %v1368_v0  ;;  %v1399_v27 = vadd.f32 %v1395_v21, %v1364_v61 }
 0x3b8   :  { %v1400_v26 = vadd.f32 %v1396_v23, %v1366_v63 }
 0x3b9   :  { %v1401_v28 = vadd.f32 %v1397_v24, %v1368_v0 }
 0x3ba   :  { %v1402_v29 = vpack.c.bf16 %v1400_v26, %v1398_v25 }
 0x3bb   :  { %v1403_v30 = vpack.c.bf16 %v1401_v28, %v1399_v27  ;;  %v1726_v28 = vld [vmem:[%s2767_s11] sm:$0xf] }
 0x3bd   :  { %1571 = vmatprep.mubr.bf16.mxu1 %v1403_v30 }
 0x3be   :  { %1572 = vmatmul.mubr.bf16.vlgmr.msra.gmra.mrb[8].mxu1 %v1402_v29 }
 0x3bf   :  { %2001 = vmatpush3.bf16.msra.mxu1 %v2286_v31  ;;  %2016 = vmatprep.mubr.msk.bf16.mxu1 %vm2511_vm1, %v2510_v32 }
 0x3c0   :  { %2002 = vmatprep.subr.bf16.mxu1 %v2510_v32 }
 0x3c3   :  { %2003 = vmatpush3.bf16.msra.mxu1 %v2287_v33 }
 0x3c4   :  { %2004 = vmatprep.subr.bf16.mxu1 %v2510_v32 }
 0x3c7   :  { %2005 = vmatpush3.bf16.msra.mxu1 %v2288_v35 }
 0x3c8   :  { %2006 = vmatprep.subr.bf16.mxu1 %v2510_v32 }
 0x3cb   :  { %2007 = vmatpush3.bf16.msra.mxu1 %v2289_v36 }
 0x3cc   :  { %2008 = vmatprep.subr.bf16.mxu1 %v2510_v32 }
 0x3cf   :  { %2009 = vmatpush3.bf16.msra.mxu1 %v2290_v38 }
 0x3d0   :  { %2010 = vmatprep.subr.bf16.mxu1 %v2510_v32 }
 0x3d3   :  { %2011 = vmatpush3.bf16.msra.mxu1 %v2291_v39 }
 0x3d4   :  { %2012 = vmatprep.subr.bf16.mxu1 %v2510_v32 }
 0x3d7   :  { %2013 = vmatpush3.bf16.msra.mxu1 %v2292_v40 }
 0x3d8   :  { %2014 = vmatprep.subr.bf16.mxu1 %v2510_v32 }
 0x3db   :  { %2015 = vmatpush3.bf16.msra.mxu1 %v2293_v41 }
 0x426   :  { %v1731_v29 = vpop.permute.xlu0 %1730 }
 0x491   :  { %v1983_v42 = vpop.f32.mrb[8].mxu1 }
 0x492   :  { %v1984_v46 = vpop.f32.mrb[9].mxu1 }
 0x493   :  { %v1985_v47 = vadd.f32 %v1984_v46, %v1983_v42  ;;  %v1986_v49 = vpop.f32.mrb[10].mxu1 }
 0x494   :  { %v1987_v50 = vpop.f32.mrb[11].mxu1 }
 0x495   :  { %v1574_v52 = vadd.f32 %v1985_v47, %v1941_v44  ;;  %v1988_v53 = vadd.f32 %v1987_v50, %v1986_v49 }
 0x497   :  { %v1580_v54 = vmul.f32 0.044715, %v1574_v52  ;;  %v1577_v55 = vadd.f32 %v1988_v53, %v1941_v44 }
 0x499   :  { %v1582_v56 = vmul.f32 %v1580_v54, %v1574_v52  ;;  %v1581_v57 = vmul.f32 0.044715, %v1577_v55 }
 0x49b   :  { %v1584_v58 = vmul.f32 %v1582_v56, %v1574_v52  ;;  %v1583_v59 = vmul.f32 %v1581_v57, %v1577_v55 }
 0x49d   :  { %v1586_v60 = vadd.f32 %v1584_v58, %v1574_v52  ;;  %v1585_v43 = vmul.f32 %v1583_v59, %v1577_v55 }
 0x49f   :  { %v1588_v61 = vmul.f32 0.7978846, %v1586_v60  ;;  %v1587_v48 = vadd.f32 %v1585_v43, %v1577_v55 }
 0x4a1   :  { %2326 = vtanh.f32 %v1588_v61  ;;  %v1589_v62 = vmul.f32 0.7978846, %v1587_v48 }
 0x4a3   :  { %2328 = vtanh.f32 %v1589_v62 }
 0x4ab   :  { %v2327_v63 = vpop.eup %2326 }
 0x4ac   :  { %v1592_v45 = vmul.f32 %v2327_v63, %v1574_v52 }
 0x4ad   :  { %v2329_v51 = vpop.eup %2328 }
 0x4ae   :  { %v1593_v0 = vmul.f32 %v2329_v51, %v1577_v55  ;;  %v1594_v1 = vadd.f32 %v1592_v45, %v1574_v52 }
 0x4b0   :  { %v1595_v2 = vadd.f32 %v1593_v0, %v1577_v55 }
 0x4b2   :  { %v1596_v3 = vpack.c.bf16 %v1595_v2, %v1594_v1 }
 0x4b4   :  { %2017 = vmatmul.mubr.bf16.vlgmr.msra.gmra.mrb[12].mxu1 %v1596_v3 }
 0x587   :  { %v1702_v7 = vpop.f32.mrb[12].mxu1 }
 0x588   :  { %v1703_v34 = vadd.f32 %v1958_v6, %v1702_v7  ;;  %v2018_v8 = vpop.f32.mrb[13].mxu1 }
 0x589   :  { %v1705_v37 = vpop.f32.mrb[14].mxu1 }
 0x58a   :  { %v1709_v9 = vmul.f32 0.044715, %v1703_v34  ;;  %v1706_v10 = vadd.f32 %v1958_v6, %v1705_v37  ;;  %v2019_v12 = vpop.f32.mrb[15].mxu1 }
 0x58c   :  { %v1711_v14 = vmul.f32 %v1709_v9, %v1703_v34  ;;  %v1710_v15 = vmul.f32 0.044715, %v1706_v10 }
 0x58e   :  { %v1713_v17 = vmul.f32 %v1711_v14, %v1703_v34  ;;  %v1712_v11 = vmul.f32 %v1710_v15, %v1706_v10 }
 0x590   :  { %v1715_v18 = vadd.f32 %v1713_v17, %v1703_v34  ;;  %v1714_v13 = vmul.f32 %v1712_v11, %v1706_v10 }
 0x592   :  { %v1717_v16 = vmul.f32 0.7978846, %v1715_v18  ;;  %v1716_v19 = vadd.f32 %v1714_v13, %v1706_v10 }
 0x594   :  { %2330 = vtanh.f32 %v1717_v16  ;;  %v1718_v20 = vmul.f32 0.7978846, %v1716_v19 }
 0x596   :  { %2332 = vtanh.f32 %v1718_v20 }
 0x59e   :  { %v2331_v21 = vpop.eup %2330 }
 0x59f   :  { %v1721_v22 = vmul.f32 %v2331_v21, %v1703_v34 }
 0x5a0   :  { %v2333_v23 = vpop.eup %2332 }
 0x5a1   :  { %v1722_v24 = vmul.f32 %v2333_v23, %v1706_v10  ;;  %v1723_v25 = vadd.f32 %v1721_v22, %v1703_v34 }
 0x5a3   :  { %v1724_v26 = vadd.f32 %v1722_v24, %v1706_v10 }
 0x5a5   :  { %v1725_v27 = vpack.c.bf16 %v1724_v26, %v1723_v25 }
 0x5a7   :  { %2021 = vmatpush3.bf16.xpose.msra.mxu0 %v1725_v27 }
 0x5ae   :  { %2023 = vmatmul.mubr.bf16.vlgmr.msra.gmra.mrb[8].mxu0 %v1726_v28 }
 0x681   :  { %v1767_v30 = vpop.f32.mrb[8].mxu0 }
 0x682   :  { %v1768_v31 = vadd.f32 %v1767_v30, %v1731_v29  ;;  %v2024_v32 = vpop.f32.mrb[9].mxu0 }
 0x683   :  { %v1770_v33 = vpop.f32.mrb[10].mxu0 }
 0x684   :  { %v2025_v35 = vpop.f32.mrb[11].mxu0  ;;  %1774 = vst.msk [vmem:[#allocation13] sm:$0xff] %vm1773_vm2, %v1768_v31 }
 0x685   :  { %2477 = shalt.err (!%p2474_p10)
}
 0x686   :  { %s2478_s21 = scalar_lea.hbm %s2769_s13, 128 }
 0x687   :  { %p2479_p11 = scmp.ne.s32.totalorder %s2769_s13, %s2478_s21  ;;  %p2482_p12 = scmp.lt.u32.totalorder %s2478_s21, %s2769_s13 }
 0x689   :  { %p2484_p13 = pnand %p2482_p12, %p2479_p11 }
 0x68b   :  { %2487 = shalt.err (!%p2484_p13)
}
 0x68c   :  { %1784 = dma.vmem_to_hbm [thread:$0]  %s1782_s17, 128, %s2769_s13, [#allocation4]  }
 0x68d   :  { %2496 = dma.done.wait [#allocation4], 128  }
 0x68e   :  { %2497 = vsyncadd [#allocation4], 4294967168 }
 0x68f   :  { %1788 = vsyncpa [#allocation3], 1 }
 0x690   :  { %1789 = vsyncpa [#allocation6], 1 }
 0x691   :  { %1790 = vsyncpa [#allocation9], 1 }
 0x692   :  { %1791 = vsyncpa [#allocation12], 1 }
 0x693   :  { %1792 = vsyncpa [#allocation4], 1 }

// kernel: tpu_custom_call.1
= control target key start
LH: loop header
LB: loop body
LE: loop exit
PB: predicated region body
PF: predicated region fallthrough
CT: control target
= control target key end

     0   :  { %18 = vsyncpa [#allocation3], 0  ;;  %s2756_s0 = inlined_call_operand.hbm [shape: bf16[16,192], index: 0, kind: input, shape index: {}]   ;;  %s2757_s1 = inlined_call_operand.hbm [shape: bf16[192,512], index: 1, kind: input, shape index: {}]   ;;  %s2758_s2 = inlined_call_operand.vmem [shape: f32[1,512], index: 2, kind: input, shape index: {}]   ;;  %s2759_s3 = inlined_call_operand.hbm [shape: bf16[512,256], index: 3, kind: input, shape index: {}]   ;;  %s2760_s4 = inlined_call_operand.vmem [shape: f32[1,256], index: 4, kind: input, shape index: {}]   ;;  %s2761_s5 = inlined_call_operand.hbm [shape: bf16[256,256], index: 5, kind: input, shape index: {}]   ;;  %s2762_s6 = inlined_call_operand.vmem [shape: f32[1,256], index: 6, kind: input, shape index: {}]   ;;  %s2763_s7 = inlined_call_operand.hbm [shape: bf16[256,128], index: 7, kind: input, shape index: {}]   ;;  %s2764_s8 = inlined_call_operand.vmem [shape: f32[1,128], index: 8, kind: input, shape index: {}]   ;;  %s2765_s9 = inlined_call_operand.hbm [shape: bf16[128,128], index: 9, kind: input, shape index: {}]   ;;  %s2766_s10 = inlined_call_operand.vmem [shape: f32[1,128], index: 10, kind: input, shape index: {}]   ;;  %s2767_s11 = inlined_call_operand.vmem [shape: bf16[8,128], index: 11, kind: input, shape index: {}]   ;;  %s2768_s12 = inlined_call_operand.vmem [shape: f32[8,1], index: 12, kind: input, shape index: {}]   ;;  %s2769_s13 = inlined_call_operand.hbm [shape: f32[8,16], index: 13, kind: output, shape index: {}]  }
   0x1   :  { %19 = vsyncpa [#allocation6], 0 }
   0x2   :  { %20 = vsyncpa [#allocation9], 0 }
   0x3   :  { %21 = vsyncpa [#allocation12], 0 }
   0x4   :  { %22 = vsyncpa [#allocation4], 0  ;;  %s2498_s25 = smov [#allocation5]   ;;  %s2334_s29 = scalar_lea.hbm %s2757_s1, 6144 }
   0x5   :  { %s40_s26 = sshll.u32 %s2498_s25, 4  ;;  %p2335_p0 = scmp.ne.s32.totalorder %s2757_s1, %s2334_s29  ;;  %s41_s26 = int_to_ptr.vmem [resolvable:$true] %s40_s26 }
   0x6   :  { %p2338_p1 = scmp.lt.u32.totalorder %s2334_s29, %s2757_s1 }
   0x8   :  { %p2340_p2 = pnand %p2338_p1, %p2335_p0 }
   0xa   :  { %2343 = shalt.err (!%p2340_p2)
}
   0xb   :  { %s2344_s17 = scalar_lea.vmem %s41_s26, 6144  ;;  %p2349_p4 = scmp.lt.s32.totalorder %s41_s26, %s41_s26 }
   0xc   :  { %p2345_p3 = scmp.ne.s32.totalorder %s41_s26, %s2344_s17  ;;  %p2350_p5 = scmp.lt.s32.totalorder %s2344_s17, %s2344_s17 }
   0xe   :  { %p2351_p6 = por %p2350_p5, %p2349_p4 }
  0x10   :  { %p2352_p7 = pnand %p2351_p6, %p2345_p3 }
  0x12   :  { %2355 = shalt.err (!%p2352_p7)
}
  0x13   :  { %s2499_s18 = smov 256   ;;  %s2500_s19 = smov 16  }
  0x14   :  { %46 = dma.hbm_to_vmem [thread:$0]  %s2757_s1, 6144, %s41_s26, [#allocation6], %s2499_s18, %s2499_s18, %s2500_s19  }
  0x15   :  { %s2501_s22 = smov [#allocation8]   ;;  %s2502_s24 = smov [#allocation2]  }
  0x16   :  { %s68_s23 = sshll.u32 %s2501_s22, 4  ;;  %s28_s25 = sshll.u32 %s2502_s24, 4  ;;  %s69_s23 = int_to_ptr.vmem [resolvable:$true] %s68_s23  ;;  %s29_s25 = int_to_ptr.vmem [resolvable:$true] %s28_s25 }
  0x17   :  { %s2356_s29 = scalar_lea.hbm %s2761_s5, 4096 }
  0x18   :  { %p2357_p8 = scmp.ne.s32.totalorder %s2761_s5, %s2356_s29  ;;  %p2360_p9 = scmp.lt.u32.totalorder %s2356_s29, %s2761_s5 }
  0x1a   :  { %p2362_p10 = pnand %p2360_p9, %p2357_p8 }
  0x1c   :  { %2365 = shalt.err (!%p2362_p10)
}
  0x1d   :  { %s2366_s1 = scalar_lea.vmem %s69_s23, 4096  ;;  %p2371_p12 = scmp.lt.s32.totalorder %s69_s23, %s69_s23 }
  0x1e   :  { %p2367_p11 = scmp.ne.s32.totalorder %s69_s23, %s2366_s1  ;;  %p2372_p13 = scmp.lt.s32.totalorder %s2366_s1, %s2366_s1 }
  0x20   :  { %p2373_p0 = por %p2372_p13, %p2371_p12 }
  0x22   :  { %p2374_p1 = pnand %p2373_p0, %p2367_p11 }
  0x24   :  { %2377 = shalt.err (!%p2374_p1)
}
  0x25   :  { %s2503_s26 = smov 128   ;;  %s2504_s17 = smov 8  }
  0x26   :  { %74 = dma.hbm_to_vmem [thread:$0]  %s2761_s5, 4096, %s69_s23, [#allocation9], %s2503_s26, %s2503_s26, %s2504_s17  }
  0x27   :  { %s2378_s22 = scalar_lea.hbm %s2756_s0, 256 }
  0x28   :  { %p2379_p2 = scmp.ne.s32.totalorder %s2756_s0, %s2378_s22  ;;  %p2382_p3 = scmp.lt.u32.totalorder %s2378_s22, %s2756_s0 }
  0x2a   :  { %p2384_p4 = pnand %p2382_p3, %p2379_p2 }
  0x2c   :  { %2387 = shalt.err (!%p2384_p4)
}
  0x2d   :  { %s2388_s30 = scalar_lea.vmem %s29_s25, 256  ;;  %p2393_p6 = scmp.lt.s32.totalorder %s29_s25, %s29_s25 }
  0x2e   :  { %p2389_p5 = scmp.ne.s32.totalorder %s29_s25, %s2388_s30  ;;  %p2394_p7 = scmp.lt.s32.totalorder %s2388_s30, %s2388_s30 }
  0x30   :  { %p2395_p8 = por %p2394_p7, %p2393_p6 }
  0x32   :  { %p2396_p9 = pnand %p2395_p8, %p2389_p5 }
  0x34   :  { %2399 = shalt.err (!%p2396_p9)
}
  0x35   :  { %34 = dma.hbm_to_vmem [thread:$0]  %s2756_s0, 256, %s29_s25, [#allocation3], %s2503_s26, %s2503_s26, %s2504_s17  }
  0x36   :  { %s2505_s14 = smov [#allocation7]   ;;  %s2506_s16 = smov [#allocation10]  }
  0x37   :  { %s54_s15 = sshll.u32 %s2505_s14, 4  ;;  %s82_s1 = sshll.u32 %s2506_s16, 4  ;;  %s55_s15 = int_to_ptr.vmem [resolvable:$true] %s54_s15  ;;  %s83_s1 = int_to_ptr.vmem [resolvable:$true] %s82_s1 }
  0x38   :  { %s2400_s20 = scalar_lea.hbm %s2759_s3, 8192 }
  0x39   :  { %p2401_p10 = scmp.ne.s32.totalorder %s2759_s3, %s2400_s20  ;;  %p2404_p11 = scmp.lt.u32.totalorder %s2400_s20, %s2759_s3 }
  0x3b   :  { %p2406_p12 = pnand %p2404_p11, %p2401_p10 }
  0x3d   :  { %2409 = shalt.err (!%p2406_p12)
}
  0x3e   :  { %s2410_s0 = scalar_lea.vmem %s55_s15, 8192  ;;  %p2415_p0 = scmp.lt.s32.totalorder %s55_s15, %s55_s15 }
  0x3f   :  { %p2411_p13 = scmp.ne.s32.totalorder %s55_s15, %s2410_s0  ;;  %p2416_p1 = scmp.lt.s32.totalorder %s2410_s0, %s2410_s0 }
  0x41   :  { %p2417_p2 = por %p2416_p1, %p2415_p0 }
  0x43   :  { %p2418_p3 = pnand %p2417_p2, %p2411_p13 }
  0x45   :  { %2421 = shalt.err (!%p2418_p3)
}
  0x46   :  { %60 = dma.hbm_to_vmem [thread:$0]  %s2759_s3, 8192, %s55_s15, [#allocation6], %s2503_s26, %s2503_s26, %s2504_s17  }
  0x47   :  { %s2422_s5 = scalar_lea.hbm %s2763_s7, 2048 }
  0x48   :  { %p2423_p4 = scmp.ne.s32.totalorder %s2763_s7, %s2422_s5  ;;  %p2426_p5 = scmp.lt.u32.totalorder %s2422_s5, %s2763_s7 }
  0x4a   :  { %p2428_p6 = pnand %p2426_p5, %p2423_p4 }
  0x4c   :  { %2431 = shalt.err (!%p2428_p6)
}
  0x4d   :  { %s2432_s19 = scalar_lea.vmem %s83_s1, 2048  ;;  %p2437_p8 = scmp.lt.s32.totalorder %s83_s1, %s83_s1 }
  0x4e   :  { %p2433_p7 = scmp.ne.s32.totalorder %s83_s1, %s2432_s19  ;;  %p2438_p9 = scmp.lt.s32.totalorder %s2432_s19, %s2432_s19 }
  0x50   :  { %p2439_p10 = por %p2438_p9, %p2437_p8 }
  0x52   :  { %p2440_p11 = pnand %p2439_p10, %p2433_p7 }
  0x54   :  { %2443 = shalt.err (!%p2440_p11)
}
  0x55   :  { %s2507_s3 = smov 64   ;;  %s2508_s26 = smov 4  }
  0x56   :  { %88 = dma.hbm_to_vmem [thread:$0]  %s2763_s7, 2048, %s83_s1, [#allocation9], %s2507_s3, %s2507_s3, %s2508_s26  }
  0x57   :  { %s2509_s20 = smov [#allocation11]   ;;  %s2444_s27 = scalar_lea.hbm %s2765_s9, 1024 }
  0x58   :  { %s96_s21 = sshll.u32 %s2509_s20, 4  ;;  %p2445_p12 = scmp.ne.s32.totalorder %s2765_s9, %s2444_s27  ;;  %s97_s21 = int_to_ptr.vmem [resolvable:$true] %s96_s21 }
  0x59   :  { %p2448_p13 = scmp.lt.u32.totalorder %s2444_s27, %s2765_s9 }
  0x5b   :  { %p2450_p0 = pnand %p2448_p13, %p2445_p12 }
  0x5d   :  { %2453 = shalt.err (!%p2450_p0)
}
  0x5e   :  { %s2454_s30 = scalar_lea.vmem %s97_s21, 1024  ;;  %p2459_p2 = scmp.lt.s32.totalorder %s97_s21, %s97_s21 }
  0x5f   :  { %p2455_p1 = scmp.ne.s32.totalorder %s97_s21, %s2454_s30  ;;  %p2460_p3 = scmp.lt.s32.totalorder %s2454_s30, %s2454_s30 }
  0x61   :  { %p2461_p4 = por %p2460_p3, %p2459_p2 }
  0x63   :  { %p2462_p5 = pnand %p2461_p4, %p2455_p1 }
  0x65   :  { %2465 = shalt.err (!%p2462_p5)
}
  0x66   :  { %102 = dma.hbm_to_vmem [thread:$0]  %s2765_s9, 1024, %s97_s21, [#allocation12], %s2507_s3, %s2507_s3, %s2508_s26  }
  0x67   :  { %2488 = dma.done.wait [#allocation3], 256  }
  0x68   :  { %2489 = vsyncadd [#allocation3], 4294967040 }
  0x69   :  { %2490 = dma.done.wait [#allocation6], 14336  }
  0x6a   :  { %2491 = vsyncadd [#allocation6], 4294952960 }
  0x6b   :  { %2492 = dma.done.wait [#allocation9], 6144  }
  0x6c   :  { %2493 = vsyncadd [#allocation9], 4294961152 }
  0x6d   :  { %2494 = dma.done.wait [#allocation12], 1024  }
  0x6e   :  { %2495 = vsyncadd [#allocation12], 4294966272  ;;  %v2051_v0 = vld [vmem:[#allocation5 + $0x4] ss:$16 sps:$4 sm:$0xff]   ;;  %v2053_v1 = vld [vmem:[#allocation5] ss:$16 sps:$4 sm:$0xff]  }
  0x6f   :  { %453 = vmatprep.subr.bf16.mxu0 %v2051_v0  ;;  %v2054_v2 = vld [vmem:[#allocation5 + $0x24] ss:$16 sps:$4 sm:$0xff]   ;;  %v2056_v3 = vld [vmem:[#allocation5 + $0x20] ss:$16 sps:$4 sm:$0xff]   ;;  %v2081_v9 = vld [vmem:[#allocation5 + $0xc] ss:$16 sps:$4 sm:$0xff]  }
  0x70   :  { %454 = vmatpush1.bf16.msra.mxu0 %v2053_v1  ;;  %v2057_v4 = vld [vmem:[#allocation5 + $0x44] ss:$16 sps:$4 sm:$0xff]   ;;  %v2059_v5 = vld [vmem:[#allocation5 + $0x40] ss:$16 sps:$4 sm:$0xff]   ;;  %v2083_v10 = vld [vmem:[#allocation5 + $0x8] ss:$16 sps:$4 sm:$0xff]   ;;  %496 = vmatprep.subr.bf16.mxu1 %v2081_v9 }
  0x71   :  { %455 = vmatprep.subr.bf16.mxu0 %v2054_v2  ;;  %v2060_v6 = vld [vmem:[#allocation5 + $0x64] ss:$16 sps:$4 sm:$0xff]   ;;  %v2062_v7 = vld [vmem:[#allocation5 + $0x60] ss:$16 sps:$4 sm:$0xff]   ;;  %v2087_v13 = vld [vmem:[#allocation5 + $0x2c] ss:$16 sps:$4 sm:$0xff]   ;;  %497 = vmatpush1.bf16.msra.mxu1 %v2083_v10 }
  0x72   :  { %v2063_v8 = vld [vmem:[#allocation5 + $0x84] ss:$16 sps:$4 sm:$0xff]   ;;  %v2065_v11 = vld [vmem:[#allocation5 + $0x80] ss:$16 sps:$4 sm:$0xff]   ;;  %v2089_v14 = vld [vmem:[#allocation5 + $0x28] ss:$16 sps:$4 sm:$0xff]   ;;  %498 = vmatprep.subr.bf16.mxu1 %v2087_v13 }
  0x73   :  { %v2066_v12 = vld [vmem:[#allocation5 + $0xa4] ss:$16 sps:$4 sm:$0xff]   ;;  %v2068_v15 = vld [vmem:[#allocation5 + $0xa0] ss:$16 sps:$4 sm:$0xff]   ;;  %v2093_v17 = vld [vmem:[#allocation5 + $0x4c] ss:$16 sps:$4 sm:$0xff]  }
  0x74   :  { %456 = vmatpush1.bf16.msra.mxu0 %v2056_v3  ;;  %v2069_v16 = vld [vmem:[#allocation5 + $0xc4] ss:$16 sps:$4 sm:$0xff]   ;;  %v2095_v18 = vld [vmem:[#allocation5 + $0x48] ss:$16 sps:$4 sm:$0xff]   ;;  %vm449_vm0 = vcmask 523264   ;;  %vm2511_vm1 = vmmov 0  }
  0x75   :  { %457 = vmatprep.subr.bf16.mxu0 %v2057_v4  ;;  %499 = vmatpush1.bf16.msra.mxu1 %v2089_v14  ;;  %v2098_v19 = vld [vmem:[#allocation2 + $0x4] ss:$8 sps:$4 sm:$0xff]   ;;  %v2071_v21 = vld [vmem:[#allocation5 + $0xc0] ss:$16 sps:$4 sm:$0xff]   ;;  %v2101_v23 = vld [vmem:[#allocation5 + $0x68] ss:$16 sps:$4 sm:$0xff]  }
  0x76   :  { %500 = vmatprep.subr.bf16.mxu1 %v2093_v17  ;;  %v2099_v20 = vld [vmem:[#allocation5 + $0x6c] ss:$16 sps:$4 sm:$0xff]   ;;  %1843 = vmatprep.mubr.msk.bf16.mxu0 %vm449_vm0, %v2098_v19  ;;  %v2072_v22 = vld [vmem:[#allocation5 + $0xe4] ss:$16 sps:$4 sm:$0xff]   ;;  %v2074_v25 = vld [vmem:[#allocation5 + $0xe0] ss:$16 sps:$4 sm:$0xff]  }
  0x77   :  { %1844 = vmatprep.mubr.msk.bf16.mxu1 %vm449_vm0, %v2098_v19  ;;  %v2102_v24 = vld [vmem:[#allocation5 + $0x8c] ss:$16 sps:$4 sm:$0xff]   ;;  %v2075_v26 = vld [vmem:[#allocation5 + $0x104] ss:$16 sps:$4 sm:$0xff]   ;;  %v2104_v27 = vld [vmem:[#allocation5 + $0x88] ss:$16 sps:$4 sm:$0xff]  }
  0x78   :  { %458 = vmatpush1.bf16.msra.mxu0 %v2059_v5  ;;  %v2105_v28 = vld [vmem:[#allocation5 + $0xac] ss:$16 sps:$4 sm:$0xff]   ;;  %v2077_v29 = vld [vmem:[#allocation5 + $0x100] ss:$16 sps:$4 sm:$0xff]   ;;  %v2078_v30 = vld [vmem:[#allocation5 + $0x124] ss:$16 sps:$4 sm:$0xff]  }
  0x79   :  { %459 = vmatprep.subr.bf16.mxu0 %v2060_v6  ;;  %501 = vmatpush1.bf16.msra.mxu1 %v2095_v18  ;;  %v2107_v31 = vld [vmem:[#allocation5 + $0xa8] ss:$16 sps:$4 sm:$0xff]   ;;  %v2108_v32 = vld [vmem:[#allocation5 + $0xcc] ss:$16 sps:$4 sm:$0xff]   ;;  %v2080_v33 = vld [vmem:[#allocation5 + $0x120] ss:$16 sps:$4 sm:$0xff]  }
  0x7a   :  { %502 = vmatprep.subr.bf16.mxu1 %v2099_v20  ;;  %v2084_v34 = vld [vmem:[#allocation5 + $0x144] ss:$16 sps:$4 sm:$0xff]   ;;  %v2110_v35 = vld [vmem:[#allocation5 + $0xc8] ss:$16 sps:$4 sm:$0xff]   ;;  %v2111_v36 = vld [vmem:[#allocation5 + $0xec] ss:$16 sps:$4 sm:$0xff]  }
  0x7b   :  { %v2086_v37 = vld [vmem:[#allocation5 + $0x140] ss:$16 sps:$4 sm:$0xff]   ;;  %v2090_v38 = vld [vmem:[#allocation5 + $0x164] ss:$16 sps:$4 sm:$0xff]   ;;  %v2113_v39 = vld [vmem:[#allocation5 + $0xe8] ss:$16 sps:$4 sm:$0xff]  }
  0x7c   :  { %460 = vmatpush1.bf16.msra.mxu0 %v2062_v7  ;;  %v2114_v40 = vld [vmem:[#allocation5 + $0x10c] ss:$16 sps:$4 sm:$0xff]   ;;  %v2092_v41 = vld [vmem:[#allocation5 + $0x160] ss:$16 sps:$4 sm:$0xff]   ;;  %v2116_v42 = vld [vmem:[#allocation5 + $0x108] ss:$16 sps:$4 sm:$0xff]  }
  0x7d   :  { %461 = vmatprep.subr.bf16.mxu0 %v2063_v8  ;;  %503 = vmatpush1.bf16.msra.mxu1 %v2101_v23  ;;  %v2096_v43 = vld [vmem:[#allocation2] ss:$8 sps:$4 sm:$0xff]   ;;  %v2117_v44 = vld [vmem:[#allocation5 + $0x12c] ss:$16 sps:$4 sm:$0xff]   ;;  %v2126_v46 = vld [vmem:[#allocation7] ss:$8 sps:$4 sm:$0xff]  }
  0x7e   :  { %504 = vmatprep.subr.bf16.mxu1 %v2102_v24  ;;  %v2128_v45 = vld [vmem:[#allocation7 + $0x4] ss:$8 sps:$4 sm:$0xff]   ;;  %v2131_v47 = vld [vmem:[#allocation7 + $0x14] ss:$8 sps:$4 sm:$0xff]   ;;  %v2119_v48 = vld [vmem:[#allocation5 + $0x128] ss:$16 sps:$4 sm:$0xff]  }
  0x7f   :  { %v2120_v49 = vld [vmem:[#allocation5 + $0x14c] ss:$16 sps:$4 sm:$0xff]   ;;  %v2129_v50 = vld [vmem:[#allocation7 + $0x10] ss:$8 sps:$4 sm:$0xff]   ;;  %v2132_v54 = vld [vmem:[#allocation7 + $0x20] ss:$8 sps:$4 sm:$0xff]  }
  0x80   :  { %462 = vmatpush1.bf16.msra.mxu0 %v2065_v11  ;;  %v2134_v51 = vld [vmem:[#allocation7 + $0x24] ss:$8 sps:$4 sm:$0xff]   ;;  %v2122_v52 = vld [vmem:[#allocation5 + $0x148] ss:$16 sps:$4 sm:$0xff]   ;;  %v2137_v55 = vld [vmem:[#allocation7 + $0x34] ss:$8 sps:$4 sm:$0xff]  }
  0x81   :  { %463 = vmatprep.subr.bf16.mxu0 %v2066_v12  ;;  %505 = vmatpush1.bf16.msra.mxu1 %v2104_v27  ;;  %v2123_v53 = vld [vmem:[#allocation5 + $0x16c] ss:$16 sps:$4 sm:$0xff]   ;;  %v2125_v56 = vld [vmem:[#allocation5 + $0x168] ss:$16 sps:$4 sm:$0xff]   ;;  %s2513_s26 = smov [#allocation13]   ;;  %vm1773_vm2 = vcmask 130048  }
  0x82   :  { %506 = vmatprep.subr.bf16.mxu1 %v2105_v28  ;;  %v2135_v57 = vld [vmem:[#allocation7 + $0x30] ss:$8 sps:$4 sm:$0xff]   ;;  %v2140_v58 = vld [vmem:[#allocation7 + $0x44] ss:$8 sps:$4 sm:$0xff]   ;;  %v2138_v59 = vld [vmem:[#allocation7 + $0x40] ss:$8 sps:$4 sm:$0xff]   ;;  %v180_v28 = vlaneseq }
  0x83   :  { %v2143_v60 = vld [vmem:[#allocation7 + $0x54] ss:$8 sps:$4 sm:$0xff]   ;;  %v2141_v61 = vld [vmem:[#allocation7 + $0x50] ss:$8 sps:$4 sm:$0xff]   ;;  %v2146_v62 = vld [vmem:[#allocation7 + $0x64] ss:$8 sps:$4 sm:$0xff]  }
  0x84   :  { %464 = vmatpush1.bf16.msra.mxu0 %v2068_v15  ;;  %v2144_v63 = vld [vmem:[#allocation7 + $0x60] ss:$8 sps:$4 sm:$0xff]   ;;  %v2149_v0 = vld [vmem:[#allocation7 + $0x74] ss:$8 sps:$4 sm:$0xff]   ;;  %v2147_v1 = vld [vmem:[#allocation7 + $0x70] ss:$8 sps:$4 sm:$0xff]  }
  0x85   :  { %465 = vmatprep.subr.bf16.mxu0 %v2069_v16  ;;  %507 = vmatpush1.bf16.msra.mxu1 %v2107_v31  ;;  %v2152_v2 = vld [vmem:[#allocation7 + $0x84] ss:$8 sps:$4 sm:$0xff]   ;;  %v2150_v3 = vld [vmem:[#allocation7 + $0x80] ss:$8 sps:$4 sm:$0xff]   ;;  %v2155_v4 = vld [vmem:[#allocation7 + $0x94] ss:$8 sps:$4 sm:$0xff]  }
  0x86   :  { %508 = vmatprep.subr.bf16.mxu1 %v2108_v32  ;;  %v2153_v5 = vld [vmem:[#allocation7 + $0x90] ss:$8 sps:$4 sm:$0xff]   ;;  %v2158_v6 = vld [vmem:[#allocation7 + $0xa4] ss:$8 sps:$4 sm:$0xff]   ;;  %v2156_v7 = vld [vmem:[#allocation7 + $0xa0] ss:$8 sps:$4 sm:$0xff]  }
  0x87   :  { %v2161_v8 = vld [vmem:[#allocation7 + $0xb4] ss:$8 sps:$4 sm:$0xff]   ;;  %v2159_v9 = vld [vmem:[#allocation7 + $0xb0] ss:$8 sps:$4 sm:$0xff]   ;;  %v2162_v10 = vld [vmem:[#allocation7 + $0xc0] ss:$8 sps:$4 sm:$0xff]  }
  0x88   :  { %466 = vmatpush1.bf16.msra.mxu0 %v2071_v21  ;;  %v2164_v11 = vld [vmem:[#allocation7 + $0xc4] ss:$8 sps:$4 sm:$0xff]   ;;  %v2167_v12 = vld [vmem:[#allocation7 + $0xd4] ss:$8 sps:$4 sm:$0xff]   ;;  %v2165_v13 = vld [vmem:[#allocation7 + $0xd0] ss:$8 sps:$4 sm:$0xff]  }
  0x89   :  { %467 = vmatprep.subr.bf16.mxu0 %v2072_v22  ;;  %509 = vmatpush1.bf16.msra.mxu1 %v2110_v35  ;;  %v2170_v14 = vld [vmem:[#allocation7 + $0xe4] ss:$8 sps:$4 sm:$0xff]   ;;  %v2168_v15 = vld [vmem:[#allocation7 + $0xe0] ss:$8 sps:$4 sm:$0xff]   ;;  %v2173_v16 = vld [vmem:[#allocation7 + $0xf4] ss:$8 sps:$4 sm:$0xff]  }
  0x8a   :  { %510 = vmatprep.subr.bf16.mxu1 %v2111_v36  ;;  %v2171_v17 = vld [vmem:[#allocation7 + $0xf0] ss:$8 sps:$4 sm:$0xff]   ;;  %v2176_v18 = vld [vmem:[#allocation7 + $0x104] ss:$8 sps:$4 sm:$0xff]   ;;  %v2222_v19 = vld [vmem:[#allocation8] ss:$8 sps:$4 sm:$0xff]  }
  0x8b   :  { %v2224_v20 = vld [vmem:[#allocation8 + $0x4] ss:$8 sps:$4 sm:$0xff]   ;;  %v2227_v21 = vld [vmem:[#allocation8 + $0x14] ss:$8 sps:$4 sm:$0xff]   ;;  %v2225_v22 = vld [vmem:[#allocation8 + $0x10] ss:$8 sps:$4 sm:$0xff]  }
  0x8c   :  { %468 = vmatpush1.bf16.msra.mxu0 %v2074_v25  ;;  %v2230_v23 = vld [vmem:[#allocation8 + $0x24] ss:$8 sps:$4 sm:$0xff]   ;;  %v2228_v24 = vld [vmem:[#allocation8 + $0x20] ss:$8 sps:$4 sm:$0xff]   ;;  %v2233_v25 = vld [vmem:[#allocation8 + $0x34] ss:$8 sps:$4 sm:$0xff]  }
  0x8d   :  { %469 = vmatprep.subr.bf16.mxu0 %v2075_v26  ;;  %511 = vmatpush1.bf16.msra.mxu1 %v2113_v39  ;;  %v2231_v26 = vld [vmem:[#allocation8 + $0x30] ss:$8 sps:$4 sm:$0xff]   ;;  %v2236_v27 = vld [vmem:[#allocation8 + $0x44] ss:$8 sps:$4 sm:$0xff]   ;;  %v181_v31 = vshrl.u32 %v180_v28, 7  ;;  %s1781_s17 = sshll.u32 %s2513_s26, 4  ;;  %s1782_s17 = int_to_ptr.vmem [resolvable:$true] %s1781_s17 }
  0x8e   :  { %512 = vmatprep.subr.bf16.mxu1 %v2114_v40  ;;  %v2237_v32 = vld [vmem:[#allocation8 + $0x50] ss:$8 sps:$4 sm:$0xff]   ;;  %v2240_v35 = vld [vmem:[#allocation8 + $0x60] ss:$8 sps:$4 sm:$0xff]   ;;  %s2466_s15 = scalar_lea.vmem %s1782_s17, 128  ;;  %p2471_p7 = scmp.lt.s32.totalorder %s1782_s17, %s1782_s17 }
  0x8f   :  { %v178_v36 = vld [vmem:[%s2758_s2] sm:$0xf]  ;;  %p2467_p6 = scmp.ne.s32.totalorder %s1782_s17, %s2466_s15  ;;  %p2472_p8 = scmp.lt.s32.totalorder %s2466_s15, %s2466_s15 }
  0x90   :  { %470 = vmatpush1.bf16.msra.mxu0 %v2077_v29  ;;  %v2234_v29 = vld [vmem:[#allocation8 + $0x40] ss:$8 sps:$4 sm:$0xff]   ;;  %v2243_v40 = vld [vmem:[#allocation8 + $0x70] ss:$8 sps:$4 sm:$0xff]  }
  0x91   :  { %471 = vmatprep.subr.bf16.mxu0 %v2078_v30  ;;  %513 = vmatpush1.bf16.msra.mxu1 %v2116_v42  ;;  %v2239_v30 = vld [vmem:[#allocation8 + $0x54] ss:$8 sps:$4 sm:$0xff]   ;;  %p2473_p9 = por %p2472_p8, %p2471_p7 }
  0x92   :  { %514 = vmatprep.subr.bf16.mxu1 %v2117_v44 }
  0x93   :  { %p2474_p10 = pnand %p2473_p9, %p2467_p6 }
  0x94   :  { %472 = vmatpush1.bf16.msra.mxu0 %v2080_v33  ;;  %v2242_v33 = vld [vmem:[#allocation8 + $0x64] ss:$8 sps:$4 sm:$0xff]  }
  0x95   :  { %473 = vmatprep.subr.bf16.mxu0 %v2084_v34  ;;  %515 = vmatpush1.bf16.msra.mxu1 %v2119_v48  ;;  %v2665_v34 = vsub.s32 0, %v181_v31 }
  0x96   :  { %516 = vmatprep.subr.bf16.mxu1 %v2120_v49 }
  0x97   :  { %v183_v39 = vrot.slane %v178_v36, %v2665_v34 }
  0x98   :  { %474 = vmatpush1.bf16.msra.mxu0 %v2086_v37  ;;  %v2670_v37 = vsub.s32 1, %v181_v31 }
  0x99   :  { %475 = vmatprep.subr.bf16.mxu0 %v2090_v38  ;;  %517 = vmatpush1.bf16.msra.mxu1 %v2122_v52  ;;  %v2245_v38 = vld [vmem:[#allocation8 + $0x74] ss:$8 sps:$4 sm:$0xff]  }
  0x9a   :  { %518 = vmatprep.subr.bf16.mxu1 %v2123_v53 }
  0x9c   :  { %476 = vmatpush1.bf16.msra.mxu0 %v2092_v41  ;;  %v187_v41 = vrot.slane %v178_v36, %v2670_v37 }
  0x9d   :  { %1003 = vmatprep.subr.bf16.mxu0 %v2128_v45  ;;  %519 = vmatpush1.bf16.msra.mxu1 %v2125_v56 }
  0x9e   :  { %1327 = vmatprep.subr.bf16.mxu1 %v2224_v20 }
  0x9f   :  { %486 = vmatmul.mubr.bf16.vlgmr.msra.gmra.mrb[0].mxu0 %v2096_v43 }
  0xa0   :  { %1004 = vmatpush1.bf16.msra.mxu0 %v2126_v46  ;;  %529 = vmatmul.mubr.bf16.vlgmr.msra.gmra.mrb[0].mxu1 %v2096_v43 }
  0xa1   :  { %1005 = vmatprep.subr.bf16.mxu0 %v2131_v47  ;;  %1328 = vmatpush1.bf16.msra.mxu1 %v2222_v19 }
  0xa2   :  { %1329 = vmatprep.subr.bf16.mxu1 %v2227_v21 }
  0xa4   :  { %1006 = vmatpush1.bf16.msra.mxu0 %v2129_v50 }
  0xa5   :  { %1007 = vmatprep.subr.bf16.mxu0 %v2134_v51  ;;  %1330 = vmatpush1.bf16.msra.mxu1 %v2225_v22 }
  0xa6   :  { %1331 = vmatprep.subr.bf16.mxu1 %v2230_v23 }
  0xa8   :  { %1008 = vmatpush1.bf16.msra.mxu0 %v2132_v54 }
  0xa9   :  { %1009 = vmatprep.subr.bf16.mxu0 %v2137_v55  ;;  %1332 = vmatpush1.bf16.msra.mxu1 %v2228_v24 }
  0xaa   :  { %1333 = vmatprep.subr.bf16.mxu1 %v2233_v25 }
  0xac   :  { %1010 = vmatpush1.bf16.msra.mxu0 %v2135_v57 }
  0xad   :  { %1011 = vmatprep.subr.bf16.mxu0 %v2140_v58  ;;  %1334 = vmatpush1.bf16.msra.mxu1 %v2231_v26  ;;  %v190_v58 = vsub.s32 2, %v181_v31 }
  0xae   :  { %1335 = vmatprep.subr.bf16.mxu1 %v2236_v27 }
  0xb0   :  { %1012 = vmatpush1.bf16.msra.mxu0 %v2138_v59 }
  0xb1   :  { %1013 = vmatprep.subr.bf16.mxu0 %v2143_v60  ;;  %1336 = vmatpush1.bf16.msra.mxu1 %v2234_v29 }
  0xb2   :  { %1337 = vmatprep.subr.bf16.mxu1 %v2239_v30 }
  0xb4   :  { %1014 = vmatpush1.bf16.msra.mxu0 %v2141_v61  ;;  %v194_v61 = vsub.s32 3, %v181_v31 }
  0xb5   :  { %1015 = vmatprep.subr.bf16.mxu0 %v2146_v62  ;;  %1338 = vmatpush1.bf16.msra.mxu1 %v2237_v32 }
  0xb6   :  { %1339 = vmatprep.subr.bf16.mxu1 %v2242_v33 }
  0xb8   :  { %1016 = vmatpush1.bf16.msra.mxu0 %v2144_v63 }
  0xb9   :  { %1017 = vmatprep.subr.bf16.mxu0 %v2149_v0  ;;  %1340 = vmatpush1.bf16.msra.mxu1 %v2240_v35 }
  0xba   :  { %1341 = vmatprep.subr.bf16.mxu1 %v2245_v38 }
  0xbc   :  { %1018 = vmatpush1.bf16.msra.mxu0 %v2147_v1 }
  0xbd   :  { %1019 = vmatprep.subr.bf16.mxu0 %v2152_v2  ;;  %1342 = vmatpush1.bf16.msra.mxu1 %v2243_v40 }
  0xc0   :  { %1020 = vmatpush1.bf16.msra.mxu0 %v2150_v3 }
  0xc1   :  { %1021 = vmatprep.subr.bf16.mxu0 %v2155_v4  ;;  %v191_v4 = vrot.slane %v178_v36, %v190_v58  ;;  %v2174_v58 = vld [vmem:[#allocation7 + $0x100] ss:$8 sps:$4 sm:$0xff]  }
  0xc4   :  { %1022 = vmatpush1.bf16.msra.mxu0 %v2153_v5 }
  0xc5   :  { %1023 = vmatprep.subr.bf16.mxu0 %v2158_v6 }
  0xc8   :  { %1024 = vmatpush1.bf16.msra.mxu0 %v2156_v7  ;;  %v195_v7 = vrot.slane %v178_v36, %v194_v61 }
  0xc9   :  { %1025 = vmatprep.subr.bf16.mxu0 %v2161_v8 }
  0xcc   :  { %1026 = vmatpush1.bf16.msra.mxu0 %v2159_v9 }
  0xcd   :  { %1027 = vmatprep.subr.bf16.mxu0 %v2164_v11 }
  0xd0   :  { %1028 = vmatpush1.bf16.msra.mxu0 %v2162_v10 }
  0xd1   :  { %1029 = vmatprep.subr.bf16.mxu0 %v2167_v12 }
  0xd4   :  { %1030 = vmatpush1.bf16.msra.mxu0 %v2165_v13 }
  0xd5   :  { %1031 = vmatprep.subr.bf16.mxu0 %v2170_v14 }
  0xd8   :  { %1032 = vmatpush1.bf16.msra.mxu0 %v2168_v15 }
  0xd9   :  { %1033 = vmatprep.subr.bf16.mxu0 %v2173_v16 }
  0xdc   :  { %1034 = vmatpush1.bf16.msra.mxu0 %v2171_v17 }
  0xdd   :  { %1046 = vmatprep.subr.bf16.mxu0 %v2176_v18 }
 0x172   :  { %v487_v42 = vpop.f32.mrb[0].mxu0 }
 0x173   :  { %v2674_v43 = vadd.f32 %v487_v42, %v183_v39  ;;  %v489_v44 = vpop.f32.mrb[1].mxu0  ;;  %v530_v10 = vpop.f32.mrb[0].mxu1 }
 0x174   :  { %v2676_v45 = vadd.f32 %v489_v44, %v187_v41  ;;  %v491_v46 = vpop.f32.mrb[2].mxu0  ;;  %v2698_v11 = vadd.f32 %v530_v10, %v191_v4  ;;  %v532_v12 = vpop.f32.mrb[1].mxu1 }
 0x175   :  { %v539_v47 = vmul.f32 0.044715, %v2674_v43  ;;  %v2679_v48 = vadd.f32 %v491_v46, %v183_v39  ;;  %v493_v49 = vpop.f32.mrb[3].mxu0  ;;  %v2700_v13 = vadd.f32 %v532_v12, %v195_v7  ;;  %v534_v14 = vpop.f32.mrb[2].mxu1 }
 0x176   :  { %v540_v50 = vmul.f32 0.044715, %v2676_v45  ;;  %v2682_v51 = vadd.f32 %v493_v49, %v187_v41  ;;  %v541_v15 = vmul.f32 0.044715, %v2698_v11  ;;  %v535_v16 = vadd.f32 %v534_v14, %v191_v4  ;;  %v536_v17 = vpop.f32.mrb[3].mxu1 }
 0x177   :  { %v547_v52 = vmul.f32 %v539_v47, %v2674_v43  ;;  %v543_v53 = vmul.f32 0.044715, %v2679_v48  ;;  %v542_v18 = vmul.f32 0.044715, %v2700_v13  ;;  %v537_v19 = vadd.f32 %v536_v17, %v195_v7  ;;  %v2183_v7 = vld [vmem:[#allocation7 + $0x130] ss:$8 sps:$4 sm:$0xff]  }
 0x178   :  { %v548_v54 = vmul.f32 %v540_v50, %v2676_v45  ;;  %v544_v55 = vmul.f32 0.044715, %v2682_v51  ;;  %v549_v20 = vmul.f32 %v541_v15, %v2698_v11  ;;  %v545_v21 = vmul.f32 0.044715, %v535_v16  ;;  %v2186_v14 = vld [vmem:[#allocation7 + $0x140] ss:$8 sps:$4 sm:$0xff]  }
 0x179   :  { %v555_v56 = vmul.f32 %v547_v52, %v2674_v43  ;;  %v551_v57 = vmul.f32 %v543_v53, %v2679_v48  ;;  %v550_v22 = vmul.f32 %v542_v18, %v2700_v13  ;;  %v546_v23 = vmul.f32 0.044715, %v537_v19  ;;  %v2191_v15 = vld [vmem:[#allocation7 + $0x154] ss:$8 sps:$4 sm:$0xff]   ;;  %v2189_v17 = vld [vmem:[#allocation7 + $0x150] ss:$8 sps:$4 sm:$0xff]  }
 0x17a   :  { %v556_v59 = vmul.f32 %v548_v54, %v2676_v45  ;;  %v552_v60 = vmul.f32 %v544_v55, %v2682_v51  ;;  %v557_v24 = vmul.f32 %v549_v20, %v2698_v11  ;;  %v553_v25 = vmul.f32 %v545_v21, %v535_v16  ;;  %v2192_v18 = vld [vmem:[#allocation7 + $0x160] ss:$8 sps:$4 sm:$0xff]   ;;  %v2203_v21 = vld [vmem:[#allocation7 + $0x194] ss:$8 sps:$4 sm:$0xff]  }
 0x17b   :  { %v563_v62 = vadd.f32 %v555_v56, %v2674_v43  ;;  %v559_v63 = vmul.f32 %v551_v57, %v2679_v48  ;;  %v558_v26 = vmul.f32 %v550_v22, %v2700_v13  ;;  %v554_v27 = vmul.f32 %v546_v23, %v537_v19  ;;  %v2198_v20 = vld [vmem:[#allocation7 + $0x180] ss:$8 sps:$4 sm:$0xff]   ;;  %v2201_v22 = vld [vmem:[#allocation7 + $0x190] ss:$8 sps:$4 sm:$0xff]   ;;  %v2206_v23 = vld [vmem:[#allocation7 + $0x1a4] ss:$8 sps:$4 sm:$0xff]  }
 0x17c   :  { %v564_v0 = vadd.f32 %v556_v59, %v2676_v45  ;;  %v560_v1 = vmul.f32 %v552_v60, %v2682_v51  ;;  %v565_v29 = vadd.f32 %v557_v24, %v2698_v11  ;;  %v561_v30 = vmul.f32 %v553_v25, %v535_v16  ;;  %v2179_v59 = vld [vmem:[#allocation7 + $0x114] ss:$8 sps:$4 sm:$0xff]   ;;  %v2177_v60 = vld [vmem:[#allocation7 + $0x110] ss:$8 sps:$4 sm:$0xff]   ;;  %v2204_v24 = vld [vmem:[#allocation7 + $0x1a0] ss:$8 sps:$4 sm:$0xff]  }
 0x17d   :  { %v571_v2 = vmul.f32 0.7978846, %v563_v62  ;;  %v567_v3 = vadd.f32 %v559_v63, %v2679_v48  ;;  %v566_v33 = vadd.f32 %v558_v26, %v2700_v13  ;;  %v562_v35 = vmul.f32 %v554_v27, %v537_v19  ;;  %v2209_v25 = vld [vmem:[#allocation7 + $0x1b4] ss:$8 sps:$4 sm:$0xff]   ;;  %v2207_v26 = vld [vmem:[#allocation7 + $0x1b0] ss:$8 sps:$4 sm:$0xff]  }
 0x17e   :  { %v572_v5 = vmul.f32 0.7978846, %v564_v0  ;;  %v568_v6 = vadd.f32 %v560_v1, %v2682_v51  ;;  %v573_v39 = vmul.f32 0.7978846, %v565_v29  ;;  %v569_v40 = vadd.f32 %v561_v30, %v535_v16  ;;  %v2185_v1 = vld [vmem:[#allocation7 + $0x134] ss:$8 sps:$4 sm:$0xff]  }
 0x17f   :  { %2294 = vtanh.f32 %v571_v2  ;;  %v575_v8 = vmul.f32 0.7978846, %v567_v3  ;;  %v574_v44 = vmul.f32 0.7978846, %v566_v33  ;;  %v570_v46 = vadd.f32 %v562_v35, %v537_v19  ;;  %v2212_v27 = vld [vmem:[#allocation7 + $0x1c4] ss:$8 sps:$4 sm:$0xff]  }
 0x180   :  { %v576_v9 = vmul.f32 0.7978846, %v568_v6  ;;  %2296 = vtanh.f32 %v572_v5  ;;  %v577_v49 = vmul.f32 0.7978846, %v569_v40  ;;  %v2215_v29 = vld [vmem:[#allocation7 + $0x1d4] ss:$8 sps:$4 sm:$0xff]  }
 0x181   :  { %2298 = vtanh.f32 %v575_v8  ;;  %v578_v53 = vmul.f32 0.7978846, %v570_v46  ;;  %v2213_v30 = vld [vmem:[#allocation7 + $0x1d0] ss:$8 sps:$4 sm:$0xff]   ;;  %v2221_v33 = vld [vmem:[#allocation7 + $0x1f4] ss:$8 sps:$4 sm:$0xff]  }
 0x182   :  { %2300 = vtanh.f32 %v576_v9  ;;  %v2188_v9 = vld [vmem:[#allocation7 + $0x144] ss:$8 sps:$4 sm:$0xff]   ;;  %v2219_v35 = vld [vmem:[#allocation7 + $0x1f0] ss:$8 sps:$4 sm:$0xff]  }
 0x183   :  { %2302 = vtanh.f32 %v573_v39  ;;  %v2251_v39 = vld [vmem:[#allocation8 + $0x94] ss:$8 sps:$4 sm:$0xff]   ;;  %v2249_v40 = vld [vmem:[#allocation8 + $0x90] ss:$8 sps:$4 sm:$0xff]  }
 0x184   :  { %2304 = vtanh.f32 %v574_v44  ;;  %v2257_v44 = vld [vmem:[#allocation8 + $0xb4] ss:$8 sps:$4 sm:$0xff]   ;;  %v2255_v46 = vld [vmem:[#allocation8 + $0xb0] ss:$8 sps:$4 sm:$0xff]  }
 0x185   :  { %2306 = vtanh.f32 %v577_v49  ;;  %v2260_v49 = vld [vmem:[#allocation8 + $0xc4] ss:$8 sps:$4 sm:$0xff]  }
 0x186   :  { %2308 = vtanh.f32 %v578_v53  ;;  %v2266_v53 = vld [vmem:[#allocation8 + $0xe4] ss:$8 sps:$4 sm:$0xff]  }
 0x189   :  { %v2295_v28 = vpop.eup %2294 }
 0x18a   :  { %v2297_v31 = vpop.eup %2296  ;;  %v587_v32 = vmul.f32 %v2295_v28, %v2674_v43  ;;  %v2210_v28 = vld [vmem:[#allocation7 + $0x1c0] ss:$8 sps:$4 sm:$0xff]  }
 0x18b   :  { %v2299_v36 = vpop.eup %2298  ;;  %v588_v38 = vmul.f32 %v2297_v31, %v2676_v45  ;;  %v2218_v31 = vld [vmem:[#allocation7 + $0x1e4] ss:$8 sps:$4 sm:$0xff]  }
 0x18c   :  { %v2301_v41 = vpop.eup %2300  ;;  %v591_v42 = vmul.f32 %v2299_v36, %v2679_v48  ;;  %v595_v50 = vadd.f32 %v587_v32, %v2674_v43  ;;  %v2182_v43 = vld [vmem:[#allocation7 + $0x124] ss:$8 sps:$4 sm:$0xff]   ;;  %v2216_v32 = vld [vmem:[#allocation7 + $0x1e0] ss:$8 sps:$4 sm:$0xff]  }
 0x18d   :  { %v592_v47 = vmul.f32 %v2301_v41, %v2682_v51  ;;  %v596_v54 = vadd.f32 %v588_v38, %v2676_v45  ;;  %v2303_v61 = vpop.eup %2302  ;;  %v2180_v45 = vld [vmem:[#allocation7 + $0x120] ss:$8 sps:$4 sm:$0xff]   ;;  %v2248_v36 = vld [vmem:[#allocation8 + $0x84] ss:$8 sps:$4 sm:$0xff]  }
 0x18e   :  { %v599_v52 = vadd.f32 %v591_v42, %v2679_v48  ;;  %v2305_v48 = vpop.eup %2304  ;;  %v589_v62 = vmul.f32 %v2303_v61, %v2698_v11  ;;  %v2246_v38 = vld [vmem:[#allocation8 + $0x80] ss:$8 sps:$4 sm:$0xff]   ;;  %1343 = vmatprep.subr.bf16.mxu1 %v2248_v36  ;;  %v2254_v41 = vld [vmem:[#allocation8 + $0xa4] ss:$8 sps:$4 sm:$0xff]  }
 0x18f   :  { %v600_v55 = vadd.f32 %v592_v47, %v2682_v51  ;;  %v2307_v63 = vpop.eup %2306  ;;  %v590_v51 = vmul.f32 %v2305_v48, %v2700_v13  ;;  %1344 = vmatpush1.bf16.msra.mxu1 %v2246_v38  ;;  %v2252_v42 = vld [vmem:[#allocation8 + $0xa0] ss:$8 sps:$4 sm:$0xff]  }
 0x190   :  { %v603_v56 = vpack.c.bf16 %v599_v52, %v595_v50  ;;  %v2309_v0 = vpop.eup %2308  ;;  %v593_v2 = vmul.f32 %v2307_v63, %v535_v16  ;;  %v597_v3 = vadd.f32 %v589_v62, %v2698_v11  ;;  %v2194_v11 = vld [vmem:[#allocation7 + $0x164] ss:$8 sps:$4 sm:$0xff]   ;;  %1345 = vmatprep.subr.bf16.mxu1 %v2251_v39  ;;  %v2258_v47 = vld [vmem:[#allocation8 + $0xc0] ss:$8 sps:$4 sm:$0xff]   ;;  %v2263_v50 = vld [vmem:[#allocation8 + $0xd4] ss:$8 sps:$4 sm:$0xff]  }
 0x191   :  { %v604_v57 = vpack.c.bf16 %v600_v55, %v596_v54  ;;  %v594_v4 = vmul.f32 %v2309_v0, %v537_v19  ;;  %v598_v5 = vadd.f32 %v590_v51, %v2700_v13  ;;  %v2197_v13 = vld [vmem:[#allocation7 + $0x174] ss:$8 sps:$4 sm:$0xff]   ;;  %v2261_v52 = vld [vmem:[#allocation8 + $0xd0] ss:$8 sps:$4 sm:$0xff]   ;;  %v2264_v54 = vld [vmem:[#allocation8 + $0xe0] ss:$8 sps:$4 sm:$0xff]  }
 0x192   :  { %v601_v6 = vadd.f32 %v593_v2, %v535_v16  ;;  %v2195_v16 = vld [vmem:[#allocation7 + $0x170] ss:$8 sps:$4 sm:$0xff]   ;;  %v2269_v55 = vld [vmem:[#allocation8 + $0xf4] ss:$8 sps:$4 sm:$0xff]   ;;  %v2271_v36 = vld [vmem:[#allocation10] sm:$0xff]  }
 0x193   :  { %1035 = vmatprep.mubr.bf16.mxu0 %v604_v57  ;;  %v602_v8 = vadd.f32 %v594_v4, %v537_v19  ;;  %v2200_v19 = vld [vmem:[#allocation7 + $0x184] ss:$8 sps:$4 sm:$0xff]   ;;  %1346 = vmatpush1.bf16.msra.mxu1 %v2249_v40  ;;  %v671_v57 = vld [vmem:[%s2760_s4] sm:$0x3] }
 0x194   :  { %1036 = vmatmul.mubr.bf16.vlgmr.msra.gmra.mrb[4].mxu0 %v603_v56  ;;  %v605_v10 = vpack.c.bf16 %v601_v6, %v597_v3  ;;  %1347 = vmatprep.subr.bf16.mxu1 %v2254_v41  ;;  %v2267_v56 = vld [vmem:[#allocation8 + $0xf0] ss:$8 sps:$4 sm:$0xff]   ;;  %v2272_v38 = vld [vmem:[#allocation10 + $0x48] sm:$0xff]  }
 0x195   :  { %1047 = vmatpush1.bf16.msra.mxu0 %v2174_v58  ;;  %v606_v12 = vpack.c.bf16 %v602_v8, %v598_v5  ;;  %v676_v58 = vrot.slane %v671_v57, %v2665_v34  ;;  %v2273_v39 = vld [vmem:[#allocation10 + $0x8] sm:$0xff]   ;;  %v2274_v40 = vld [vmem:[#allocation10 + $0x50] sm:$0xff]  }
 0x196   :  { %1048 = vmatprep.subr.bf16.mxu0 %v2179_v59  ;;  %v680_v59 = vrot.slane %v671_v57, %v2670_v37  ;;  %v2275_v41 = vld [vmem:[#allocation10 + $0x10] sm:$0xff]  }
 0x197   :  { %1078 = vmatprep.mubr.bf16.mxu0 %v606_v12  ;;  %1348 = vmatpush1.bf16.msra.mxu1 %v2252_v42  ;;  %v2276_v42 = vld [vmem:[#allocation10 + $0x58] sm:$0xff]  }
 0x198   :  { %1349 = vmatprep.subr.bf16.mxu1 %v2257_v44  ;;  %v2277_v44 = vld [vmem:[#allocation10 + $0x18] sm:$0xff]  }
 0x199   :  { %1049 = vmatpush1.bf16.msra.mxu0 %v2177_v60 }
 0x19a   :  { %1050 = vmatprep.subr.bf16.mxu0 %v2182_v43 }
 0x19b   :  { %1350 = vmatpush1.bf16.msra.mxu1 %v2255_v46  ;;  %v2278_v46 = vld [vmem:[#allocation10 + $0x60] sm:$0xff]  }
 0x19c   :  { %1351 = vmatprep.subr.bf16.mxu1 %v2260_v49  ;;  %v2280_v49 = vld [vmem:[#allocation10 + $0x68] sm:$0xff]  }
 0x19d   :  { %1051 = vmatpush1.bf16.msra.mxu0 %v2180_v45 }
 0x19e   :  { %1052 = vmatprep.subr.bf16.mxu0 %v2185_v1 }
 0x19f   :  { %1352 = vmatpush1.bf16.msra.mxu1 %v2258_v47  ;;  %v2279_v47 = vld [vmem:[#allocation10 + $0x20] sm:$0xff]  }
 0x1a0   :  { %1353 = vmatprep.subr.bf16.mxu1 %v2263_v50  ;;  %v2281_v50 = vld [vmem:[#allocation10 + $0x28] sm:$0xff]  }
 0x1a1   :  { %1053 = vmatpush1.bf16.msra.mxu0 %v2183_v7 }
 0x1a2   :  { %1054 = vmatprep.subr.bf16.mxu0 %v2188_v9 }
 0x1a3   :  { %1354 = vmatpush1.bf16.msra.mxu1 %v2261_v52  ;;  %v2282_v52 = vld [vmem:[#allocation10 + $0x70] sm:$0xff]  }
 0x1a4   :  { %1355 = vmatprep.subr.bf16.mxu1 %v2266_v53  ;;  %v2283_v53 = vld [vmem:[#allocation10 + $0x30] sm:$0xff]  }
 0x1a5   :  { %1055 = vmatpush1.bf16.msra.mxu0 %v2186_v14 }
 0x1a6   :  { %1056 = vmatprep.subr.bf16.mxu0 %v2191_v15 }
 0x1a7   :  { %1356 = vmatpush1.bf16.msra.mxu1 %v2264_v54  ;;  %v2284_v54 = vld [vmem:[#allocation10 + $0x78] sm:$0xff]  }
 0x1a8   :  { %1357 = vmatprep.subr.bf16.mxu1 %v2269_v55  ;;  %v2285_v55 = vld [vmem:[#allocation10 + $0x38] sm:$0xff]  }
 0x1a9   :  { %1057 = vmatpush1.bf16.msra.mxu0 %v2189_v17 }
 0x1aa   :  { %1058 = vmatprep.subr.bf16.mxu0 %v2194_v11 }
 0x1ab   :  { %1358 = vmatpush1.bf16.msra.mxu1 %v2267_v56  ;;  %v1155_v56 = vld [vmem:[%s2762_s6] sm:$0x3] }
 0x1ac   :  { %v1160_v57 = vrot.slane %v1155_v56, %v2665_v34 }
 0x1ad   :  { %1059 = vmatpush1.bf16.msra.mxu0 %v2192_v18 }
 0x1ae   :  { %1060 = vmatprep.subr.bf16.mxu0 %v2197_v13 }
 0x1b1   :  { %1061 = vmatpush1.bf16.msra.mxu0 %v2195_v16 }
 0x1b2   :  { %1062 = vmatprep.subr.bf16.mxu0 %v2200_v19 }
 0x1b5   :  { %1063 = vmatpush1.bf16.msra.mxu0 %v2198_v20 }
 0x1b6   :  { %1064 = vmatprep.subr.bf16.mxu0 %v2203_v21 }
 0x1b9   :  { %1065 = vmatpush1.bf16.msra.mxu0 %v2201_v22 }
 0x1ba   :  { %1066 = vmatprep.subr.bf16.mxu0 %v2206_v23 }
 0x1bd   :  { %1067 = vmatpush1.bf16.msra.mxu0 %v2204_v24 }
 0x1be   :  { %1068 = vmatprep.subr.bf16.mxu0 %v2209_v25 }
 0x1c1   :  { %1069 = vmatpush1.bf16.msra.mxu0 %v2207_v26 }
 0x1c2   :  { %1070 = vmatprep.subr.bf16.mxu0 %v2212_v27 }
 0x1c5   :  { %1071 = vmatpush1.bf16.msra.mxu0 %v2210_v28 }
 0x1c6   :  { %1072 = vmatprep.subr.bf16.mxu0 %v2215_v29 }
 0x1c9   :  { %1073 = vmatpush1.bf16.msra.mxu0 %v2213_v30 }
 0x1ca   :  { %1074 = vmatprep.subr.bf16.mxu0 %v2218_v31 }
 0x1cd   :  { %1075 = vmatpush1.bf16.msra.mxu0 %v2216_v32 }
 0x1ce   :  { %1076 = vmatprep.subr.bf16.mxu0 %v2221_v33 }
 0x1d1   :  { %1077 = vmatpush1.bf16.msra.mxu0 %v2219_v35  ;;  %v2270_v35 = vld [vmem:[#allocation10 + $0x40] sm:$0xff]  }
 0x1d2   :  { %1967 = vmatprep.subr.bf16.mxu1 %v2270_v35  ;;  %v2288_v35 = vld [vmem:[#allocation11 + $0x10] sm:$0xff]  }
 0x1d4   :  { %1079 = vmatmul.mubr.bf16.vlgmr.msra.gmra.mrb[4].mxu0 %v605_v10 }
 0x2a7   :  { %v1080_v60 = vpop.f32.mrb[4].mxu0 }
 0x2a8   :  { %v2026_v43 = vadd.f32 %v1080_v60, %v676_v58  ;;  %v1082_v61 = vpop.f32.mrb[5].mxu0 }
 0x2a9   :  { %v2027_v48 = vadd.f32 %v1082_v61, %v680_v59  ;;  %v1084_v62 = vpop.f32.mrb[6].mxu0 }
 0x2aa   :  { %v1089_v63 = vmul.f32 0.044715, %v2026_v43  ;;  %v2028_v45 = vadd.f32 %v1084_v62, %v676_v58  ;;  %v1086_v51 = vpop.f32.mrb[7].mxu0  ;;  %v1164_v58 = vrot.slane %v1155_v56, %v2670_v37 }
 0x2ab   :  { %v1090_v0 = vmul.f32 0.044715, %v2027_v48  ;;  %v2029_v1 = vadd.f32 %v1086_v51, %v680_v59 }
 0x2ac   :  { %v1093_v2 = vmul.f32 %v2026_v43, %v1089_v63  ;;  %v1091_v3 = vmul.f32 0.044715, %v2028_v45 }
 0x2ad   :  { %v1094_v4 = vmul.f32 %v2027_v48, %v1090_v0  ;;  %v1092_v5 = vmul.f32 0.044715, %v2029_v1 }
 0x2ae   :  { %v1097_v6 = vmul.f32 %v2026_v43, %v1093_v2  ;;  %v1095_v7 = vmul.f32 %v2028_v45, %v1091_v3 }
 0x2af   :  { %v1098_v8 = vmul.f32 %v2027_v48, %v1094_v4  ;;  %v1096_v9 = vmul.f32 %v2029_v1, %v1092_v5 }
 0x2b0   :  { %v1101_v10 = vadd.f32 %v2026_v43, %v1097_v6  ;;  %v1099_v12 = vmul.f32 %v2028_v45, %v1095_v7 }
 0x2b1   :  { %v1102_v14 = vadd.f32 %v2027_v48, %v1098_v8  ;;  %v1100_v15 = vmul.f32 %v2029_v1, %v1096_v9 }
 0x2b2   :  { %v1105_v17 = vmul.f32 0.7978846, %v1101_v10  ;;  %v1103_v11 = vadd.f32 %v2028_v45, %v1099_v12 }
 0x2b3   :  { %v1106_v18 = vmul.f32 0.7978846, %v1102_v14  ;;  %v1104_v13 = vadd.f32 %v2029_v1, %v1100_v15 }
 0x2b4   :  { %2310 = vtanh.f32 %v1105_v17  ;;  %v1107_v16 = vmul.f32 0.7978846, %v1103_v11 }
 0x2b5   :  { %v1108_v19 = vmul.f32 0.7978846, %v1104_v13  ;;  %2312 = vtanh.f32 %v1106_v18 }
 0x2b6   :  { %2314 = vtanh.f32 %v1107_v16 }
 0x2b7   :  { %2316 = vtanh.f32 %v1108_v19 }
 0x2be   :  { %v2311_v20 = vpop.eup %2310 }
 0x2bf   :  { %v2313_v21 = vpop.eup %2312  ;;  %v1113_v22 = vmul.f32 %v2311_v20, %v2026_v43 }
 0x2c0   :  { %v2315_v23 = vpop.eup %2314  ;;  %v1114_v24 = vmul.f32 %v2313_v21, %v2027_v48 }
 0x2c1   :  { %v2317_v25 = vpop.eup %2316  ;;  %v1115_v26 = vmul.f32 %v2315_v23, %v2028_v45  ;;  %v1117_v28 = vadd.f32 %v2026_v43, %v1113_v22 }
 0x2c2   :  { %v1116_v27 = vmul.f32 %v2317_v25, %v2029_v1  ;;  %v1118_v30 = vadd.f32 %v2027_v48, %v1114_v24 }
 0x2c3   :  { %v1119_v29 = vadd.f32 %v2028_v45, %v1115_v26 }
 0x2c4   :  { %v1120_v31 = vadd.f32 %v2029_v1, %v1116_v27 }
 0x2c5   :  { %v1121_v32 = vpack.c.bf16 %v1119_v29, %v1117_v28 }
 0x2c6   :  { %v1122_v33 = vpack.c.bf16 %v1120_v31, %v1118_v30  ;;  %v2286_v31 = vld [vmem:[#allocation11] sm:$0xff]  }
 0x2c8   :  { %1359 = vmatprep.mubr.bf16.mxu1 %v1122_v33  ;;  %v2287_v33 = vld [vmem:[#allocation11 + $0x8] sm:$0xff]  }
 0x2c9   :  { %1360 = vmatmul.mubr.bf16.vlgmr.msra.gmra.mrb[4].mxu1 %v1121_v32  ;;  %v2510_v32 = vmov 0.0  }
 0x2ca   :  { %1968 = vmatpush3.bf16.msra.mxu1 %v2271_v36  ;;  %2020 = vmatprep.subr.bf16.mxu0 %v2510_v32  ;;  %v2289_v36 = vld [vmem:[#allocation11 + $0x18] sm:$0xff]  }
 0x2cb   :  { %1969 = vmatprep.subr.bf16.mxu1 %v2272_v38  ;;  %v2290_v38 = vld [vmem:[#allocation11 + $0x20] sm:$0xff]   ;;  %2022 = vmatprep.mubr.msk.bf16.mxu0 %vm2511_vm1, %v2510_v32 }
 0x2ce   :  { %1970 = vmatpush3.bf16.msra.mxu1 %v2273_v39  ;;  %v2291_v39 = vld [vmem:[#allocation11 + $0x28] sm:$0xff]  }
 0x2cf   :  { %1971 = vmatprep.subr.bf16.mxu1 %v2274_v40  ;;  %v2292_v40 = vld [vmem:[#allocation11 + $0x30] sm:$0xff]  }
 0x2d2   :  { %1972 = vmatpush3.bf16.msra.mxu1 %v2275_v41  ;;  %v2293_v41 = vld [vmem:[#allocation11 + $0x38] sm:$0xff]  }
 0x2d3   :  { %1973 = vmatprep.subr.bf16.mxu1 %v2276_v42 }
 0x2d6   :  { %1974 = vmatpush3.bf16.msra.mxu1 %v2277_v44  ;;  %v1941_v44 = vld [vmem:[%s2764_s8] ss:$0 sm:$0xff] }
 0x2d7   :  { %1975 = vmatprep.subr.bf16.mxu1 %v2278_v46 }
 0x2da   :  { %1976 = vmatpush3.bf16.msra.mxu1 %v2279_v47 }
 0x2db   :  { %1977 = vmatprep.subr.bf16.mxu1 %v2280_v49 }
 0x2de   :  { %1978 = vmatpush3.bf16.msra.mxu1 %v2281_v50 }
 0x2df   :  { %1979 = vmatprep.subr.bf16.mxu1 %v2282_v52 }
 0x2e2   :  { %1980 = vmatpush3.bf16.msra.mxu1 %v2283_v53 }
 0x2e3   :  { %1981 = vmatprep.subr.bf16.mxu1 %v2284_v54 }
 0x2e6   :  { %1982 = vmatpush3.bf16.msra.mxu1 %v2285_v55 }
 0x2e7   :  { %2000 = vmatprep.subr.bf16.mxu1 %v2510_v32 }
 0x39c   :  { %v1361_v59 = vpop.f32.mrb[4].mxu1 }
 0x39d   :  { %v1362_v60 = vadd.f32 %v1361_v59, %v1160_v57  ;;  %v1363_v43 = vpop.f32.mrb[5].mxu1 }
 0x39e   :  { %v1364_v61 = vadd.f32 %v1363_v43, %v1164_v58  ;;  %v1365_v48 = vpop.f32.mrb[6].mxu1 }
 0x39f   :  { %v1370_v62 = vmul.f32 0.044715, %v1362_v60  ;;  %v1366_v63 = vadd.f32 %v1365_v48, %v1160_v57  ;;  %v1367_v45 = vpop.f32.mrb[7].mxu1 }
 0x3a0   :  { %v1371_v51 = vmul.f32 0.044715, %v1364_v61  ;;  %v1368_v0 = vadd.f32 %v1367_v45, %v1164_v58 }
 0x3a1   :  { %v1374_v1 = vmul.f32 %v1370_v62, %v1362_v60  ;;  %v1372_v2 = vmul.f32 0.044715, %v1366_v63 }
 0x3a2   :  { %v1375_v3 = vmul.f32 %v1371_v51, %v1364_v61  ;;  %v1373_v4 = vmul.f32 0.044715, %v1368_v0 }
 0x3a3   :  { %v1378_v5 = vmul.f32 %v1374_v1, %v1362_v60  ;;  %v1376_v6 = vmul.f32 %v1372_v2, %v1366_v63 }
 0x3a4   :  { %v1379_v7 = vmul.f32 %v1375_v3, %v1364_v61  ;;  %v1377_v34 = vmul.f32 %v1373_v4, %v1368_v0  ;;  %v1727_v4 = vld [vmem:[%s2768_s12] sm:$0xff] }
 0x3a5   :  { %v1382_v8 = vadd.f32 %v1378_v5, %v1362_v60  ;;  %v1380_v37 = vmul.f32 %v1376_v6, %v1366_v63  ;;  %v2512_v5 = vmov 0   ;;  %v1958_v6 = vld [vmem:[%s2766_s10] ss:$0 sm:$0xff] }
 0x3a6   :  { %v1383_v9 = vadd.f32 %v1379_v7, %v1364_v61  ;;  %v1381_v10 = vmul.f32 %v1377_v34, %v1368_v0  ;;  %2050 = vset.pattern.permute.xlu0 %v2512_v5 }
 0x3a7   :  { %v1386_v12 = vmul.f32 0.7978846, %v1382_v8  ;;  %v1384_v14 = vadd.f32 %v1380_v37, %v1366_v63  ;;  %1730 = vperm.xlu0 %2050, %v1727_v4  }
 0x3a8   :  { %v1387_v15 = vmul.f32 0.7978846, %v1383_v9  ;;  %v1385_v17 = vadd.f32 %v1381_v10, %v1368_v0 }
 0x3a9   :  { %2318 = vtanh.f32 %v1386_v12  ;;  %v1388_v11 = vmul.f32 0.7978846, %v1384_v14 }
 0x3aa   :  { %v1389_v18 = vmul.f32 0.7978846, %v1385_v17  ;;  %2320 = vtanh.f32 %v1387_v15 }
 0x3ab   :  { %2322 = vtanh.f32 %v1388_v11 }
 0x3ac   :  { %2324 = vtanh.f32 %v1389_v18 }
 0x3b3   :  { %v2319_v13 = vpop.eup %2318 }
 0x3b4   :  { %v2321_v16 = vpop.eup %2320  ;;  %v1394_v19 = vmul.f32 %v2319_v13, %v1362_v60 }
 0x3b5   :  { %v2323_v20 = vpop.eup %2322  ;;  %v1395_v21 = vmul.f32 %v2321_v16, %v1364_v61 }
 0x3b6   :  { %v2325_v22 = vpop.eup %2324  ;;  %v1396_v23 = vmul.f32 %v2323_v20, %v1366_v63  ;;  %v1398_v25 = vadd.f32 %v1394_v19, %v1362_v60 }
 0x3b7   :  { %v1397_v24 = vmul.f32 %v2325_v22, %v1368_v0  ;;  %v1399_v27 = vadd.f32 %v1395_v21, %v1364_v61 }
 0x3b8   :  { %v1400_v26 = vadd.f32 %v1396_v23, %v1366_v63 }
 0x3b9   :  { %v1401_v28 = vadd.f32 %v1397_v24, %v1368_v0 }
 0x3ba   :  { %v1402_v29 = vpack.c.bf16 %v1400_v26, %v1398_v25 }
 0x3bb   :  { %v1403_v30 = vpack.c.bf16 %v1401_v28, %v1399_v27  ;;  %v1726_v28 = vld [vmem:[%s2767_s11] sm:$0xf] }
 0x3bd   :  { %1571 = vmatprep.mubr.bf16.mxu1 %v1403_v30 }
 0x3be   :  { %1572 = vmatmul.mubr.bf16.vlgmr.msra.gmra.mrb[8].mxu1 %v1402_v29 }
 0x3bf   :  { %2001 = vmatpush3.bf16.msra.mxu1 %v2286_v31  ;;  %2016 = vmatprep.mubr.msk.bf16.mxu1 %vm2511_vm1, %v2510_v32 }
 0x3c0   :  { %2002 = vmatprep.subr.bf16.mxu1 %v2510_v32 }
 0x3c3   :  { %2003 = vmatpush3.bf16.msra.mxu1 %v2287_v33 }
 0x3c4   :  { %2004 = vmatprep.subr.bf16.mxu1 %v2510_v32 }
 0x3c7   :  { %2005 = vmatpush3.bf16.msra.mxu1 %v2288_v35 }
 0x3c8   :  { %2006 = vmatprep.subr.bf16.mxu1 %v2510_v32 }
 0x3cb   :  { %2007 = vmatpush3.bf16.msra.mxu1 %v2289_v36 }
 0x3cc   :  { %2008 = vmatprep.subr.bf16.mxu1 %v2510_v32 }
 0x3cf   :  { %2009 = vmatpush3.bf16.msra.mxu1 %v2290_v38 }
 0x3d0   :  { %2010 = vmatprep.subr.bf16.mxu1 %v2510_v32 }
 0x3d3   :  { %2011 = vmatpush3.bf16.msra.mxu1 %v2291_v39 }
 0x3d4   :  { %2012 = vmatprep.subr.bf16.mxu1 %v2510_v32 }
 0x3d7   :  { %2013 = vmatpush3.bf16.msra.mxu1 %v2292_v40 }
 0x3d8   :  { %2014 = vmatprep.subr.bf16.mxu1 %v2510_v32 }
 0x3db   :  { %2015 = vmatpush3.bf16.msra.mxu1 %v2293_v41 }
 0x426   :  { %v1731_v29 = vpop.permute.xlu0 %1730 }
 0x491   :  { %v1983_v42 = vpop.f32.mrb[8].mxu1 }
 0x492   :  { %v1984_v46 = vpop.f32.mrb[9].mxu1 }
 0x493   :  { %v1985_v47 = vadd.f32 %v1984_v46, %v1983_v42  ;;  %v1986_v49 = vpop.f32.mrb[10].mxu1 }
 0x494   :  { %v1987_v50 = vpop.f32.mrb[11].mxu1 }
 0x495   :  { %v1574_v52 = vadd.f32 %v1985_v47, %v1941_v44  ;;  %v1988_v53 = vadd.f32 %v1987_v50, %v1986_v49 }
 0x497   :  { %v1580_v54 = vmul.f32 0.044715, %v1574_v52  ;;  %v1577_v55 = vadd.f32 %v1988_v53, %v1941_v44 }
 0x499   :  { %v1582_v56 = vmul.f32 %v1580_v54, %v1574_v52  ;;  %v1581_v57 = vmul.f32 0.044715, %v1577_v55 }
 0x49b   :  { %v1584_v58 = vmul.f32 %v1582_v56, %v1574_v52  ;;  %v1583_v59 = vmul.f32 %v1581_v57, %v1577_v55 }
 0x49d   :  { %v1586_v60 = vadd.f32 %v1584_v58, %v1574_v52  ;;  %v1585_v43 = vmul.f32 %v1583_v59, %v1577_v55 }
 0x49f   :  { %v1588_v61 = vmul.f32 0.7978846, %v1586_v60  ;;  %v1587_v48 = vadd.f32 %v1585_v43, %v1577_v55 }
 0x4a1   :  { %2326 = vtanh.f32 %v1588_v61  ;;  %v1589_v62 = vmul.f32 0.7978846, %v1587_v48 }
 0x4a3   :  { %2328 = vtanh.f32 %v1589_v62 }
 0x4ab   :  { %v2327_v63 = vpop.eup %2326 }
 0x4ac   :  { %v1592_v45 = vmul.f32 %v2327_v63, %v1574_v52 }
 0x4ad   :  { %v2329_v51 = vpop.eup %2328 }
 0x4ae   :  { %v1593_v0 = vmul.f32 %v2329_v51, %v1577_v55  ;;  %v1594_v1 = vadd.f32 %v1592_v45, %v1574_v52 }
 0x4b0   :  { %v1595_v2 = vadd.f32 %v1593_v0, %v1577_v55 }
 0x4b2   :  { %v1596_v3 = vpack.c.bf16 %v1595_v2, %v1594_v1 }
 0x4b4   :  { %2017 = vmatmul.mubr.bf16.vlgmr.msra.gmra.mrb[12].mxu1 %v1596_v3 }
 0x587   :  { %v1702_v7 = vpop.f32.mrb[12].mxu1 }
 0x588   :  { %v1703_v34 = vadd.f32 %v1958_v6, %v1702_v7  ;;  %v2018_v8 = vpop.f32.mrb[13].mxu1 }
 0x589   :  { %v1705_v37 = vpop.f32.mrb[14].mxu1 }
 0x58a   :  { %v1709_v9 = vmul.f32 0.044715, %v1703_v34  ;;  %v1706_v10 = vadd.f32 %v1958_v6, %v1705_v37  ;;  %v2019_v12 = vpop.f32.mrb[15].mxu1 }
 0x58c   :  { %v1711_v14 = vmul.f32 %v1709_v9, %v1703_v34  ;;  %v1710_v15 = vmul.f32 0.044715, %v1706_v10 }
 0x58e   :  { %v1713_v17 = vmul.f32 %v1711_v14, %v1703_v34  ;;  %v1712_v11 = vmul.f32 %v1710_v15, %v1706_v10 }
 0x590   :  { %v1715_v18 = vadd.f32 %v1713_v17, %v1703_v34  ;;  %v1714_v13 = vmul.f32 %v1712_v11, %v1706_v10 }
 0x592   :  { %v1717_v16 = vmul.f32 0.7978846, %v1715_v18  ;;  %v1716_v19 = vadd.f32 %v1714_v13, %v1706_v10 }
 0x594   :  { %2330 = vtanh.f32 %v1717_v16  ;;  %v1718_v20 = vmul.f32 0.7978846, %v1716_v19 }
 0x596   :  { %2332 = vtanh.f32 %v1718_v20 }
 0x59e   :  { %v2331_v21 = vpop.eup %2330 }
 0x59f   :  { %v1721_v22 = vmul.f32 %v2331_v21, %v1703_v34 }
 0x5a0   :  { %v2333_v23 = vpop.eup %2332 }
 0x5a1   :  { %v1722_v24 = vmul.f32 %v2333_v23, %v1706_v10  ;;  %v1723_v25 = vadd.f32 %v1721_v22, %v1703_v34 }
 0x5a3   :  { %v1724_v26 = vadd.f32 %v1722_v24, %v1706_v10 }
 0x5a5   :  { %v1725_v27 = vpack.c.bf16 %v1724_v26, %v1723_v25 }
 0x5a7   :  { %2021 = vmatpush3.bf16.xpose.msra.mxu0 %v1725_v27 }
 0x5ae   :  { %2023 = vmatmul.mubr.bf16.vlgmr.msra.gmra.mrb[8].mxu0 %v1726_v28 }
 0x681   :  { %v1767_v30 = vpop.f32.mrb[8].mxu0 }
 0x682   :  { %v1768_v31 = vadd.f32 %v1767_v30, %v1731_v29  ;;  %v2024_v32 = vpop.f32.mrb[9].mxu0 }
 0x683   :  { %v1770_v33 = vpop.f32.mrb[10].mxu0 }
 0x684   :  { %v2025_v35 = vpop.f32.mrb[11].mxu0  ;;  %1774 = vst.msk [vmem:[#allocation13] sm:$0xff] %vm1773_vm2, %v1768_v31 }
 0x685   :  { %2477 = shalt.err (!%p2474_p10)
}
 0x686   :  { %s2478_s21 = scalar_lea.hbm %s2769_s13, 128 }
 0x687   :  { %p2479_p11 = scmp.ne.s32.totalorder %s2769_s13, %s2478_s21  ;;  %p2482_p12 = scmp.lt.u32.totalorder %s2478_s21, %s2769_s13 }
 0x689   :  { %p2484_p13 = pnand %p2482_p12, %p2479_p11 }
 0x68b   :  { %2487 = shalt.err (!%p2484_p13)
}
 0x68c   :  { %1784 = dma.vmem_to_hbm [thread:$0]  %s1782_s17, 128, %s2769_s13, [#allocation4]  }
 0x68d   :  { %2496 = dma.done.wait [#allocation4], 128  }
 0x68e   :  { %2497 = vsyncadd [#allocation4], 4294967168 }
 0x68f   :  { %1788 = vsyncpa [#allocation3], 1 }
 0x690   :  { %1789 = vsyncpa [#allocation6], 1 }
 0x691   :  { %1790 = vsyncpa [#allocation9], 1 }
 0x692   :  { %1791 = vsyncpa [#allocation12], 1 }
 0x693   :  { %1792 = vsyncpa [#allocation4], 1 }

</bundles_post_ra>
